<compile_context>
chip_gen: v7x
topology: tpu7x:2x2x1
jax: 0.10.0
libtpu: 0.0.40
codegen_flags: <defaults>
</compile_context>

<pallas_src>
import functools

import jax
import jax.numpy as jnp
from jax import lax
from jax.experimental import pallas as pl
from jax.experimental.pallas import tpu as pltpu

EMBED_DIM = 768
HIDDEN = 100      # logical hidden size (PyTorch hidden_dim)
HP = 128          # hidden padded to the 128-lane vreg width
SUBLANE = 8       # batch padded to a multiple of the 8-sublane vreg height
TBLK_MAX = 64     # max timesteps per grid block (sized for v7x's 64 MiB VMEM with headroom)

# PyTorch LSTM stacks gate rows as [i, f, g, o]; the kernel uses [i, f, o, g] (forward) so a
# single sigmoid covers a contiguous 3*Hp slice, and [i, o, g] (backward last-step only).
_PT_I, _PT_F, _PT_G, _PT_O = 0, 1, 2, 3
_FWD_ORDER = (_PT_I, _PT_F, _PT_O, _PT_G)
_BWD_ORDER = (_PT_I, _PT_O, _PT_G)


def _round_up(x, m):
    return ((x + m - 1) // m) * m


def _make_kernel(T, t_blk, bp, hp, n_blocks):
    """Build the time-streamed BiLSTM-last-step kernel (closure over static tiling)."""
    needs_mask = (n_blocks * t_blk) != T   # last block contains padded timesteps

    def kernel(x_ref, x_last_ref, wih_f_ref, b_f_ref, whh_f_ref, wih_b_ref, b_b_ref,
               out_ref, gx_ref, h_ref, c_ref):
        # x_ref      (t_blk*bp, E)   this block of time-major embedded inputs
        # x_last_ref (bp, E)         embeddings of the last valid timestep (resident)
        # wih_f_ref  (E, 4*hp)       forward input weights, gate order [i,f,o,g] (resident)
        # b_f_ref    (1, 4*hp)       forward bias (b_ih + b_hh), fp32 (resident)
        # whh_f_ref  (hp, 4*hp)      forward recurrent weights (resident)
        # wih_b_ref  (E, 3*hp)       backward input weights, gate order [i,o,g] (resident)
        # b_b_ref    (1, 3*hp)       backward bias, fp32 (resident)
        # out_ref    (bp, 2*hp)      [h_fwd(T-1) | h_bwd at t=T-1]
        # gx_ref     (t_blk*bp, 4*hp) scratch: precomputed forward input gates (this block)
        # h_ref/c_ref (bp, hp)       fp32 recurrent carry across grid steps
        tb = pl.program_id(0)

        # ---- zero the (h, c) carry at the first time block ----
        @pl.when(tb == 0)
        def _():
            h_ref[...] = jnp.zeros_like(h_ref)
            c_ref[...] = jnp.zeros_like(c_ref)

        # ---- forward-direction input projection for this block of timesteps ----
        # One (t_blk*bp, E) x (E, 4*hp) MXU matmul (fp32 accumulation), bias folded in,
        # written straight into the gate scratch: no separate intermediate + copy pass.
        gx_ref[...] = (jnp.dot(x_ref[...], wih_f_ref[...],
                               preferred_element_type=jnp.float32)
                       + b_f_ref[...]).astype(gx_ref.dtype)

        # ---- serial recurrence over the timesteps of this block ----
        w_dt = whh_f_ref.dtype

        def step(t, carry):
            h, c = carry
            row = pl.multiple_of(t * bp, bp)               # aligned scratch read
            g = gx_ref[pl.ds(row, bp), :].astype(jnp.float32) + jnp.dot(
                h.astype(w_dt), whh_f_ref[...], preferred_element_type=jnp.float32)
            # gate order [i, f, o, g]: one contiguous sigmoid, one tanh (lane-aligned slices)
            s = jax.nn.sigmoid(g[:, 0:3 * hp])
            gg = jnp.tanh(g[:, 3 * hp:4 * hp])
            i_g = s[:, 0:hp]
            f_g = s[:, hp:2 * hp]
            o_g = s[:, 2 * hp:3 * hp]
            c_new = f_g * c + i_g * gg
            h_new = o_g * jnp.tanh(c_new)
            if needs_mask:                                 # trace-time flag; only last block
                valid = (tb * t_blk + t) < T               # padded steps keep (h, c)
                h_new = jnp.where(valid, h_new, h)
                c_new = jnp.where(valid, c_new, c)
            return h_new, c_new

        h, c = lax.fori_loop(0, t_blk, step, (h_ref[...], c_ref[...]),
                             unroll=min(8, t_blk))
        h_ref[...] = h
        c_ref[...] = c

        # ---- last block: reverse direction at the last timestep + output store ----
        @pl.when(tb == n_blocks - 1)
        def _():
            # Reverse scan's first step from zero state: only [i, o, g] gates are needed.
            gb = jnp.dot(x_last_ref[...], wih_b_ref[...],
                         preferred_element_type=jnp.float32) + b_b_ref[...]
            sb = jax.nn.sigmoid(gb[:, 0:2 * hp])
            g_b = jnp.tanh(gb[:, 2 * hp:3 * hp])
            h_bwd = sb[:, hp:2 * hp] * jnp.tanh(sb[:, 0:hp] * g_b)
            # Lane-dense, 128-aligned output stores.
            out_ref[:, 0:hp] = h
            out_ref[:, hp:2 * hp] = h_bwd

    return kernel


def bilstm_last_hidden(token_ids, emb_w, packed_params, *,
                       matmul_dtype=jnp.bfloat16, tblk_max=TBLK_MAX):
    """token_ids: (B, T) int32 -> (B, 2*HIDDEN) float32 via one Pallas kernel.

    matmul_dtype=bfloat16 (default) keeps fp32 accumulation but halves MXU operand /
    activation bytes; pass jnp.float32 for bit-accurate comparisons against the reference.
    """
    B, T = token_ids.shape
    wih_f, b_f, whh_f, wih_b, b_b = packed_params
    E = wih_f.shape[0]
    hp = whh_f.shape[0]
    bp = _round_up(max(B, SUBLANE), SUBLANE)

    # Time tiling: n_blocks grid steps of t_blk timesteps each; the (<= n_blocks - 1) padded
    # steps in the final block are masked inside the recurrence.
    n_blocks = pl.cdiv(T, min(T, max(1, tblk_max)))
    t_blk = pl.cdiv(T, n_blocks)
    t_pad = n_blocks * t_blk

    # Time-major rearrangement + padding on the int32 ids (B*T*4 bytes), not on the
    # (B, T, 768) f32 embeddings; the gather then lands directly in kernel layout.
    ids_tm = jnp.pad(token_ids.T, ((0, t_pad - T), (0, bp - B)))          # (t_pad, bp)
    x_tm = jnp.take(emb_w, ids_tm.reshape(-1), axis=0).astype(matmul_dtype)   # (t_pad*bp, E)
    ids_last = jnp.pad(token_ids[:, T - 1], (0, bp - B))                  # (bp,)
    x_last = jnp.take(emb_w, ids_last, axis=0).astype(matmul_dtype)       # (bp, E)

    # bf16 gate scratch halves the per-step vector-load bytes on the serial path, but only
    # stays sublane-packing-aligned when the per-timestep row slab (bp rows) is a multiple
    # of 16; otherwise keep the scratch fp32 (elementwise math is fp32 in all cases).
    if jnp.dtype(matmul_dtype).itemsize == 2 and bp % 16 == 0:
        gx_dtype = matmul_dtype
    else:
        gx_dtype = jnp.float32

    isz = jnp.dtype(matmul_dtype).itemsize
    gsz = jnp.dtype(gx_dtype).itemsize
    est = (2 * t_blk * bp * E * isz                                   # double-buffered x block
           + 2 * bp * E * isz                                         # resident last-step rows
           + 2 * (E * 4 * hp + hp * 4 * hp + E * 3 * hp) * isz        # resident weights
           + 2 * 7 * hp * 4                                           # biases (fp32)
           + t_blk * bp * 4 * hp * gsz                                # forward gate scratch
           + 2 * bp * hp * 4                                          # (h, c) carry
           + 2 * bp * 2 * hp * 4)                                     # output block
    vmem_limit = int(min(64 << 20, max(32 << 20, 2 * est)))           # capped at v7x's 64 MiB

    kernel = _make_kernel(T, t_blk, bp, hp, n_blocks)
    wconst = lambda i: (0, 0)   # constant block index -> fetched once, stays VMEM-resident

    out_p = pl.pallas_call(
        kernel,
        out_shape=jax.ShapeDtypeStruct((bp, 2 * hp), jnp.float32),
        grid=(n_blocks,),
        in_specs=[
            pl.BlockSpec((t_blk * bp, E), lambda i: (i, 0)),   # streamed time-major input
            pl.BlockSpec((bp, E), wconst),                     # last-timestep rows
            pl.BlockSpec((E, 4 * hp), wconst),                 # fwd W_ih
            pl.BlockSpec((1, 4 * hp), wconst),                 # fwd bias
            pl.BlockSpec((hp, 4 * hp), wconst),                # fwd W_hh
            pl.BlockSpec((E, 3 * hp), wconst),                 # bwd W_ih (i,o,g only)
            pl.BlockSpec((1, 3 * hp), wconst),                 # bwd bias (i,o,g only)
        ],
        out_specs=pl.BlockSpec((bp, 2 * hp), lambda i: (0, 0)),
        scratch_shapes=[
            pltpu.VMEM((t_blk * bp, 4 * hp), gx_dtype),        # precomputed fwd gates
            pltpu.VMEM((bp, hp), jnp.float32),                 # h carry
            pltpu.VMEM((bp, hp), jnp.float32),                 # c carry
        ],
        compiler_params=pltpu.CompilerParams(
            dimension_semantics=("arbitrary",),                # serial recurrence over time
            vmem_limit_bytes=vmem_limit),
    )(x_tm, x_last,
      wih_f.astype(matmul_dtype), b_f,
      whh_f.astype(matmul_dtype),
      wih_b.astype(matmul_dtype), b_b)

    # Un-pad: logical layout is [h_fwd[:H], h_bwd[:H]], matching PyTorch's output[:, -1, :].
    return jnp.concatenate([out_p[:B, :HIDDEN], out_p[:B, hp:hp + HIDDEN]], axis=-1)


def _pack_gate_rows(w, order, h, hp):
    """(4h, ...) PyTorch gate-stacked tensor -> (len(order)*hp, ...), reordered + zero-padded.

    The zero padding is a correctness invariant: padded hidden lanes keep gate pre-activations
    exactly 0 (sigmoid->0.5, tanh->0), so c and h stay exactly 0 in the padded lanes.
    """
    blocks = []
    for g in order:
        blk = w[g * h:(g + 1) * h]
        pad = [(0, hp - h)] + [(0, 0)] * (w.ndim - 1)
        blocks.append(jnp.pad(blk, pad))
    return jnp.concatenate(blocks, axis=0)


def pack_lstm_params(wih_f, whh_f, bih_f, bhh_f, wih_b, whh_b, bih_b, bhh_b,
                     hidden=HIDDEN, hp=HP):
    """Repack PyTorch-native LSTM tensors into the padded/reordered layout the kernel expects."""
    del whh_b  # reverse direction only ever runs from zero state -> h0 @ whh_b == 0

    wih_f_p = _pack_gate_rows(wih_f, _FWD_ORDER, hidden, hp).T                    # (E, 4Hp)
    b_f = _pack_gate_rows((bih_f + bhh_f)[:, None], _FWD_ORDER, hidden, hp).T     # (1, 4Hp)

    whh_f_p = _pack_gate_rows(whh_f, _FWD_ORDER, hidden, hp)                      # (4Hp, H)
    whh_f_p = jnp.pad(whh_f_p, ((0, 0), (0, hp - hidden))).T                      # (Hp, 4Hp)

    wih_b_p = _pack_gate_rows(wih_b, _BWD_ORDER, hidden, hp).T                    # (E, 3Hp)
    b_b = _pack_gate_rows((bih_b + bhh_b)[:, None], _BWD_ORDER, hidden, hp).T     # (1, 3Hp)
    return wih_f_p, b_f, whh_f_p, wih_b_p, b_b


def init_params(key, num_vocab, embed_dim=EMBED_DIM, hidden=HIDDEN):
    """Deterministic synthetic parameters with PyTorch-shaped tensors, then repacked."""
    keys = jax.random.split(key, 9)
    emb_w = 0.02 * jax.random.normal(keys[0], (num_vocab, embed_dim), jnp.float32)
    k = 1.0 / jnp.sqrt(jnp.float32(hidden))

    def u(kk, shape):
        return jax.random.uniform(kk, shape, jnp.float32, -k, k)

    raw = dict(
        wih_f=u(keys[1], (4 * hidden, embed_dim)),
        whh_f=u(keys[2], (4 * hidden, hidden)),
        bih_f=u(keys[3], (4 * hidden,)),
        bhh_f=u(keys[4], (4 * hidden,)),
        wih_b=u(keys[5], (4 * hidden, embed_dim)),
        whh_b=u(keys[6], (4 * hidden, hidden)),
        bih_b=u(keys[7], (4 * hidden,)),
        bhh_b=u(keys[8], (4 * hidden,)),
    )
    packed = pack_lstm_params(**raw)
    return emb_w, packed, raw


def forward(token_ids, emb_w, packed_params, **kw):
    # TODO(synk): tokenizer (string -> input_ids) has no Pallas equivalent; integer token
    #             ids are consumed directly. Embedding gather runs in JAX on time-major ids.
    return bilstm_last_hidden(token_ids, emb_w, packed_params, **kw)   # (B, 2*HIDDEN)


def ref_forward(token_ids, emb_w, raw):
    """Pure-JAX reference of the original (unpadded) math for the correctness check."""
    x = jnp.take(emb_w, token_ids, axis=0).astype(jnp.float32)
    B, T, _ = x.shape
    H = HIDDEN

    def cell(x_t, h, c, wih, whh, b):
        g = x_t @ wih.T + h @ whh.T + b
        i = jax.nn.sigmoid(g[:, :H])
        f = jax.nn.sigmoid(g[:, H:2 * H])
        gg = jnp.tanh(g[:, 2 * H:3 * H])
        o = jax.nn.sigmoid(g[:, 3 * H:])
        c = f * c + i * gg
        return o * jnp.tanh(c), c

    h = jnp.zeros((B, H), jnp.float32)
    c = jnp.zeros((B, H), jnp.float32)
    for t in range(T):
        h, c = cell(x[:, t], h, c, raw["wih_f"], raw["whh_f"], raw["bih_f"] + raw["bhh_f"])
    hb, _ = cell(x[:, -1], jnp.zeros((B, H)), jnp.zeros((B, H)),
                 raw["wih_b"], raw["whh_b"], raw["bih_b"] + raw["bhh_b"])
    return jnp.concatenate([h, hb], axis=-1)


if __name__ == "__main__":
    key = jax.random.PRNGKey(0)
    k_param, k_ids = jax.random.split(key)

    NUM_VOCAB = 1000
    B, T = 2, 8

    emb_w, packed, raw = init_params(k_param, NUM_VOCAB)
    token_ids = jax.random.randint(k_ids, (B, T), 0, NUM_VOCAB, dtype=jnp.int32)

    ref = jax.block_until_ready(ref_forward(token_ids, emb_w, raw))

    # 1) fp32 MXU path, single time block: tight tolerance vs. pure-JAX reference.
    f32_fn = jax.jit(functools.partial(forward, matmul_dtype=jnp.float32))
    out_f32 = jax.block_until_ready(f32_fn(token_ids, emb_w, packed))
    assert out_f32.shape == (B, 2 * HIDDEN), out_f32.shape
    assert jnp.allclose(out_f32, ref, atol=2e-4, rtol=2e-4), \
        float(jnp.max(jnp.abs(out_f32 - ref)))

    # 2) fp32 path with a forced 3-block time grid (exercises streaming + padded-step mask).
    stream_fn = jax.jit(functools.partial(forward, matmul_dtype=jnp.float32, tblk_max=3))
    out_stream = jax.block_until_ready(stream_fn(token_ids, emb_w, packed))
    assert jnp.allclose(out_stream, ref, atol=2e-4, rtol=2e-4), \
        float(jnp.max(jnp.abs(out_stream - ref)))

    # 3) default bf16-operand path (fp32 accumulation): looser tolerance for bf16 rounding.
    bf16_fn = jax.jit(forward)
    out_bf16 = jax.block_until_ready(bf16_fn(token_ids, emb_w, packed))
    assert out_bf16.shape == (B, 2 * HIDDEN), out_bf16.shape
    assert jnp.allclose(out_bf16, ref, atol=3e-2, rtol=3e-2), \
        float(jnp.max(jnp.abs(out_bf16 - ref)))

    print("KERNEL_OK")
</pallas_src>

<mosaic_0001>
module attributes {stable_mosaic.version = 11 : i64} {
  func.func @kernel(%arg0: i32, %arg1: memref<64x768xf32, #tpu.memory_space<vmem>>, %arg2: memref<8x768xf32, #tpu.memory_space<vmem>>, %arg3: memref<768x512xf32, #tpu.memory_space<vmem>>, %arg4: memref<1x512xf32, #tpu.memory_space<vmem>>, %arg5: memref<128x512xf32, #tpu.memory_space<vmem>>, %arg6: memref<768x384xf32, #tpu.memory_space<vmem>>, %arg7: memref<1x384xf32, #tpu.memory_space<vmem>>, %arg8: memref<8x256xf32, #tpu.memory_space<vmem>>, %arg9: memref<64x512xf32, #tpu.memory_space<vmem>>, %arg10: memref<8x128xf32, #tpu.memory_space<vmem>>, %arg11: memref<8x128xf32, #tpu.memory_space<vmem>>) attributes {dimension_semantics = [#tpu.dimension_semantics<arbitrary>], iteration_bounds = array<i64: 1>, scalar_prefetch = 0 : i64, scratch_operands = 3 : i64, tpu.core_type = #tpu.core_type<tc>, window_params = [{transform_indices = @transform_0, window_bounds = array<i64: 64, 768>}, {pipeline_mode = #tpu.pipeline_mode<synchronous>, transform_indices = @transform_1, window_bounds = array<i64: 8, 768>}, {pipeline_mode = #tpu.pipeline_mode<synchronous>, transform_indices = @transform_2, window_bounds = array<i64: 768, 512>}, {pipeline_mode = #tpu.pipeline_mode<synchronous>, transform_indices = @transform_3, window_bounds = array<i64: 1, 512>}, {pipeline_mode = #tpu.pipeline_mode<synchronous>, transform_indices = @transform_4, window_bounds = array<i64: 128, 512>}, {pipeline_mode = #tpu.pipeline_mode<synchronous>, transform_indices = @transform_5, window_bounds = array<i64: 768, 384>}, {pipeline_mode = #tpu.pipeline_mode<synchronous>, transform_indices = @transform_6, window_bounds = array<i64: 1, 384>}, {pipeline_mode = #tpu.pipeline_mode<synchronous>, transform_indices = @transform_7, window_bounds = array<i64: 8, 256>}]} {
    %c0_i32 = arith.constant 0 : i32
    %0 = arith.cmpi eq, %arg0, %c0_i32 : i32
    %1 = arith.extui %0 : i1 to i32
    %c0_i32_0 = arith.constant 0 : i32
    %2 = arith.cmpi ne, %1, %c0_i32_0 : i32
    scf.if %2 {
      %cst_67 = arith.constant 0.000000e+00 : f32
      %201 = vector.broadcast %cst_67 : f32 to vector<8x128xf32>
      %c0_68 = arith.constant 0 : index
      %c0_69 = arith.constant 0 : index
      %202 = vector.load %arg10[%c0_68, %c0_69] : memref<8x128xf32, #tpu.memory_space<vmem>>, vector<8x128xf32>
      tpu.vector_store %arg10[%c0_68, %c0_69], %201 {strides = array<i32>} : memref<8x128xf32, #tpu.memory_space<vmem>>, vector<8x128xf32>,
      %cst_70 = arith.constant 0.000000e+00 : f32
      %203 = vector.broadcast %cst_70 : f32 to vector<8x128xf32>
      %c0_71 = arith.constant 0 : index
      %c0_72 = arith.constant 0 : index
      %204 = vector.load %arg11[%c0_71, %c0_72] : memref<8x128xf32, #tpu.memory_space<vmem>>, vector<8x128xf32>
      tpu.vector_store %arg11[%c0_71, %c0_72], %203 {strides = array<i32>} : memref<8x128xf32, #tpu.memory_space<vmem>>, vector<8x128xf32>,
    } else {
    }
    %c0 = arith.constant 0 : index
    %c0_1 = arith.constant 0 : index
    %3 = vector.load %arg1[%c0, %c0_1] : memref<64x768xf32, #tpu.memory_space<vmem>>, vector<64x768xf32>
    %c0_2 = arith.constant 0 : index
    %c0_3 = arith.constant 0 : index
    %4 = vector.load %arg3[%c0_2, %c0_3] : memref<768x512xf32, #tpu.memory_space<vmem>>, vector<768x512xf32>
    %cst = arith.constant dense<0.000000e+00> : vector<64x512xf32>
    %5 = tpu.matmul %3, %4, %cst {dimension_numbers = #tpu.dot_dimension_numbers<[1], [0], [0], [1], [0, 0, 1, 1], [], []>} : vector<64x768xf32>, vector<768x512xf32>, vector<64x512xf32> -> vector<64x512xf32>
    %c0_4 = arith.constant 0 : index
    %c0_5 = arith.constant 0 : index
    %6 = vector.load %arg4[%c0_4, %c0_5] : memref<1x512xf32, #tpu.memory_space<vmem>>, vector<1x512xf32>
    %7 = vector.broadcast %6 : vector<1x512xf32> to vector<64x512xf32>
    %8 = arith.addf %5, %7 : vector<64x512xf32>
    %c0_6 = arith.constant 0 : index
    %c0_7 = arith.constant 0 : index
    %9 = vector.load %arg9[%c0_6, %c0_7] : memref<64x512xf32, #tpu.memory_space<vmem>>, vector<64x512xf32>
    tpu.vector_store %arg9[%c0_6, %c0_7], %8 {strides = array<i32>} : memref<64x512xf32, #tpu.memory_space<vmem>>, vector<64x512xf32>,
    %c0_8 = arith.constant 0 : index
    %c0_9 = arith.constant 0 : index
    %10 = vector.load %arg10[%c0_8, %c0_9] : memref<8x128xf32, #tpu.memory_space<vmem>>, vector<8x128xf32>
    %c0_10 = arith.constant 0 : index
    %c0_11 = arith.constant 0 : index
    %11 = vector.load %arg11[%c0_10, %c0_11] : memref<8x128xf32, #tpu.memory_space<vmem>>, vector<8x128xf32>
    %c0_i32_12 = arith.constant 0 : i32
    %c8_i32 = arith.constant 8 : i32
    %12 = arith.muli %c0_i32_12, %c8_i32 : i32
    %13 = tpu.assume_multiple %12, 8 : i32
    %14 = arith.index_cast %13 : i32 to index
    %c0_13 = arith.constant 0 : index
    %15 = vector.load %arg9[%14, %c0_13] : memref<64x512xf32, #tpu.memory_space<vmem>>, vector<8x512xf32>
    %c0_14 = arith.constant 0 : index
    %c0_15 = arith.constant 0 : index
    %16 = vector.load %arg5[%c0_14, %c0_15] : memref<128x512xf32, #tpu.memory_space<vmem>>, vector<128x512xf32>
    %cst_16 = arith.constant dense<0.000000e+00> : vector<8x512xf32>
    %17 = tpu.matmul %10, %16, %cst_16 {dimension_numbers = #tpu.dot_dimension_numbers<[1], [0], [0], [1], [0, 0, 1, 1], [], []>} : vector<8x128xf32>, vector<128x512xf32>, vector<8x512xf32> -> vector<8x512xf32>
    %18 = arith.addf %15, %17 : vector<8x512xf32>
    %19 = vector.extract_strided_slice %18 {offsets = [0, 0], sizes = [8, 384], strides = [1, 1]} : vector<8x512xf32> to vector<8x384xf32>
    %20 = arith.negf %19 : vector<8x384xf32>
    %21 = math.exp %20 : vector<8x384xf32>
    %cst_17 = arith.constant 1.000000e+00 : f32
    %22 = vector.broadcast %cst_17 : f32 to vector<8x384xf32>
    %23 = arith.addf %22, %21 : vector<8x384xf32>
    %24 = arith.divf %22, %23 : vector<8x384xf32>
    %25 = vector.extract_strided_slice %18 {offsets = [0, 384], sizes = [8, 128], strides = [1, 1]} : vector<8x512xf32> to vector<8x128xf32>
    %26 = math.tanh %25 : vector<8x128xf32>
    %27 = vector.extract_strided_slice %24 {offsets = [0, 0], sizes = [8, 128], strides = [1, 1]} : vector<8x384xf32> to vector<8x128xf32>
    %28 = vector.extract_strided_slice %24 {offsets = [0, 128], sizes = [8, 128], strides = [1, 1]} : vector<8x384xf32> to vector<8x128xf32>
    %29 = vector.extract_strided_slice %24 {offsets = [0, 256], sizes = [8, 128], strides = [1, 1]} : vector<8x384xf32> to vector<8x128xf32>
    %30 = arith.mulf %28, %11 : vector<8x128xf32>
    %31 = arith.mulf %27, %26 : vector<8x128xf32>
    %32 = arith.addf %30, %31 : vector<8x128xf32>
    %33 = math.tanh %32 : vector<8x128xf32>
    %34 = arith.mulf %29, %33 : vector<8x128xf32>
    %c1_i32 = arith.constant 1 : i32
    %c8_i32_18 = arith.constant 8 : i32
    %35 = arith.muli %c1_i32, %c8_i32_18 : i32
    %36 = tpu.assume_multiple %35, 8 : i32
    %37 = arith.index_cast %36 : i32 to index
    %c0_19 = arith.constant 0 : index
    %38 = vector.load %arg9[%37, %c0_19] : memref<64x512xf32, #tpu.memory_space<vmem>>, vector<8x512xf32>
    %c0_20 = arith.constant 0 : index
    %c0_21 = arith.constant 0 : index
    %39 = vector.load %arg5[%c0_20, %c0_21] : memref<128x512xf32, #tpu.memory_space<vmem>>, vector<128x512xf32>
    %cst_22 = arith.constant dense<0.000000e+00> : vector<8x512xf32>
    %40 = tpu.matmul %34, %39, %cst_22 {dimension_numbers = #tpu.dot_dimension_numbers<[1], [0], [0], [1], [0, 0, 1, 1], [], []>} : vector<8x128xf32>, vector<128x512xf32>, vector<8x512xf32> -> vector<8x512xf32>
    %41 = arith.addf %38, %40 : vector<8x512xf32>
    %42 = vector.extract_strided_slice %41 {offsets = [0, 0], sizes = [8, 384], strides = [1, 1]} : vector<8x512xf32> to vector<8x384xf32>
    %43 = arith.negf %42 : vector<8x384xf32>
    %44 = math.exp %43 : vector<8x384xf32>
    %cst_23 = arith.constant 1.000000e+00 : f32
    %45 = vector.broadcast %cst_23 : f32 to vector<8x384xf32>
    %46 = arith.addf %45, %44 : vector<8x384xf32>
    %47 = arith.divf %45, %46 : vector<8x384xf32>
    %48 = vector.extract_strided_slice %41 {offsets = [0, 384], sizes = [8, 128], strides = [1, 1]} : vector<8x512xf32> to vector<8x128xf32>
    %49 = math.tanh %48 : vector<8x128xf32>
    %50 = vector.extract_strided_slice %47 {offsets = [0, 0], sizes = [8, 128], strides = [1, 1]} : vector<8x384xf32> to vector<8x128xf32>
    %51 = vector.extract_strided_slice %47 {offsets = [0, 128], sizes = [8, 128], strides = [1, 1]} : vector<8x384xf32> to vector<8x128xf32>
    %52 = vector.extract_strided_slice %47 {offsets = [0, 256], sizes = [8, 128], strides = [1, 1]} : vector<8x384xf32> to vector<8x128xf32>
    %53 = arith.mulf %51, %32 : vector<8x128xf32>
    %54 = arith.mulf %50, %49 : vector<8x128xf32>
    %55 = arith.addf %53, %54 : vector<8x128xf32>
    %56 = math.tanh %55 : vector<8x128xf32>
    %57 = arith.mulf %52, %56 : vector<8x128xf32>
    %c2_i32 = arith.constant 2 : i32
    %c8_i32_24 = arith.constant 8 : i32
    %58 = arith.muli %c2_i32, %c8_i32_24 : i32
    %59 = tpu.assume_multiple %58, 8 : i32
    %60 = arith.index_cast %59 : i32 to index
    %c0_25 = arith.constant 0 : index
    %61 = vector.load %arg9[%60, %c0_25] : memref<64x512xf32, #tpu.memory_space<vmem>>, vector<8x512xf32>
    %c0_26 = arith.constant 0 : index
    %c0_27 = arith.constant 0 : index
    %62 = vector.load %arg5[%c0_26, %c0_27] : memref<128x512xf32, #tpu.memory_space<vmem>>, vector<128x512xf32>
    %cst_28 = arith.constant dense<0.000000e+00> : vector<8x512xf32>
    %63 = tpu.matmul %57, %62, %cst_28 {dimension_numbers = #tpu.dot_dimension_numbers<[1], [0], [0], [1], [0, 0, 1, 1], [], []>} : vector<8x128xf32>, vector<128x512xf32>, vector<8x512xf32> -> vector<8x512xf32>
    %64 = arith.addf %61, %63 : vector<8x512xf32>
    %65 = vector.extract_strided_slice %64 {offsets = [0, 0], sizes = [8, 384], strides = [1, 1]} : vector<8x512xf32> to vector<8x384xf32>
    %66 = arith.negf %65 : vector<8x384xf32>
    %67 = math.exp %66 : vector<8x384xf32>
    %cst_29 = arith.constant 1.000000e+00 : f32
    %68 = vector.broadcast %cst_29 : f32 to vector<8x384xf32>
    %69 = arith.addf %68, %67 : vector<8x384xf32>
    %70 = arith.divf %68, %69 : vector<8x384xf32>
    %71 = vector.extract_strided_slice %64 {offsets = [0, 384], sizes = [8, 128], strides = [1, 1]} : vector<8x512xf32> to vector<8x128xf32>
    %72 = math.tanh %71 : vector<8x128xf32>
    %73 = vector.extract_strided_slice %70 {offsets = [0, 0], sizes = [8, 128], strides = [1, 1]} : vector<8x384xf32> to vector<8x128xf32>
    %74 = vector.extract_strided_slice %70 {offsets = [0, 128], sizes = [8, 128], strides = [1, 1]} : vector<8x384xf32> to vector<8x128xf32>
    %75 = vector.extract_strided_slice %70 {offsets = [0, 256], sizes = [8, 128], strides = [1, 1]} : vector<8x384xf32> to vector<8x128xf32>
    %76 = arith.mulf %74, %55 : vector<8x128xf32>
    %77 = arith.mulf %73, %72 : vector<8x128xf32>
    %78 = arith.addf %76, %77 : vector<8x128xf32>
    %79 = math.tanh %78 : vector<8x128xf32>
    %80 = arith.mulf %75, %79 : vector<8x128xf32>
    %c3_i32 = arith.constant 3 : i32
    %c8_i32_30 = arith.constant 8 : i32
    %81 = arith.muli %c3_i32, %c8_i32_30 : i32
    %82 = tpu.assume_multiple %81, 8 : i32
    %83 = arith.index_cast %82 : i32 to index
    %c0_31 = arith.constant 0 : index
    %84 = vector.load %arg9[%83, %c0_31] : memref<64x512xf32, #tpu.memory_space<vmem>>, vector<8x512xf32>
    %c0_32 = arith.constant 0 : index
    %c0_33 = arith.constant 0 : index
    %85 = vector.load %arg5[%c0_32, %c0_33] : memref<128x512xf32, #tpu.memory_space<vmem>>, vector<128x512xf32>
    %cst_34 = arith.constant dense<0.000000e+00> : vector<8x512xf32>
    %86 = tpu.matmul %80, %85, %cst_34 {dimension_numbers = #tpu.dot_dimension_numbers<[1], [0], [0], [1], [0, 0, 1, 1], [], []>} : vector<8x128xf32>, vector<128x512xf32>, vector<8x512xf32> -> vector<8x512xf32>
    %87 = arith.addf %84, %86 : vector<8x512xf32>
    %88 = vector.extract_strided_slice %87 {offsets = [0, 0], sizes = [8, 384], strides = [1, 1]} : vector<8x512xf32> to vector<8x384xf32>
    %89 = arith.negf %88 : vector<8x384xf32>
    %90 = math.exp %89 : vector<8x384xf32>
    %cst_35 = arith.constant 1.000000e+00 : f32
    %91 = vector.broadcast %cst_35 : f32 to vector<8x384xf32>
    %92 = arith.addf %91, %90 : vector<8x384xf32>
    %93 = arith.divf %91, %92 : vector<8x384xf32>
    %94 = vector.extract_strided_slice %87 {offsets = [0, 384], sizes = [8, 128], strides = [1, 1]} : vector<8x512xf32> to vector<8x128xf32>
    %95 = math.tanh %94 : vector<8x128xf32>
    %96 = vector.extract_strided_slice %93 {offsets = [0, 0], sizes = [8, 128], strides = [1, 1]} : vector<8x384xf32> to vector<8x128xf32>
    %97 = vector.extract_strided_slice %93 {offsets = [0, 128], sizes = [8, 128], strides = [1, 1]} : vector<8x384xf32> to vector<8x128xf32>
    %98 = vector.extract_strided_slice %93 {offsets = [0, 256], sizes = [8, 128], strides = [1, 1]} : vector<8x384xf32> to vector<8x128xf32>
    %99 = arith.mulf %97, %78 : vector<8x128xf32>
    %100 = arith.mulf %96, %95 : vector<8x128xf32>
    %101 = arith.addf %99, %100 : vector<8x128xf32>
    %102 = math.tanh %101 : vector<8x128xf32>
    %103 = arith.mulf %98, %102 : vector<8x128xf32>
    %c4_i32 = arith.constant 4 : i32
    %c8_i32_36 = arith.constant 8 : i32
    %104 = arith.muli %c4_i32, %c8_i32_36 : i32
    %105 = tpu.assume_multiple %104, 8 : i32
    %106 = arith.index_cast %105 : i32 to index
    %c0_37 = arith.constant 0 : index
    %107 = vector.load %arg9[%106, %c0_37] : memref<64x512xf32, #tpu.memory_space<vmem>>, vector<8x512xf32>
    %c0_38 = arith.constant 0 : index
    %c0_39 = arith.constant 0 : index
    %108 = vector.load %arg5[%c0_38, %c0_39] : memref<128x512xf32, #tpu.memory_space<vmem>>, vector<128x512xf32>
    %cst_40 = arith.constant dense<0.000000e+00> : vector<8x512xf32>
    %109 = tpu.matmul %103, %108, %cst_40 {dimension_numbers = #tpu.dot_dimension_numbers<[1], [0], [0], [1], [0, 0, 1, 1], [], []>} : vector<8x128xf32>, vector<128x512xf32>, vector<8x512xf32> -> vector<8x512xf32>
    %110 = arith.addf %107, %109 : vector<8x512xf32>
    %111 = vector.extract_strided_slice %110 {offsets = [0, 0], sizes = [8, 384], strides = [1, 1]} : vector<8x512xf32> to vector<8x384xf32>
    %112 = arith.negf %111 : vector<8x384xf32>
    %113 = math.exp %112 : vector<8x384xf32>
    %cst_41 = arith.constant 1.000000e+00 : f32
    %114 = vector.broadcast %cst_41 : f32 to vector<8x384xf32>
    %115 = arith.addf %114, %113 : vector<8x384xf32>
    %116 = arith.divf %114, %115 : vector<8x384xf32>
    %117 = vector.extract_strided_slice %110 {offsets = [0, 384], sizes = [8, 128], strides = [1, 1]} : vector<8x512xf32> to vector<8x128xf32>
    %118 = math.tanh %117 : vector<8x128xf32>
    %119 = vector.extract_strided_slice %116 {offsets = [0, 0], sizes = [8, 128], strides = [1, 1]} : vector<8x384xf32> to vector<8x128xf32>
    %120 = vector.extract_strided_slice %116 {offsets = [0, 128], sizes = [8, 128], strides = [1, 1]} : vector<8x384xf32> to vector<8x128xf32>
    %121 = vector.extract_strided_slice %116 {offsets = [0, 256], sizes = [8, 128], strides = [1, 1]} : vector<8x384xf32> to vector<8x128xf32>
    %122 = arith.mulf %120, %101 : vector<8x128xf32>
    %123 = arith.mulf %119, %118 : vector<8x128xf32>
    %124 = arith.addf %122, %123 : vector<8x128xf32>
    %125 = math.tanh %124 : vector<8x128xf32>
    %126 = arith.mulf %121, %125 : vector<8x128xf32>
    %c5_i32 = arith.constant 5 : i32
    %c8_i32_42 = arith.constant 8 : i32
    %127 = arith.muli %c5_i32, %c8_i32_42 : i32
    %128 = tpu.assume_multiple %127, 8 : i32
    %129 = arith.index_cast %128 : i32 to index
    %c0_43 = arith.constant 0 : index
    %130 = vector.load %arg9[%129, %c0_43] : memref<64x512xf32, #tpu.memory_space<vmem>>, vector<8x512xf32>
    %c0_44 = arith.constant 0 : index
    %c0_45 = arith.constant 0 : index
    %131 = vector.load %arg5[%c0_44, %c0_45] : memref<128x512xf32, #tpu.memory_space<vmem>>, vector<128x512xf32>
    %cst_46 = arith.constant dense<0.000000e+00> : vector<8x512xf32>
    %132 = tpu.matmul %126, %131, %cst_46 {dimension_numbers = #tpu.dot_dimension_numbers<[1], [0], [0], [1], [0, 0, 1, 1], [], []>} : vector<8x128xf32>, vector<128x512xf32>, vector<8x512xf32> -> vector<8x512xf32>
    %133 = arith.addf %130, %132 : vector<8x512xf32>
    %134 = vector.extract_strided_slice %133 {offsets = [0, 0], sizes = [8, 384], strides = [1, 1]} : vector<8x512xf32> to vector<8x384xf32>
    %135 = arith.negf %134 : vector<8x384xf32>
    %136 = math.exp %135 : vector<8x384xf32>
    %cst_47 = arith.constant 1.000000e+00 : f32
    %137 = vector.broadcast %cst_47 : f32 to vector<8x384xf32>
    %138 = arith.addf %137, %136 : vector<8x384xf32>
    %139 = arith.divf %137, %138 : vector<8x384xf32>
    %140 = vector.extract_strided_slice %133 {offsets = [0, 384], sizes = [8, 128], strides = [1, 1]} : vector<8x512xf32> to vector<8x128xf32>
    %141 = math.tanh %140 : vector<8x128xf32>
    %142 = vector.extract_strided_slice %139 {offsets = [0, 0], sizes = [8, 128], strides = [1, 1]} : vector<8x384xf32> to vector<8x128xf32>
    %143 = vector.extract_strided_slice %139 {offsets = [0, 128], sizes = [8, 128], strides = [1, 1]} : vector<8x384xf32> to vector<8x128xf32>
    %144 = vector.extract_strided_slice %139 {offsets = [0, 256], sizes = [8, 128], strides = [1, 1]} : vector<8x384xf32> to vector<8x128xf32>
    %145 = arith.mulf %143, %124 : vector<8x128xf32>
    %146 = arith.mulf %142, %141 : vector<8x128xf32>
    %147 = arith.addf %145, %146 : vector<8x128xf32>
    %148 = math.tanh %147 : vector<8x128xf32>
    %149 = arith.mulf %144, %148 : vector<8x128xf32>
    %c6_i32 = arith.constant 6 : i32
    %c8_i32_48 = arith.constant 8 : i32
    %150 = arith.muli %c6_i32, %c8_i32_48 : i32
    %151 = tpu.assume_multiple %150, 8 : i32
    %152 = arith.index_cast %151 : i32 to index
    %c0_49 = arith.constant 0 : index
    %153 = vector.load %arg9[%152, %c0_49] : memref<64x512xf32, #tpu.memory_space<vmem>>, vector<8x512xf32>
    %c0_50 = arith.constant 0 : index
    %c0_51 = arith.constant 0 : index
    %154 = vector.load %arg5[%c0_50, %c0_51] : memref<128x512xf32, #tpu.memory_space<vmem>>, vector<128x512xf32>
    %cst_52 = arith.constant dense<0.000000e+00> : vector<8x512xf32>
    %155 = tpu.matmul %149, %154, %cst_52 {dimension_numbers = #tpu.dot_dimension_numbers<[1], [0], [0], [1], [0, 0, 1, 1], [], []>} : vector<8x128xf32>, vector<128x512xf32>, vector<8x512xf32> -> vector<8x512xf32>
    %156 = arith.addf %153, %155 : vector<8x512xf32>
    %157 = vector.extract_strided_slice %156 {offsets = [0, 0], sizes = [8, 384], strides = [1, 1]} : vector<8x512xf32> to vector<8x384xf32>
    %158 = arith.negf %157 : vector<8x384xf32>
    %159 = math.exp %158 : vector<8x384xf32>
    %cst_53 = arith.constant 1.000000e+00 : f32
    %160 = vector.broadcast %cst_53 : f32 to vector<8x384xf32>
    %161 = arith.addf %160, %159 : vector<8x384xf32>
    %162 = arith.divf %160, %161 : vector<8x384xf32>
    %163 = vector.extract_strided_slice %156 {offsets = [0, 384], sizes = [8, 128], strides = [1, 1]} : vector<8x512xf32> to vector<8x128xf32>
    %164 = math.tanh %163 : vector<8x128xf32>
    %165 = vector.extract_strided_slice %162 {offsets = [0, 0], sizes = [8, 128], strides = [1, 1]} : vector<8x384xf32> to vector<8x128xf32>
    %166 = vector.extract_strided_slice %162 {offsets = [0, 128], sizes = [8, 128], strides = [1, 1]} : vector<8x384xf32> to vector<8x128xf32>
    %167 = vector.extract_strided_slice %162 {offsets = [0, 256], sizes = [8, 128], strides = [1, 1]} : vector<8x384xf32> to vector<8x128xf32>
    %168 = arith.mulf %166, %147 : vector<8x128xf32>
    %169 = arith.mulf %165, %164 : vector<8x128xf32>
    %170 = arith.addf %168, %169 : vector<8x128xf32>
    %171 = math.tanh %170 : vector<8x128xf32>
    %172 = arith.mulf %167, %171 : vector<8x128xf32>
    %c7_i32 = arith.constant 7 : i32
    %c8_i32_54 = arith.constant 8 : i32
    %173 = arith.muli %c7_i32, %c8_i32_54 : i32
    %174 = tpu.assume_multiple %173, 8 : i32
    %175 = arith.index_cast %174 : i32 to index
    %c0_55 = arith.constant 0 : index
    %176 = vector.load %arg9[%175, %c0_55] : memref<64x512xf32, #tpu.memory_space<vmem>>, vector<8x512xf32>
    %c0_56 = arith.constant 0 : index
    %c0_57 = arith.constant 0 : index
    %177 = vector.load %arg5[%c0_56, %c0_57] : memref<128x512xf32, #tpu.memory_space<vmem>>, vector<128x512xf32>
    %cst_58 = arith.constant dense<0.000000e+00> : vector<8x512xf32>
    %178 = tpu.matmul %172, %177, %cst_58 {dimension_numbers = #tpu.dot_dimension_numbers<[1], [0], [0], [1], [0, 0, 1, 1], [], []>} : vector<8x128xf32>, vector<128x512xf32>, vector<8x512xf32> -> vector<8x512xf32>
    %179 = arith.addf %176, %178 : vector<8x512xf32>
    %180 = vector.extract_strided_slice %179 {offsets = [0, 0], sizes = [8, 384], strides = [1, 1]} : vector<8x512xf32> to vector<8x384xf32>
    %181 = arith.negf %180 : vector<8x384xf32>
    %182 = math.exp %181 : vector<8x384xf32>
    %cst_59 = arith.constant 1.000000e+00 : f32
    %183 = vector.broadcast %cst_59 : f32 to vector<8x384xf32>
    %184 = arith.addf %183, %182 : vector<8x384xf32>
    %185 = arith.divf %183, %184 : vector<8x384xf32>
    %186 = vector.extract_strided_slice %179 {offsets = [0, 384], sizes = [8, 128], strides = [1, 1]} : vector<8x512xf32> to vector<8x128xf32>
    %187 = math.tanh %186 : vector<8x128xf32>
    %188 = vector.extract_strided_slice %185 {offsets = [0, 0], sizes = [8, 128], strides = [1, 1]} : vector<8x384xf32> to vector<8x128xf32>
    %189 = vector.extract_strided_slice %185 {offsets = [0, 128], sizes = [8, 128], strides = [1, 1]} : vector<8x384xf32> to vector<8x128xf32>
    %190 = vector.extract_strided_slice %185 {offsets = [0, 256], sizes = [8, 128], strides = [1, 1]} : vector<8x384xf32> to vector<8x128xf32>
    %191 = arith.mulf %189, %170 : vector<8x128xf32>
    %192 = arith.mulf %188, %187 : vector<8x128xf32>
    %193 = arith.addf %191, %192 : vector<8x128xf32>
    %194 = math.tanh %193 : vector<8x128xf32>
    %195 = arith.mulf %190, %194 : vector<8x128xf32>
    %c8_i32_60 = arith.constant 8 : i32
    %c0_61 = arith.constant 0 : index
    %c0_62 = arith.constant 0 : index
    %196 = vector.load %arg10[%c0_61, %c0_62] : memref<8x128xf32, #tpu.memory_space<vmem>>, vector<8x128xf32>
    tpu.vector_store %arg10[%c0_61, %c0_62], %195 {strides = array<i32>} : memref<8x128xf32, #tpu.memory_space<vmem>>, vector<8x128xf32>,
    %c0_63 = arith.constant 0 : index
    %c0_64 = arith.constant 0 : index
    %197 = vector.load %arg11[%c0_63, %c0_64] : memref<8x128xf32, #tpu.memory_space<vmem>>, vector<8x128xf32>
    tpu.vector_store %arg11[%c0_63, %c0_64], %193 {strides = array<i32>} : memref<8x128xf32, #tpu.memory_space<vmem>>, vector<8x128xf32>,
    %c0_i32_65 = arith.constant 0 : i32
    %198 = arith.cmpi eq, %arg0, %c0_i32_65 : i32
    %199 = arith.extui %198 : i1 to i32
    %c0_i32_66 = arith.constant 0 : i32
    %200 = arith.cmpi ne, %199, %c0_i32_66 : i32
    scf.if %200 {
      %c0_67 = arith.constant 0 : index
      %c0_68 = arith.constant 0 : index
      %201 = vector.load %arg2[%c0_67, %c0_68] : memref<8x768xf32, #tpu.memory_space<vmem>>, vector<8x768xf32>
      %c0_69 = arith.constant 0 : index
      %c0_70 = arith.constant 0 : index
      %202 = vector.load %arg6[%c0_69, %c0_70] : memref<768x384xf32, #tpu.memory_space<vmem>>, vector<768x384xf32>
      %cst_71 = arith.constant dense<0.000000e+00> : vector<8x384xf32>
      %203 = tpu.matmul %201, %202, %cst_71 {dimension_numbers = #tpu.dot_dimension_numbers<[1], [0], [0], [1], [0, 0, 1, 1], [], []>} : vector<8x768xf32>, vector<768x384xf32>, vector<8x384xf32> -> vector<8x384xf32>
      %c0_72 = arith.constant 0 : index
      %c0_73 = arith.constant 0 : index
      %204 = vector.load %arg7[%c0_72, %c0_73] : memref<1x384xf32, #tpu.memory_space<vmem>>, vector<1x384xf32>
      %205 = vector.broadcast %204 : vector<1x384xf32> to vector<8x384xf32>
      %206 = arith.addf %203, %205 : vector<8x384xf32>
      %207 = vector.extract_strided_slice %206 {offsets = [0, 0], sizes = [8, 256], strides = [1, 1]} : vector<8x384xf32> to vector<8x256xf32>
      %208 = arith.negf %207 : vector<8x256xf32>
      %209 = math.exp %208 : vector<8x256xf32>
      %cst_74 = arith.constant 1.000000e+00 : f32
      %210 = vector.broadcast %cst_74 : f32 to vector<8x256xf32>
      %211 = arith.addf %210, %209 : vector<8x256xf32>
      %212 = arith.divf %210, %211 : vector<8x256xf32>
      %213 = vector.extract_strided_slice %206 {offsets = [0, 256], sizes = [8, 128], strides = [1, 1]} : vector<8x384xf32> to vector<8x128xf32>
      %214 = math.tanh %213 : vector<8x128xf32>
      %215 = vector.extract_strided_slice %212 {offsets = [0, 128], sizes = [8, 128], strides = [1, 1]} : vector<8x256xf32> to vector<8x128xf32>
      %216 = vector.extract_strided_slice %212 {offsets = [0, 0], sizes = [8, 128], strides = [1, 1]} : vector<8x256xf32> to vector<8x128xf32>
      %217 = arith.mulf %216, %214 : vector<8x128xf32>
      %218 = math.tanh %217 : vector<8x128xf32>
      %219 = arith.mulf %215, %218 : vector<8x128xf32>
      %c0_75 = arith.constant 0 : index
      %c0_76 = arith.constant 0 : index
      %220 = vector.load %arg8[%c0_75, %c0_76] : memref<8x256xf32, #tpu.memory_space<vmem>>, vector<8x128xf32>
      tpu.vector_store %arg8[%c0_75, %c0_76], %195 {strides = array<i32>} : memref<8x256xf32, #tpu.memory_space<vmem>>, vector<8x128xf32>,
      %c0_77 = arith.constant 0 : index
      %c128 = arith.constant 128 : index
      %221 = vector.load %arg8[%c0_77, %c128] : memref<8x256xf32, #tpu.memory_space<vmem>>, vector<8x128xf32>
      tpu.vector_store %arg8[%c0_77, %c128], %219 {strides = array<i32>} : memref<8x256xf32, #tpu.memory_space<vmem>>, vector<8x128xf32>,
    } else {
    }
    return
  }
  func.func @transform_0(%arg0: i32) -> (i32, i32) {
    %c0_i32 = arith.constant 0 : i32
    %c0_i32_0 = arith.constant 0 : i32
    return %arg0, %c0_i32 : i32, i32
  }
  func.func @transform_1(%arg0: i32) -> (i32, i32) {
    %c0_i32 = arith.constant 0 : i32
    %c0_i32_0 = arith.constant 0 : i32
    %c0_i32_1 = arith.constant 0 : i32
    return %c0_i32, %c0_i32_0 : i32, i32
  }
  func.func @transform_2(%arg0: i32) -> (i32, i32) {
    %c0_i32 = arith.constant 0 : i32
    %c0_i32_0 = arith.constant 0 : i32
    %c0_i32_1 = arith.constant 0 : i32
    return %c0_i32, %c0_i32_0 : i32, i32
  }
  func.func @transform_3(%arg0: i32) -> (i32, i32) {
    %c0_i32 = arith.constant 0 : i32
    %c0_i32_0 = arith.constant 0 : i32
    %c0_i32_1 = arith.constant 0 : i32
    return %c0_i32, %c0_i32_0 : i32, i32
  }
  func.func @transform_4(%arg0: i32) -> (i32, i32) {
    %c0_i32 = arith.constant 0 : i32
    %c0_i32_0 = arith.constant 0 : i32
    %c0_i32_1 = arith.constant 0 : i32
    return %c0_i32, %c0_i32_0 : i32, i32
  }
  func.func @transform_5(%arg0: i32) -> (i32, i32) {
    %c0_i32 = arith.constant 0 : i32
    %c0_i32_0 = arith.constant 0 : i32
    %c0_i32_1 = arith.constant 0 : i32
    return %c0_i32, %c0_i32_0 : i32, i32
  }
  func.func @transform_6(%arg0: i32) -> (i32, i32) {
    %c0_i32 = arith.constant 0 : i32
    %c0_i32_0 = arith.constant 0 : i32
    %c0_i32_1 = arith.constant 0 : i32
    return %c0_i32, %c0_i32_0 : i32, i32
  }
  func.func @transform_7(%arg0: i32) -> (i32, i32) {
    %c0_i32 = arith.constant 0 : i32
    %c0_i32_0 = arith.constant 0 : i32
    %c0_i32_1 = arith.constant 0 : i32
    return %c0_i32, %c0_i32_0 : i32, i32
  }
}

</mosaic_0001>

<bundles_post_ra>
// kernel: forward.1
= control target key start
LH: loop header
LB: loop body
LE: loop exit
PB: predicated region body
PF: predicated region fallthrough
CT: control target
= control target key end

     0   :  { %12 = vsyncpa [#allocation6], 0  ;;  %s7279_s0 = inlined_call_operand.vmem [shape: f32[64,768], index: 0, kind: input, shape index: {}]   ;;  %s7280_s1 = inlined_call_operand.vmem [shape: f32[8,768], index: 1, kind: input, shape index: {}]   ;;  %s7281_s2 = inlined_call_operand.vmem [shape: f32[768,512], index: 2, kind: input, shape index: {}]   ;;  %s7282_s3 = inlined_call_operand.hbm [shape: f32[1,512], index: 3, kind: input, shape index: {}]   ;;  %s7283_s4 = inlined_call_operand.hbm [shape: f32[128,512], index: 4, kind: input, shape index: {}]   ;;  %s7284_s5 = inlined_call_operand.hbm [shape: f32[768,384], index: 5, kind: input, shape index: {}]   ;;  %s7285_s6 = inlined_call_operand.hbm [shape: f32[1,384], index: 6, kind: input, shape index: {}]   ;;  %s7286_s7 = inlined_call_operand.vmem [shape: f32[8,256], index: 7, kind: output, shape index: {}]  }
   0x1   :  { %13 = vsyncpa [#allocation8], 0 }
   0x2   :  { %14 = vsyncpa [#allocation11], 0  ;;  %s5202_s24 = smov [#allocation7]   ;;  %s5108_s28 = scalar_lea.hbm %s7283_s4, 8192 }
   0x3   :  { %s36_s25 = sshll.u32 %s5202_s24, 4  ;;  %p5109_p0 = scmp.ne.s32.totalorder %s7283_s4, %s5108_s28  ;;  %s37_s25 = int_to_ptr.vmem [resolvable:$true] %s36_s25 }
   0x4   :  { %p5112_p1 = scmp.lt.u32.totalorder %s5108_s28, %s7283_s4 }
   0x6   :  { %p5114_p2 = pnand %p5112_p1, %p5109_p0 }
   0x8   :  { %5117 = shalt.err (!%p5114_p2)
}
   0x9   :  { %s5118_s10 = scalar_lea.vmem %s37_s25, 8192  ;;  %p5123_p4 = scmp.lt.s32.totalorder %s37_s25, %s37_s25 }
   0xa   :  { %p5119_p3 = scmp.ne.s32.totalorder %s37_s25, %s5118_s10  ;;  %p5124_p5 = scmp.lt.s32.totalorder %s5118_s10, %s5118_s10 }
   0xc   :  { %p5125_p6 = por %p5124_p5, %p5123_p4 }
   0xe   :  { %p5126_p7 = pnand %p5125_p6, %p5119_p3 }
  0x10   :  { %5129 = shalt.err (!%p5126_p7)
}
  0x11   :  { %s5203_s11 = smov 512   ;;  %s5204_s12 = smov 32  }
  0x12   :  { %42 = dma.hbm_to_vmem [thread:$0]  %s7283_s4, 8192, %s37_s25, [#allocation8], %s5203_s11, %s5203_s11, %s5204_s12  }
  0x13   :  { %s5205_s15 = smov [#allocation5]   ;;  %s5206_s17 = smov [#allocation9]  }
  0x14   :  { %s27_s16 = sshll.u32 %s5205_s15, 4  ;;  %s48_s18 = sshll.u32 %s5206_s17, 4  ;;  %s28_s16 = int_to_ptr.vmem [resolvable:$true] %s27_s16  ;;  %s49_s18 = int_to_ptr.vmem [resolvable:$true] %s48_s18 }
  0x15   :  { %s5130_s21 = scalar_lea.hbm %s7282_s3, 64 }
  0x16   :  { %p5131_p8 = scmp.ne.s32.totalorder %s7282_s3, %s5130_s21  ;;  %p5134_p9 = scmp.lt.u32.totalorder %s5130_s21, %s7282_s3 }
  0x18   :  { %p5136_p10 = pnand %p5134_p9, %p5131_p8 }
  0x1a   :  { %5139 = shalt.err (!%p5136_p10)
}
  0x1b   :  { %s5140_s4 = scalar_lea.vmem %s28_s16, 64  ;;  %p5145_p12 = scmp.lt.s32.totalorder %s28_s16, %s28_s16 }
  0x1c   :  { %p5141_p11 = scmp.ne.s32.totalorder %s28_s16, %s5140_s4  ;;  %p5146_p13 = scmp.lt.s32.totalorder %s5140_s4, %s5140_s4 }
  0x1e   :  { %p5147_p0 = por %p5146_p13, %p5145_p12 }
  0x20   :  { %p5148_p1 = pnand %p5147_p0, %p5141_p11 }
  0x22   :  { %5151 = shalt.err (!%p5148_p1)
}
  0x23   :  { %30 = dma.hbm_to_vmem [thread:$0]  %s7282_s3, 64, %s28_s16, [#allocation6]  }
  0x24   :  { %s5152_s30 = scalar_lea.hbm %s7284_s5, 36864 }
  0x25   :  { %p5153_p2 = scmp.ne.s32.totalorder %s7284_s5, %s5152_s30  ;;  %p5156_p3 = scmp.lt.u32.totalorder %s5152_s30, %s7284_s5 }
  0x27   :  { %p5158_p4 = pnand %p5156_p3, %p5153_p2 }
  0x29   :  { %5161 = shalt.err (!%p5158_p4)
}
  0x2a   :  { %s5162_s12 = scalar_lea.vmem %s49_s18, 36864  ;;  %p5167_p6 = scmp.lt.s32.totalorder %s49_s18, %s49_s18 }
  0x2b   :  { %p5163_p5 = scmp.ne.s32.totalorder %s49_s18, %s5162_s12  ;;  %p5168_p7 = scmp.lt.s32.totalorder %s5162_s12, %s5162_s12 }
  0x2d   :  { %p5169_p8 = por %p5168_p7, %p5167_p6 }
  0x2f   :  { %p5170_p9 = pnand %p5169_p8, %p5163_p5 }
  0x31   :  { %5173 = shalt.err (!%p5170_p9)
}
  0x32   :  { %s5207_s3 = smov 384   ;;  %s5208_s13 = smov 24  }
  0x33   :  { %54 = dma.hbm_to_vmem [thread:$0]  %s7284_s5, 36864, %s49_s18, [#allocation8], %s5207_s3, %s5207_s3, %s5208_s13  }
  0x34   :  { %s5209_s16 = smov [#allocation10]   ;;  %s5174_s21 = scalar_lea.hbm %s7285_s6, 48 }
  0x35   :  { %s61_s17 = sshll.u32 %s5209_s16, 4  ;;  %p5175_p10 = scmp.ne.s32.totalorder %s7285_s6, %s5174_s21  ;;  %s62_s17 = int_to_ptr.vmem [resolvable:$true] %s61_s17 }
  0x36   :  { %p5178_p11 = scmp.lt.u32.totalorder %s5174_s21, %s7285_s6 }
  0x38   :  { %p5180_p12 = pnand %p5178_p11, %p5175_p10 }
  0x3a   :  { %5183 = shalt.err (!%p5180_p12)
}
  0x3b   :  { %s5184_s4 = scalar_lea.vmem %s62_s17, 48  ;;  %s5188_s5 = scalar_lea.vmem %s62_s17, 64 }
  0x3c   :  { %p5185_p13 = scmp.ne.s32.totalorder %s62_s17, %s5184_s4  ;;  %p5189_p0 = scmp.lt.s32.totalorder %s62_s17, %s62_s17 }
  0x3d   :  { %p5190_p1 = scmp.lt.s32.totalorder %s5188_s5, %s5184_s4 }
  0x3f   :  { %p5191_p2 = por %p5190_p1, %p5189_p0 }
  0x41   :  { %p5192_p3 = pnand %p5191_p2, %p5185_p13 }
  0x43   :  { %5195 = shalt.err (!%p5192_p3)
}
  0x44   :  { %64 = dma.hbm_to_vmem [thread:$0]  %s7285_s6, 48, %s62_s17, [#allocation11]  }
  0x45   :  { %5196 = dma.done.wait [#allocation6], 64  }
  0x46   :  { %5197 = vsyncadd [#allocation6], 4294967232 }
  0x47   :  { %5198 = dma.done.wait [#allocation8], 45056  }
  0x48   :  { %5199 = vsyncadd [#allocation8], 4294922240 }
  0x49   :  { %5200 = dma.done.wait [#allocation11], 48  }
  0x4a   :  { %5201 = vsyncadd [#allocation11], 4294967248  ;;  %v132_v0 = vld [vmem:[%s7281_s2 + $0x8] sm:$0xff]  ;;  %v131_v5 = vld [vmem:[%s7281_s2] sm:$0xff] }
  0x4b   :  { %v136_v1 = vld [vmem:[%s7281_s2 + $0x28] sm:$0xff]  ;;  %v135_v6 = vld [vmem:[%s7281_s2 + $0x20] sm:$0xff] }
  0x4c   :  { %v260_v2 = vld [vmem:[%s7281_s2 + $0x408] sm:$0xff]  ;;  %v3631_v3 = vpack.c.bf16 %v136_v1, %v132_v0  ;;  %v3633_v8 = vpack.c.bf16 %v135_v6, %v131_v5  ;;  %v259_v9 = vld [vmem:[%s7281_s2 + $0x400] sm:$0xff] }
  0x4d   :  { %v264_v4 = vld [vmem:[%s7281_s2 + $0x428] sm:$0xff]  ;;  %v263_v10 = vld [vmem:[%s7281_s2 + $0x420] sm:$0xff] }
  0x4e   :  { %v3695_v7 = vpack.c.bf16 %v264_v4, %v260_v2  ;;  %v140_v11 = vld [vmem:[%s7281_s2 + $0x48] sm:$0xff]  ;;  %3632 = vmatprep.subr.bf16.mxu1 %v3631_v3  ;;  %v3697_v12 = vpack.c.bf16 %v263_v10, %v259_v9  ;;  %v139_v18 = vld [vmem:[%s7281_s2 + $0x40] sm:$0xff] }
  0x4f   :  { %v144_v13 = vld [vmem:[%s7281_s2 + $0x68] sm:$0xff]  ;;  %3634 = vmatpush1.bf16.msra.mxu1 %v3633_v8  ;;  %v143_v19 = vld [vmem:[%s7281_s2 + $0x60] sm:$0xff] }
  0x50   :  { %v268_v14 = vld [vmem:[%s7281_s2 + $0x448] sm:$0xff]  ;;  %3696 = vmatprep.subr.bf16.mxu0 %v3695_v7  ;;  %v3635_v16 = vpack.c.bf16 %v144_v13, %v140_v11  ;;  %v267_v20 = vld [vmem:[%s7281_s2 + $0x440] sm:$0xff]  ;;  %v3637_v21 = vpack.c.bf16 %v143_v19, %v139_v18 }
  0x51   :  { %v272_v15 = vld [vmem:[%s7281_s2 + $0x468] sm:$0xff]  ;;  %3698 = vmatpush1.bf16.msra.mxu0 %v3697_v12  ;;  %v271_v22 = vld [vmem:[%s7281_s2 + $0x460] sm:$0xff] }
  0x52   :  { %v3699_v17 = vpack.c.bf16 %v272_v15, %v268_v14  ;;  %v148_v23 = vld [vmem:[%s7281_s2 + $0x88] sm:$0xff]  ;;  %3636 = vmatprep.subr.bf16.mxu1 %v3635_v16  ;;  %v3701_v25 = vpack.c.bf16 %v271_v22, %v267_v20  ;;  %v147_v29 = vld [vmem:[%s7281_s2 + $0x80] sm:$0xff] }
  0x53   :  { %v152_v24 = vld [vmem:[%s7281_s2 + $0xa8] sm:$0xff]  ;;  %v151_v31 = vld [vmem:[%s7281_s2 + $0xa0] sm:$0xff]  ;;  %3638 = vmatpush1.bf16.msra.mxu1 %v3637_v21 }
  0x54   :  { %3700 = vmatprep.subr.bf16.mxu0 %v3699_v17  ;;  %v3639_v26 = vpack.c.bf16 %v152_v24, %v148_v23  ;;  %v276_v27 = vld [vmem:[%s7281_s2 + $0x488] sm:$0xff]  ;;  %v275_v32 = vld [vmem:[%s7281_s2 + $0x480] sm:$0xff]  ;;  %v3641_v34 = vpack.c.bf16 %v151_v31, %v147_v29 }
  0x55   :  { %v280_v28 = vld [vmem:[%s7281_s2 + $0x4a8] sm:$0xff]  ;;  %v279_v33 = vld [vmem:[%s7281_s2 + $0x4a0] sm:$0xff]  ;;  %3702 = vmatpush1.bf16.msra.mxu0 %v3701_v25 }
  0x56   :  { %v3703_v30 = vpack.c.bf16 %v280_v28, %v276_v27  ;;  %v156_v35 = vld [vmem:[%s7281_s2 + $0xc8] sm:$0xff]  ;;  %3640 = vmatprep.subr.bf16.mxu1 %v3639_v26  ;;  %v3705_v38 = vpack.c.bf16 %v279_v33, %v275_v32  ;;  %v155_v41 = vld [vmem:[%s7281_s2 + $0xc0] sm:$0xff] }
  0x57   :  { %v160_v36 = vld [vmem:[%s7281_s2 + $0xe8] sm:$0xff]  ;;  %v159_v42 = vld [vmem:[%s7281_s2 + $0xe0] sm:$0xff]  ;;  %3642 = vmatpush1.bf16.msra.mxu1 %v3641_v34 }
  0x58   :  { %v284_v37 = vld [vmem:[%s7281_s2 + $0x4c8] sm:$0xff]  ;;  %v3643_v39 = vpack.c.bf16 %v160_v36, %v156_v35  ;;  %3704 = vmatprep.subr.bf16.mxu0 %v3703_v30  ;;  %v283_v44 = vld [vmem:[%s7281_s2 + $0x4c0] sm:$0xff]  ;;  %v3645_v50 = vpack.c.bf16 %v159_v42, %v155_v41 }
  0x59   :  { %v288_v40 = vld [vmem:[%s7281_s2 + $0x4e8] sm:$0xff]  ;;  %v287_v45 = vld [vmem:[%s7281_s2 + $0x4e0] sm:$0xff]  ;;  %3706 = vmatpush1.bf16.msra.mxu0 %v3705_v38 }
  0x5a   :  { %v3707_v43 = vpack.c.bf16 %v288_v40, %v284_v37  ;;  %v164_v46 = vld [vmem:[%s7281_s2 + $0x108] sm:$0xff]  ;;  %3644 = vmatprep.subr.bf16.mxu1 %v3643_v39  ;;  %v3709_v51 = vpack.c.bf16 %v287_v45, %v283_v44  ;;  %v163_v53 = vld [vmem:[%s7281_s2 + $0x100] sm:$0xff] }
  0x5b   :  { %v168_v47 = vld [vmem:[%s7281_s2 + $0x128] sm:$0xff]  ;;  %v167_v54 = vld [vmem:[%s7281_s2 + $0x120] sm:$0xff]  ;;  %3646 = vmatpush1.bf16.msra.mxu1 %v3645_v50 }
  0x5c   :  { %v292_v48 = vld [vmem:[%s7281_s2 + $0x508] sm:$0xff]  ;;  %v3647_v52 = vpack.c.bf16 %v168_v47, %v164_v46  ;;  %v291_v55 = vld [vmem:[%s7281_s2 + $0x500] sm:$0xff]  ;;  %3708 = vmatprep.subr.bf16.mxu0 %v3707_v43  ;;  %v3649_v62 = vpack.c.bf16 %v167_v54, %v163_v53 }
  0x5d   :  { %v296_v49 = vld [vmem:[%s7281_s2 + $0x528] sm:$0xff]  ;;  %v295_v57 = vld [vmem:[%s7281_s2 + $0x520] sm:$0xff]  ;;  %3710 = vmatpush1.bf16.msra.mxu0 %v3709_v51 }
  0x5e   :  { %v3711_v56 = vpack.c.bf16 %v296_v49, %v292_v48  ;;  %v172_v58 = vld [vmem:[%s7281_s2 + $0x148] sm:$0xff]  ;;  %3648 = vmatprep.subr.bf16.mxu1 %v3647_v52  ;;  %v3713_v63 = vpack.c.bf16 %v295_v57, %v291_v55  ;;  %v171_v1 = vld [vmem:[%s7281_s2 + $0x140] sm:$0xff] }
  0x5f   :  { %v176_v59 = vld [vmem:[%s7281_s2 + $0x168] sm:$0xff]  ;;  %v175_v2 = vld [vmem:[%s7281_s2 + $0x160] sm:$0xff]  ;;  %3650 = vmatpush1.bf16.msra.mxu1 %v3649_v62 }
  0x60   :  { %v300_v60 = vld [vmem:[%s7281_s2 + $0x548] sm:$0xff]  ;;  %v3651_v0 = vpack.c.bf16 %v176_v59, %v172_v58  ;;  %v299_v3 = vld [vmem:[%s7281_s2 + $0x540] sm:$0xff]  ;;  %3712 = vmatprep.subr.bf16.mxu0 %v3711_v56  ;;  %v3653_v10 = vpack.c.bf16 %v175_v2, %v171_v1 }
  0x61   :  { %v304_v61 = vld [vmem:[%s7281_s2 + $0x568] sm:$0xff]  ;;  %v303_v5 = vld [vmem:[%s7281_s2 + $0x560] sm:$0xff]  ;;  %3714 = vmatpush1.bf16.msra.mxu0 %v3713_v63 }
  0x62   :  { %v3715_v4 = vpack.c.bf16 %v304_v61, %v300_v60  ;;  %v180_v6 = vld [vmem:[%s7281_s2 + $0x188] sm:$0xff]  ;;  %3652 = vmatprep.subr.bf16.mxu1 %v3651_v0  ;;  %v3717_v11 = vpack.c.bf16 %v303_v5, %v299_v3  ;;  %v179_v13 = vld [vmem:[%s7281_s2 + $0x180] sm:$0xff] }
  0x63   :  { %v184_v7 = vld [vmem:[%s7281_s2 + $0x1a8] sm:$0xff]  ;;  %v183_v14 = vld [vmem:[%s7281_s2 + $0x1a0] sm:$0xff]  ;;  %3654 = vmatpush1.bf16.msra.mxu1 %v3653_v10 }
  0x64   :  { %v308_v8 = vld [vmem:[%s7281_s2 + $0x588] sm:$0xff]  ;;  %v3655_v12 = vpack.c.bf16 %v184_v7, %v180_v6  ;;  %v307_v15 = vld [vmem:[%s7281_s2 + $0x580] sm:$0xff]  ;;  %3716 = vmatprep.subr.bf16.mxu0 %v3715_v4  ;;  %v3657_v22 = vpack.c.bf16 %v183_v14, %v179_v13 }
  0x65   :  { %v312_v9 = vld [vmem:[%s7281_s2 + $0x5a8] sm:$0xff]  ;;  %v311_v17 = vld [vmem:[%s7281_s2 + $0x5a0] sm:$0xff]  ;;  %3718 = vmatpush1.bf16.msra.mxu0 %v3717_v11 }
  0x66   :  { %v3719_v16 = vpack.c.bf16 %v312_v9, %v308_v8  ;;  %v188_v18 = vld [vmem:[%s7281_s2 + $0x1c8] sm:$0xff]  ;;  %3656 = vmatprep.subr.bf16.mxu1 %v3655_v12  ;;  %v3721_v23 = vpack.c.bf16 %v311_v17, %v307_v15  ;;  %v187_v25 = vld [vmem:[%s7281_s2 + $0x1c0] sm:$0xff] }
  0x67   :  { %v192_v19 = vld [vmem:[%s7281_s2 + $0x1e8] sm:$0xff]  ;;  %v191_v26 = vld [vmem:[%s7281_s2 + $0x1e0] sm:$0xff]  ;;  %3658 = vmatpush1.bf16.msra.mxu1 %v3657_v22 }
  0x68   :  { %v316_v20 = vld [vmem:[%s7281_s2 + $0x5c8] sm:$0xff]  ;;  %v3659_v24 = vpack.c.bf16 %v192_v19, %v188_v18  ;;  %v315_v27 = vld [vmem:[%s7281_s2 + $0x5c0] sm:$0xff]  ;;  %3720 = vmatprep.subr.bf16.mxu0 %v3719_v16  ;;  %v3661_v34 = vpack.c.bf16 %v191_v26, %v187_v25  ;;  %v86_v19 = vld [vmem:[%s7279_s0 + $0x18] sm:$0xff] }
  0x69   :  { %v320_v21 = vld [vmem:[%s7281_s2 + $0x5e8] sm:$0xff]  ;;  %v319_v29 = vld [vmem:[%s7281_s2 + $0x5e0] sm:$0xff]  ;;  %3722 = vmatpush1.bf16.msra.mxu0 %v3721_v23  ;;  %714 = vmatprep.mubr.f32.mxu0 %v86_v19 }
  0x6a   :  { %v3723_v28 = vpack.c.bf16 %v320_v21, %v316_v20  ;;  %v196_v30 = vld [vmem:[%s7281_s2 + $0x208] sm:$0xff]  ;;  %3660 = vmatprep.subr.bf16.mxu1 %v3659_v24  ;;  %v3725_v35 = vpack.c.bf16 %v319_v29, %v315_v27  ;;  %v195_v37 = vld [vmem:[%s7281_s2 + $0x200] sm:$0xff] }
  0x6b   :  { %v200_v31 = vld [vmem:[%s7281_s2 + $0x228] sm:$0xff]  ;;  %v199_v38 = vld [vmem:[%s7281_s2 + $0x220] sm:$0xff]  ;;  %3662 = vmatpush1.bf16.msra.mxu1 %v3661_v34 }
  0x6c   :  { %v324_v32 = vld [vmem:[%s7281_s2 + $0x608] sm:$0xff]  ;;  %v3663_v36 = vpack.c.bf16 %v200_v31, %v196_v30  ;;  %v323_v39 = vld [vmem:[%s7281_s2 + $0x600] sm:$0xff]  ;;  %3724 = vmatprep.subr.bf16.mxu0 %v3723_v28  ;;  %v3665_v46 = vpack.c.bf16 %v199_v38, %v195_v37 }
  0x6d   :  { %v328_v33 = vld [vmem:[%s7281_s2 + $0x628] sm:$0xff]  ;;  %v327_v41 = vld [vmem:[%s7281_s2 + $0x620] sm:$0xff]  ;;  %3726 = vmatpush1.bf16.msra.mxu0 %v3725_v35 }
  0x6e   :  { %v3727_v40 = vpack.c.bf16 %v328_v33, %v324_v32  ;;  %v204_v42 = vld [vmem:[%s7281_s2 + $0x248] sm:$0xff]  ;;  %3664 = vmatprep.subr.bf16.mxu1 %v3663_v36  ;;  %v3729_v47 = vpack.c.bf16 %v327_v41, %v323_v39  ;;  %v203_v49 = vld [vmem:[%s7281_s2 + $0x240] sm:$0xff] }
  0x6f   :  { %v208_v43 = vld [vmem:[%s7281_s2 + $0x268] sm:$0xff]  ;;  %v207_v50 = vld [vmem:[%s7281_s2 + $0x260] sm:$0xff]  ;;  %3666 = vmatpush1.bf16.msra.mxu1 %v3665_v46 }
  0x70   :  { %v332_v44 = vld [vmem:[%s7281_s2 + $0x648] sm:$0xff]  ;;  %v3667_v48 = vpack.c.bf16 %v208_v43, %v204_v42  ;;  %v331_v51 = vld [vmem:[%s7281_s2 + $0x640] sm:$0xff]  ;;  %3728 = vmatprep.subr.bf16.mxu0 %v3727_v40  ;;  %v3669_v58 = vpack.c.bf16 %v207_v50, %v203_v49 }
  0x71   :  { %v336_v45 = vld [vmem:[%s7281_s2 + $0x668] sm:$0xff]  ;;  %v335_v53 = vld [vmem:[%s7281_s2 + $0x660] sm:$0xff]  ;;  %3730 = vmatpush1.bf16.msra.mxu0 %v3729_v47 }
  0x72   :  { %v3731_v52 = vpack.c.bf16 %v336_v45, %v332_v44  ;;  %v212_v54 = vld [vmem:[%s7281_s2 + $0x288] sm:$0xff]  ;;  %3668 = vmatprep.subr.bf16.mxu1 %v3667_v48  ;;  %v3733_v59 = vpack.c.bf16 %v335_v53, %v331_v51  ;;  %v211_v61 = vld [vmem:[%s7281_s2 + $0x280] sm:$0xff] }
  0x73   :  { %v216_v55 = vld [vmem:[%s7281_s2 + $0x2a8] sm:$0xff]  ;;  %v215_v62 = vld [vmem:[%s7281_s2 + $0x2a0] sm:$0xff]  ;;  %3670 = vmatpush1.bf16.msra.mxu1 %v3669_v58 }
  0x74   :  { %v340_v56 = vld [vmem:[%s7281_s2 + $0x688] sm:$0xff]  ;;  %v3671_v60 = vpack.c.bf16 %v216_v55, %v212_v54  ;;  %v339_v63 = vld [vmem:[%s7281_s2 + $0x680] sm:$0xff]  ;;  %3732 = vmatprep.subr.bf16.mxu0 %v3731_v52  ;;  %v3673_v6 = vpack.c.bf16 %v215_v62, %v211_v61 }
  0x75   :  { %v344_v57 = vld [vmem:[%s7281_s2 + $0x6a8] sm:$0xff]  ;;  %v343_v1 = vld [vmem:[%s7281_s2 + $0x6a0] sm:$0xff]  ;;  %3734 = vmatpush1.bf16.msra.mxu0 %v3733_v59 }
  0x76   :  { %v3735_v0 = vpack.c.bf16 %v344_v57, %v340_v56  ;;  %v220_v2 = vld [vmem:[%s7281_s2 + $0x2c8] sm:$0xff]  ;;  %v219_v7 = vld [vmem:[%s7281_s2 + $0x2c0] sm:$0xff]  ;;  %3672 = vmatprep.subr.bf16.mxu1 %v3671_v60  ;;  %v3737_v8 = vpack.c.bf16 %v343_v1, %v339_v63  ;;  %v138_v1 = vld [vmem:[%s7281_s2 + $0x38] sm:$0xff] }
  0x77   :  { %v224_v3 = vld [vmem:[%s7281_s2 + $0x2e8] sm:$0xff]  ;;  %v223_v10 = vld [vmem:[%s7281_s2 + $0x2e0] sm:$0xff]  ;;  %3674 = vmatpush1.bf16.msra.mxu1 %v3673_v6 }
  0x78   :  { %v348_v4 = vld [vmem:[%s7281_s2 + $0x6c8] sm:$0xff]  ;;  %v3675_v9 = vpack.c.bf16 %v224_v3, %v220_v2  ;;  %v347_v11 = vld [vmem:[%s7281_s2 + $0x6c0] sm:$0xff]  ;;  %3736 = vmatprep.subr.bf16.mxu0 %v3735_v0  ;;  %v3677_v20 = vpack.c.bf16 %v223_v10, %v219_v7  ;;  %v134_v0 = vld [vmem:[%s7281_s2 + $0x18] sm:$0xff] }
  0x79   :  { %v352_v5 = vld [vmem:[%s7281_s2 + $0x6e8] sm:$0xff]  ;;  %v351_v12 = vld [vmem:[%s7281_s2 + $0x6e0] sm:$0xff]  ;;  %3738 = vmatpush1.bf16.msra.mxu0 %v3737_v8  ;;  %v3823_v6 = vpack.c.bf16 %v138_v1, %v134_v0  ;;  %v133_v8 = vld [vmem:[%s7281_s2 + $0x10] sm:$0xff] }
  0x7a   :  { %v3739_v13 = vpack.c.bf16 %v352_v5, %v348_v4  ;;  %v228_v14 = vld [vmem:[%s7281_s2 + $0x308] sm:$0xff]  ;;  %3676 = vmatprep.subr.bf16.mxu1 %v3675_v9  ;;  %v3741_v21 = vpack.c.bf16 %v351_v12, %v347_v11  ;;  %v227_v23 = vld [vmem:[%s7281_s2 + $0x300] sm:$0xff]  ;;  %v137_v9 = vld [vmem:[%s7281_s2 + $0x30] sm:$0xff] }
  0x7b   :  { %v232_v15 = vld [vmem:[%s7281_s2 + $0x328] sm:$0xff]  ;;  %v231_v24 = vld [vmem:[%s7281_s2 + $0x320] sm:$0xff]  ;;  %3678 = vmatpush1.bf16.msra.mxu1 %v3677_v20  ;;  %v142_v12 = vld [vmem:[%s7281_s2 + $0x58] sm:$0xff]  ;;  %v3825_v19 = vpack.c.bf16 %v137_v9, %v133_v8 }
  0x7c   :  { %v5596_v16 = vld [vmem:[%s7279_s0 + $0x8] sm:$0xff]  ;;  %v3679_v22 = vpack.c.bf16 %v232_v15, %v228_v14  ;;  %v355_v25 = vld [vmem:[%s7281_s2 + $0x700] sm:$0xff]  ;;  %3740 = vmatprep.subr.bf16.mxu0 %v3739_v13  ;;  %v3681_v32 = vpack.c.bf16 %v231_v24, %v227_v23  ;;  %v146_v13 = vld [vmem:[%s7281_s2 + $0x78] sm:$0xff] }
  0x7d   :  { %v356_v17 = vld [vmem:[%s7281_s2 + $0x708] sm:$0xff]  ;;  %601 = vmatprep.mubr.f32.mxu1 %v5596_v16  ;;  %v359_v27 = vld [vmem:[%s7281_s2 + $0x720] sm:$0xff]  ;;  %3742 = vmatpush1.bf16.msra.mxu0 %v3741_v21  ;;  %v3827_v21 = vpack.c.bf16 %v146_v13, %v142_v12  ;;  %v141_v23 = vld [vmem:[%s7281_s2 + $0x50] sm:$0xff] }
  0x7e   :  { %v360_v18 = vld [vmem:[%s7281_s2 + $0x728] sm:$0xff]  ;;  %3680 = vmatprep.subr.bf16.mxu1 %v3679_v22  ;;  %v3745_v33 = vpack.c.bf16 %v359_v27, %v355_v25  ;;  %v235_v35 = vld [vmem:[%s7281_s2 + $0x340] sm:$0xff]  ;;  %v145_v24 = vld [vmem:[%s7281_s2 + $0x70] sm:$0xff] }
  0x7f   :  { %v3743_v26 = vpack.c.bf16 %v360_v18, %v356_v17  ;;  %v236_v28 = vld [vmem:[%s7281_s2 + $0x348] sm:$0xff]  ;;  %v239_v36 = vld [vmem:[%s7281_s2 + $0x360] sm:$0xff]  ;;  %3682 = vmatpush1.bf16.msra.mxu1 %v3681_v32  ;;  %v85_v18 = vld [vmem:[%s7279_s0 + $0x10] sm:$0xff] }
  0x80   :  { %v240_v29 = vld [vmem:[%s7281_s2 + $0x368] sm:$0xff]  ;;  %v363_v37 = vld [vmem:[%s7281_s2 + $0x740] sm:$0xff]  ;;  %v3685_v44 = vpack.c.bf16 %v239_v36, %v235_v35  ;;  %v150_v27 = vld [vmem:[%s7281_s2 + $0x98] sm:$0xff] }
  0x81   :  { %v364_v30 = vld [vmem:[%s7281_s2 + $0x748] sm:$0xff]  ;;  %v3683_v34 = vpack.c.bf16 %v240_v29, %v236_v28  ;;  %3744 = vmatprep.subr.bf16.mxu0 %v3743_v26  ;;  %v367_v39 = vld [vmem:[%s7281_s2 + $0x760] sm:$0xff]  ;;  %v154_v28 = vld [vmem:[%s7281_s2 + $0xb8] sm:$0xff] }
  0x82   :  { %v368_v31 = vld [vmem:[%s7281_s2 + $0x768] sm:$0xff]  ;;  %3746 = vmatpush1.bf16.msra.mxu0 %v3745_v33  ;;  %v3749_v45 = vpack.c.bf16 %v367_v39, %v363_v37  ;;  %v243_v47 = vld [vmem:[%s7281_s2 + $0x380] sm:$0xff]  ;;  %v5767_v33 = vld [vmem:[%s7279_s0 + $0x38] sm:$0xff]  ;;  %v3831_v37 = vpack.c.bf16 %v154_v28, %v150_v27 }
  0x83   :  { %v3747_v38 = vpack.c.bf16 %v368_v31, %v364_v30  ;;  %v244_v40 = vld [vmem:[%s7281_s2 + $0x388] sm:$0xff]  ;;  %3684 = vmatprep.subr.bf16.mxu1 %v3683_v34  ;;  %v247_v48 = vld [vmem:[%s7281_s2 + $0x3a0] sm:$0xff]  ;;  %v3829_v31 = vpack.c.bf16 %v145_v24, %v141_v23  ;;  %v5775_v35 = vld [vmem:[%s7279_s0 + $0x30] sm:$0xff] }
  0x84   :  { %v248_v41 = vld [vmem:[%s7281_s2 + $0x3a8] sm:$0xff]  ;;  %v371_v49 = vld [vmem:[%s7281_s2 + $0x780] sm:$0xff]  ;;  %3686 = vmatpush1.bf16.msra.mxu1 %v3685_v44  ;;  %v3689_v56 = vpack.c.bf16 %v247_v48, %v243_v47  ;;  %v153_v39 = vld [vmem:[%s7281_s2 + $0xb0] sm:$0xff] }
  0x85   :  { %v372_v42 = vld [vmem:[%s7281_s2 + $0x788] sm:$0xff]  ;;  %v3687_v46 = vpack.c.bf16 %v248_v41, %v244_v40  ;;  %3748 = vmatprep.subr.bf16.mxu0 %v3747_v38  ;;  %v375_v51 = vld [vmem:[%s7281_s2 + $0x7a0] sm:$0xff]  ;;  %v149_v38 = vld [vmem:[%s7281_s2 + $0x90] sm:$0xff] }
  0x86   :  { %v376_v43 = vld [vmem:[%s7281_s2 + $0x7a8] sm:$0xff]  ;;  %3750 = vmatpush1.bf16.msra.mxu0 %v3749_v45  ;;  %v3753_v57 = vpack.c.bf16 %v375_v51, %v371_v49  ;;  %v251_v59 = vld [vmem:[%s7281_s2 + $0x3c0] sm:$0xff]  ;;  %v162_v44 = vld [vmem:[%s7281_s2 + $0xf8] sm:$0xff]  ;;  %v3833_v47 = vpack.c.bf16 %v153_v39, %v149_v38 }
  0x87   :  { %v3751_v50 = vpack.c.bf16 %v376_v43, %v372_v42  ;;  %v252_v52 = vld [vmem:[%s7281_s2 + $0x3c8] sm:$0xff]  ;;  %3688 = vmatprep.subr.bf16.mxu1 %v3687_v46  ;;  %v255_v60 = vld [vmem:[%s7281_s2 + $0x3e0] sm:$0xff]  ;;  %v158_v43 = vld [vmem:[%s7281_s2 + $0xd8] sm:$0xff] }
  0x88   :  { %v256_v53 = vld [vmem:[%s7281_s2 + $0x3e8] sm:$0xff]  ;;  %v379_v61 = vld [vmem:[%s7281_s2 + $0x7c0] sm:$0xff]  ;;  %3690 = vmatpush1.bf16.msra.mxu1 %v3689_v56  ;;  %v3693_v4 = vpack.c.bf16 %v255_v60, %v251_v59  ;;  %v97_v56 = vld [vmem:[%s7279_s0 + $0x70] sm:$0xff] }
  0x89   :  { %v380_v54 = vld [vmem:[%s7281_s2 + $0x7c8] sm:$0xff]  ;;  %v3691_v58 = vpack.c.bf16 %v256_v53, %v252_v52  ;;  %3752 = vmatprep.subr.bf16.mxu0 %v3751_v50  ;;  %v383_v63 = vld [vmem:[%s7281_s2 + $0x7e0] sm:$0xff]  ;;  %v98_v50 = vld [vmem:[%s7279_s0 + $0x78] sm:$0xff]  ;;  %v3835_v53 = vpack.c.bf16 %v162_v44, %v158_v43 }
  0x8a   :  { %v384_v55 = vld [vmem:[%s7281_s2 + $0x7e8] sm:$0xff]  ;;  %3754 = vmatpush1.bf16.msra.mxu0 %v3753_v57  ;;  %v3757_v5 = vpack.c.bf16 %v383_v63, %v379_v61  ;;  %v387_v7 = vld [vmem:[%s7281_s2 + $0x800] sm:$0xff]  ;;  %v166_v59 = vld [vmem:[%s7281_s2 + $0x118] sm:$0xff] }
  0x8b   :  { %v3755_v62 = vpack.c.bf16 %v384_v55, %v380_v54  ;;  %v388_v2 = vld [vmem:[%s7281_s2 + $0x808] sm:$0xff]  ;;  %3692 = vmatprep.subr.bf16.mxu1 %v3691_v58  ;;  %v391_v11 = vld [vmem:[%s7281_s2 + $0x820] sm:$0xff]  ;;  %v157_v54 = vld [vmem:[%s7281_s2 + $0xd0] sm:$0xff] }
  0x8c   :  { %v392_v3 = vld [vmem:[%s7281_s2 + $0x828] sm:$0xff]  ;;  %3694 = vmatpush1.bf16.msra.mxu1 %v3693_v4  ;;  %v5731_v17 = vld [vmem:[%s7279_s0] sm:$0xff]  ;;  %v3761_v20 = vpack.c.bf16 %v391_v11, %v387_v7  ;;  %v161_v55 = vld [vmem:[%s7281_s2 + $0xf0] sm:$0xff] }
  0x8d   :  { %3756 = vmatprep.subr.bf16.mxu0 %v3755_v62  ;;  %v3759_v10 = vpack.c.bf16 %v392_v3, %v388_v2  ;;  %v396_v14 = vld [vmem:[%s7281_s2 + $0x848] sm:$0xff]  ;;  %3824 = vmatprep.subr.bf16.mxu1 %v3823_v6  ;;  %v395_v22 = vld [vmem:[%s7281_s2 + $0x840] sm:$0xff]  ;;  %v170_v60 = vld [vmem:[%s7281_s2 + $0x138] sm:$0xff]  ;;  %v3837_v63 = vpack.c.bf16 %v161_v55, %v157_v54 }
  0x8e   :  { %v400_v15 = vld [vmem:[%s7281_s2 + $0x868] sm:$0xff]  ;;  %3758 = vmatpush1.bf16.msra.mxu0 %v3757_v5  ;;  %v399_v26 = vld [vmem:[%s7281_s2 + $0x860] sm:$0xff]  ;;  %v5851_v1 = vld [vmem:[%s7279_s0 + $0x98] sm:$0xff]  ;;  %v3839_v5 = vpack.c.bf16 %v170_v60, %v166_v59 }
  0x8f   :  { %3760 = vmatprep.subr.bf16.mxu0 %v3759_v10  ;;  %v3763_v25 = vpack.c.bf16 %v400_v15, %v396_v14  ;;  %602 = vmatmul.mubr.f32.vlgmr.msra.gmra.mrb[0].mxu1 %v5731_v17  ;;  %v404_v29 = vld [vmem:[%s7281_s2 + $0x888] sm:$0xff]  ;;  %v403_v32 = vld [vmem:[%s7281_s2 + $0x880] sm:$0xff]  ;;  %v3765_v36 = vpack.c.bf16 %v399_v26, %v395_v22  ;;  %v5859_v3 = vld [vmem:[%s7279_s0 + $0x90] sm:$0xff] }
  0x90   :  { %v408_v30 = vld [vmem:[%s7281_s2 + $0x8a8] sm:$0xff]  ;;  %3826 = vmatpush1.bf16.msra.mxu1 %v3825_v19  ;;  %v91_v40 = vld [vmem:[%s7279_s0 + $0x40] sm:$0xff]  ;;  %607 = vmatprep.mubr.f32.mxu1 %v5767_v33  ;;  %v165_v6 = vld [vmem:[%s7281_s2 + $0x110] sm:$0xff] }
  0x91   :  { %715 = vmatmul.mubr.f32.vlgmr.msra.gmra.mrb[0].mxu0 %v85_v18  ;;  %v92_v34 = vld [vmem:[%s7279_s0 + $0x48] sm:$0xff]  ;;  %3828 = vmatprep.subr.bf16.mxu1 %v3827_v21  ;;  %v3767_v41 = vpack.c.bf16 %v408_v30, %v404_v29  ;;  %v407_v42 = vld [vmem:[%s7281_s2 + $0x8a0] sm:$0xff]  ;;  %v169_v7 = vld [vmem:[%s7281_s2 + $0x130] sm:$0xff] }
  0x92   :  { %3762 = vmatpush1.bf16.msra.mxu0 %v3761_v20  ;;  %v412_v45 = vld [vmem:[%s7281_s2 + $0x8c8] sm:$0xff]  ;;  %720 = vmatprep.mubr.f32.mxu0 %v92_v34  ;;  %v411_v48 = vld [vmem:[%s7281_s2 + $0x8c0] sm:$0xff]  ;;  %v3769_v52 = vpack.c.bf16 %v407_v42, %v403_v32  ;;  %v174_v11 = vld [vmem:[%s7281_s2 + $0x158] sm:$0xff]  ;;  %v3841_v15 = vpack.c.bf16 %v169_v7, %v165_v6 }
  0x93   :  { %3764 = vmatprep.subr.bf16.mxu0 %v3763_v25  ;;  %v416_v46 = vld [vmem:[%s7281_s2 + $0x8e8] sm:$0xff]  ;;  %608 = vmatmul.mubr.f32.gmra.mrb[2].mxu1 %v5775_v35  ;;  %v5817_v51 = vld [vmem:[%s7279_s0 + $0x60] sm:$0xff]  ;;  %v178_v12 = vld [vmem:[%s7281_s2 + $0x178] sm:$0xff] }
  0x94   :  { %3830 = vmatpush1.bf16.msra.mxu1 %v3829_v31  ;;  %v5809_v49 = vld [vmem:[%s7279_s0 + $0x68] sm:$0xff]  ;;  %v3771_v57 = vpack.c.bf16 %v416_v46, %v412_v45  ;;  %v415_v58 = vld [vmem:[%s7281_s2 + $0x8e0] sm:$0xff]  ;;  %v110_v20 = vld [vmem:[%s7279_s0 + $0xd8] sm:$0xff]  ;;  %v3843_v23 = vpack.c.bf16 %v178_v12, %v174_v11 }
  0x95   :  { %721 = vmatmul.mubr.f32.gmra.mrb[2].mxu0 %v91_v40  ;;  %3832 = vmatprep.subr.bf16.mxu1 %v3831_v37  ;;  %v420_v61 = vld [vmem:[%s7281_s2 + $0x908] sm:$0xff]  ;;  %v419_v0 = vld [vmem:[%s7281_s2 + $0x900] sm:$0xff]  ;;  %v3773_v4 = vpack.c.bf16 %v415_v58, %v411_v48  ;;  %v173_v24 = vld [vmem:[%s7281_s2 + $0x150] sm:$0xff] }
  0x96   :  { %3766 = vmatpush1.bf16.msra.mxu0 %v3765_v36  ;;  %613 = vmatprep.mubr.f32.mxu1 %v5809_v49  ;;  %v424_v62 = vld [vmem:[%s7281_s2 + $0x928] sm:$0xff]  ;;  %v103_v8 = vld [vmem:[%s7279_s0 + $0xa0] sm:$0xff]  ;;  %v177_v25 = vld [vmem:[%s7281_s2 + $0x170] sm:$0xff] }
  0x97   :  { %3768 = vmatprep.subr.bf16.mxu0 %v3767_v41  ;;  %726 = vmatprep.mubr.f32.mxu0 %v98_v50  ;;  %v104_v2 = vld [vmem:[%s7279_s0 + $0xa8] sm:$0xff]  ;;  %v3775_v9 = vpack.c.bf16 %v424_v62, %v420_v61  ;;  %v423_v10 = vld [vmem:[%s7281_s2 + $0x920] sm:$0xff]  ;;  %v109_v26 = vld [vmem:[%s7279_s0 + $0xd0] sm:$0xff]  ;;  %v3845_v34 = vpack.c.bf16 %v177_v25, %v173_v24 }
  0x98   :  { %614 = vmatmul.mubr.f32.gmra.mrb[4].mxu1 %v5817_v51  ;;  %v428_v13 = vld [vmem:[%s7281_s2 + $0x948] sm:$0xff]  ;;  %v427_v18 = vld [vmem:[%s7281_s2 + $0x940] sm:$0xff]  ;;  %v3777_v22 = vpack.c.bf16 %v423_v10, %v419_v0  ;;  %v182_v29 = vld [vmem:[%s7281_s2 + $0x198] sm:$0xff] }
  0x99   :  { %3834 = vmatpush1.bf16.msra.mxu1 %v3833_v47  ;;  %727 = vmatmul.mubr.f32.gmra.mrb[4].mxu0 %v97_v56  ;;  %v432_v14 = vld [vmem:[%s7281_s2 + $0x968] sm:$0xff]  ;;  %v5901_v21 = vld [vmem:[%s7279_s0 + $0xc0] sm:$0xff]  ;;  %v186_v30 = vld [vmem:[%s7281_s2 + $0x1b8] sm:$0xff] }
  0x9a   :  { %3770 = vmatpush1.bf16.msra.mxu0 %v3769_v52  ;;  %3836 = vmatprep.subr.bf16.mxu1 %v3835_v53  ;;  %v5893_v19 = vld [vmem:[%s7279_s0 + $0xc8] sm:$0xff]  ;;  %v3779_v27 = vpack.c.bf16 %v432_v14, %v428_v13  ;;  %v431_v28 = vld [vmem:[%s7281_s2 + $0x960] sm:$0xff]  ;;  %v5935_v37 = vld [vmem:[%s7279_s0 + $0xf8] sm:$0xff]  ;;  %v3847_v41 = vpack.c.bf16 %v186_v30, %v182_v29 }
  0x9b   :  { %3772 = vmatprep.subr.bf16.mxu0 %v3771_v57  ;;  %619 = vmatprep.mubr.f32.mxu1 %v5851_v1  ;;  %v436_v31 = vld [vmem:[%s7281_s2 + $0x988] sm:$0xff]  ;;  %v435_v36 = vld [vmem:[%s7281_s2 + $0x980] sm:$0xff]  ;;  %v5945_v39 = vld [vmem:[%s7279_s0 + $0xf0] sm:$0xff]  ;;  %v3781_v40 = vpack.c.bf16 %v431_v28, %v427_v18 }
  0x9c   :  { %732 = vmatprep.mubr.f32.mxu0 %v104_v2  ;;  %620 = vmatmul.mubr.f32.gmra.mrb[6].mxu1 %v5859_v3  ;;  %v440_v32 = vld [vmem:[%s7281_s2 + $0x9a8] sm:$0xff]  ;;  %v181_v42 = vld [vmem:[%s7281_s2 + $0x190] sm:$0xff]  ;;  %v5956_v44 = vld [vmem:[%s7279_s0 + $0x100] sm:$0xff] }
  0x9d   :  { %3838 = vmatpush1.bf16.msra.mxu1 %v3837_v63  ;;  %733 = vmatmul.mubr.f32.gmra.mrb[6].mxu0 %v103_v8  ;;  %v5940_v38 = vld [vmem:[%s7279_s0 + $0x108] sm:$0xff]  ;;  %v185_v43 = vld [vmem:[%s7281_s2 + $0x1b0] sm:$0xff]  ;;  %v3783_v45 = vpack.c.bf16 %v440_v32, %v436_v31  ;;  %v439_v46 = vld [vmem:[%s7281_s2 + $0x9a0] sm:$0xff] }
  0x9e   :  { %3774 = vmatpush1.bf16.msra.mxu0 %v3773_v4  ;;  %3840 = vmatprep.subr.bf16.mxu1 %v3839_v5  ;;  %v190_v47 = vld [vmem:[%s7281_s2 + $0x1d8] sm:$0xff]  ;;  %v444_v50 = vld [vmem:[%s7281_s2 + $0x9c8] sm:$0xff]  ;;  %v3849_v53 = vpack.c.bf16 %v185_v43, %v181_v42  ;;  %v443_v54 = vld [vmem:[%s7281_s2 + $0x9c0] sm:$0xff]  ;;  %v3785_v58 = vpack.c.bf16 %v439_v46, %v435_v36 }
  0x9f   :  { %3776 = vmatprep.subr.bf16.mxu0 %v3775_v9  ;;  %625 = vmatprep.mubr.f32.mxu1 %v5893_v19  ;;  %v194_v48 = vld [vmem:[%s7281_s2 + $0x1f8] sm:$0xff]  ;;  %v448_v52 = vld [vmem:[%s7281_s2 + $0x9e8] sm:$0xff]  ;;  %v5993_v57 = vld [vmem:[%s7279_s0 + $0x120] sm:$0xff] }
  0xa0   :  { %738 = vmatprep.mubr.f32.mxu0 %v110_v20  ;;  %626 = vmatmul.mubr.f32.gmra.mrb[8].mxu1 %v5901_v21  ;;  %v5983_v55 = vld [vmem:[%s7279_s0 + $0x128] sm:$0xff]  ;;  %v5988_v56 = vld [vmem:[%s7279_s0 + $0x138] sm:$0xff]  ;;  %v3851_v59 = vpack.c.bf16 %v194_v48, %v190_v47  ;;  %v189_v60 = vld [vmem:[%s7281_s2 + $0x1d0] sm:$0xff]  ;;  %v3787_v63 = vpack.c.bf16 %v448_v52, %v444_v50 }
  0xa1   :  { %3842 = vmatpush1.bf16.msra.mxu1 %v3841_v15  ;;  %739 = vmatmul.mubr.f32.gmra.mrb[8].mxu0 %v109_v26  ;;  %v193_v61 = vld [vmem:[%s7281_s2 + $0x1f0] sm:$0xff]  ;;  %v447_v0 = vld [vmem:[%s7281_s2 + $0x9e0] sm:$0xff]  ;;  %v198_v2 = vld [vmem:[%s7281_s2 + $0x218] sm:$0xff] }
  0xa2   :  { %3778 = vmatpush1.bf16.msra.mxu0 %v3777_v22  ;;  %3844 = vmatprep.subr.bf16.mxu1 %v3843_v23  ;;  %v6004_v62 = vld [vmem:[%s7279_s0 + $0x130] sm:$0xff]  ;;  %v202_v4 = vld [vmem:[%s7281_s2 + $0x238] sm:$0xff]  ;;  %v452_v5 = vld [vmem:[%s7281_s2 + $0xa08] sm:$0xff]  ;;  %v3853_v7 = vpack.c.bf16 %v193_v61, %v189_v60  ;;  %v3789_v12 = vpack.c.bf16 %v447_v0, %v443_v54 }
  0xa3   :  { %3780 = vmatprep.subr.bf16.mxu0 %v3779_v27  ;;  %631 = vmatprep.mubr.f32.mxu1 %v5935_v37  ;;  %v456_v6 = vld [vmem:[%s7281_s2 + $0xa28] sm:$0xff]  ;;  %v451_v8 = vld [vmem:[%s7281_s2 + $0xa00] sm:$0xff]  ;;  %v6031_v9 = vld [vmem:[%s7279_s0 + $0x158] sm:$0xff]  ;;  %v3855_v13 = vpack.c.bf16 %v202_v4, %v198_v2 }
  0xa4   :  { %744 = vmatprep.mubr.f32.mxu0 %v5940_v38  ;;  %632 = vmatmul.mubr.f32.gmra.mrb[10].mxu1 %v5945_v39  ;;  %v6036_v10 = vld [vmem:[%s7279_s0 + $0x168] sm:$0xff]  ;;  %v6041_v11 = vld [vmem:[%s7279_s0 + $0x150] sm:$0xff]  ;;  %v6052_v18 = vld [vmem:[%s7279_s0 + $0x160] sm:$0xff]  ;;  %v3791_v20 = vpack.c.bf16 %v456_v6, %v452_v5 }
  0xa5   :  { %3846 = vmatpush1.bf16.msra.mxu1 %v3845_v34  ;;  %745 = vmatmul.mubr.f32.gmra.mrb[10].mxu0 %v5956_v44  ;;  %v197_v14 = vld [vmem:[%s7281_s2 + $0x210] sm:$0xff]  ;;  %v455_v22 = vld [vmem:[%s7281_s2 + $0xa20] sm:$0xff]  ;;  %v206_v23 = vld [vmem:[%s7281_s2 + $0x258] sm:$0xff] }
  0xa6   :  { %3782 = vmatpush1.bf16.msra.mxu0 %v3781_v40  ;;  %3848 = vmatprep.subr.bf16.mxu1 %v3847_v41  ;;  %v201_v15 = vld [vmem:[%s7281_s2 + $0x230] sm:$0xff]  ;;  %v210_v24 = vld [vmem:[%s7281_s2 + $0x278] sm:$0xff]  ;;  %v460_v25 = vld [vmem:[%s7281_s2 + $0xa48] sm:$0xff]  ;;  %v3793_v29 = vpack.c.bf16 %v455_v22, %v451_v8 }
  0xa7   :  { %3784 = vmatprep.subr.bf16.mxu0 %v3783_v45  ;;  %637 = vmatprep.mubr.f32.mxu1 %v5983_v55  ;;  %v464_v26 = vld [vmem:[%s7281_s2 + $0xa68] sm:$0xff]  ;;  %v3857_v27 = vpack.c.bf16 %v201_v15, %v197_v14  ;;  %v3859_v30 = vpack.c.bf16 %v210_v24, %v206_v23  ;;  %v459_v31 = vld [vmem:[%s7281_s2 + $0xa40] sm:$0xff]  ;;  %v205_v32 = vld [vmem:[%s7281_s2 + $0x250] sm:$0xff] }
  0xa8   :  { %750 = vmatprep.mubr.f32.mxu0 %v5988_v56  ;;  %638 = vmatmul.mubr.f32.gmra.mrb[12].mxu1 %v5993_v57  ;;  %v6076_v28 = vld [vmem:[%s7279_s0 + $0x28] sm:$0xff]  ;;  %v209_v34 = vld [vmem:[%s7281_s2 + $0x270] sm:$0xff]  ;;  %v3795_v36 = vpack.c.bf16 %v464_v26, %v460_v25  ;;  %v463_v40 = vld [vmem:[%s7281_s2 + $0xa60] sm:$0xff] }
  0xa9   :  { %3850 = vmatpush1.bf16.msra.mxu1 %v3849_v53  ;;  %751 = vmatmul.mubr.f32.gmra.mrb[12].mxu0 %v6004_v62  ;;  %v214_v41 = vld [vmem:[%s7281_s2 + $0x298] sm:$0xff]  ;;  %v468_v43 = vld [vmem:[%s7281_s2 + $0xa88] sm:$0xff]  ;;  %v3861_v46 = vpack.c.bf16 %v209_v34, %v205_v32  ;;  %v3797_v47 = vpack.c.bf16 %v463_v40, %v459_v31  ;;  %v467_v50 = vld [vmem:[%s7281_s2 + $0xa80] sm:$0xff] }
  0xaa   :  { %3786 = vmatpush1.bf16.msra.mxu0 %v3785_v58  ;;  %3852 = vmatprep.subr.bf16.mxu1 %v3851_v59  ;;  %v218_v42 = vld [vmem:[%s7281_s2 + $0x2b8] sm:$0xff]  ;;  %v472_v45 = vld [vmem:[%s7281_s2 + $0xaa8] sm:$0xff]  ;;  %v213_v52 = vld [vmem:[%s7281_s2 + $0x290] sm:$0xff] }
  0xab   :  { %3788 = vmatprep.subr.bf16.mxu0 %v3787_v63  ;;  %643 = vmatprep.mubr.f32.mxu1 %v6031_v9  ;;  %v3863_v48 = vpack.c.bf16 %v218_v42, %v214_v41  ;;  %v217_v53 = vld [vmem:[%s7281_s2 + $0x2b0] sm:$0xff]  ;;  %v471_v54 = vld [vmem:[%s7281_s2 + $0xaa0] sm:$0xff]  ;;  %v222_v58 = vld [vmem:[%s7281_s2 + $0x2d8] sm:$0xff] }
  0xac   :  { %756 = vmatprep.mubr.f32.mxu0 %v6036_v10  ;;  %644 = vmatmul.mubr.f32.gmra.mrb[14].mxu1 %v6041_v11  ;;  %v226_v59 = vld [vmem:[%s7281_s2 + $0x2f8] sm:$0xff]  ;;  %v476_v60 = vld [vmem:[%s7281_s2 + $0xac8] sm:$0xff]  ;;  %v3865_v63 = vpack.c.bf16 %v217_v53, %v213_v52  ;;  %v3801_v0 = vpack.c.bf16 %v471_v54, %v467_v50  ;;  %v475_v4 = vld [vmem:[%s7281_s2 + $0xac0] sm:$0xff] }
  0xad   :  { %3854 = vmatpush1.bf16.msra.mxu1 %v3853_v7  ;;  %757 = vmatmul.mubr.f32.gmra.mrb[14].mxu0 %v6052_v18  ;;  %v480_v61 = vld [vmem:[%s7281_s2 + $0xae8] sm:$0xff]  ;;  %v3867_v2 = vpack.c.bf16 %v226_v59, %v222_v58  ;;  %v221_v5 = vld [vmem:[%s7281_s2 + $0x2d0] sm:$0xff]  ;;  %v479_v8 = vld [vmem:[%s7281_s2 + $0xae0] sm:$0xff] }
  0xae   :  { %3790 = vmatpush1.bf16.msra.mxu0 %v3789_v12  ;;  %3856 = vmatprep.subr.bf16.mxu1 %v3855_v13  ;;  %v225_v6 = vld [vmem:[%s7281_s2 + $0x2f0] sm:$0xff]  ;;  %v3803_v7 = vpack.c.bf16 %v480_v61, %v476_v60  ;;  %v230_v12 = vld [vmem:[%s7281_s2 + $0x318] sm:$0xff]  ;;  %v484_v14 = vld [vmem:[%s7281_s2 + $0xb08] sm:$0xff]  ;;  %v3805_v22 = vpack.c.bf16 %v479_v8, %v475_v4 }
  0xaf   :  { %3792 = vmatprep.subr.bf16.mxu0 %v3791_v20  ;;  %827 = vmatprep.mubr.f32.mxu0 %v6076_v28  ;;  %v234_v13 = vld [vmem:[%s7281_s2 + $0x338] sm:$0xff]  ;;  %v488_v15 = vld [vmem:[%s7281_s2 + $0xb28] sm:$0xff]  ;;  %v3869_v20 = vpack.c.bf16 %v225_v6, %v221_v5  ;;  %v483_v24 = vld [vmem:[%s7281_s2 + $0xb00] sm:$0xff] }
  0xb0   :  { %940 = vmatprep.mubr.f32.mxu1 %v5596_v16  ;;  %v3799_v16 = vpack.c.bf16 %v472_v45, %v468_v43  ;;  %v3871_v23 = vpack.c.bf16 %v234_v13, %v230_v12  ;;  %v229_v25 = vld [vmem:[%s7281_s2 + $0x310] sm:$0xff]  ;;  %v242_v31 = vld [vmem:[%s7281_s2 + $0x378] sm:$0xff]  ;;  %v492_v32 = vld [vmem:[%s7281_s2 + $0xb48] sm:$0xff] }
  0xb1   :  { %3858 = vmatpush1.bf16.msra.mxu1 %v3857_v27  ;;  %v233_v26 = vld [vmem:[%s7281_s2 + $0x330] sm:$0xff]  ;;  %v3807_v27 = vpack.c.bf16 %v488_v15, %v484_v14  ;;  %v496_v34 = vld [vmem:[%s7281_s2 + $0xb68] sm:$0xff]  ;;  %v491_v42 = vld [vmem:[%s7281_s2 + $0xb40] sm:$0xff] }
  0xb2   :  { %3794 = vmatpush1.bf16.msra.mxu0 %v3793_v29  ;;  %3860 = vmatprep.subr.bf16.mxu1 %v3859_v30  ;;  %v487_v29 = vld [vmem:[%s7281_s2 + $0xb20] sm:$0xff]  ;;  %v238_v30 = vld [vmem:[%s7281_s2 + $0x358] sm:$0xff]  ;;  %v237_v43 = vld [vmem:[%s7281_s2 + $0x350] sm:$0xff] }
  0xb3   :  { %3796 = vmatprep.subr.bf16.mxu0 %v3795_v36  ;;  %v3873_v36 = vpack.c.bf16 %v233_v26, %v229_v25  ;;  %v3809_v40 = vpack.c.bf16 %v487_v29, %v483_v24  ;;  %v3875_v41 = vpack.c.bf16 %v242_v31, %v238_v30  ;;  %v241_v45 = vld [vmem:[%s7281_s2 + $0x370] sm:$0xff]  ;;  %v250_v50 = vld [vmem:[%s7281_s2 + $0x3b8] sm:$0xff]  ;;  %v500_v52 = vld [vmem:[%s7281_s2 + $0xb88] sm:$0xff] }
  0xb4   :  { %v504_v53 = vld [vmem:[%s7281_s2 + $0xba8] sm:$0xff]  ;;  %v499_v59 = vld [vmem:[%s7281_s2 + $0xb80] sm:$0xff]  ;;  %v245_v60 = vld [vmem:[%s7281_s2 + $0x390] sm:$0xff] }
  0xb5   :  { %3862 = vmatpush1.bf16.msra.mxu1 %v3861_v46  ;;  %v3811_v46 = vpack.c.bf16 %v496_v34, %v492_v32  ;;  %v249_v61 = vld [vmem:[%s7281_s2 + $0x3b0] sm:$0xff]  ;;  %v258_v4 = vld [vmem:[%s7281_s2 + $0x3f8] sm:$0xff]  ;;  %v508_v5 = vld [vmem:[%s7281_s2 + $0xbc8] sm:$0xff] }
  0xb6   :  { %3798 = vmatpush1.bf16.msra.mxu0 %v3797_v47  ;;  %3864 = vmatprep.subr.bf16.mxu1 %v3863_v48  ;;  %v495_v47 = vld [vmem:[%s7281_s2 + $0xb60] sm:$0xff]  ;;  %v246_v48 = vld [vmem:[%s7281_s2 + $0x398] sm:$0xff]  ;;  %v512_v6 = vld [vmem:[%s7281_s2 + $0xbe8] sm:$0xff] }
  0xb7   :  { %3800 = vmatprep.subr.bf16.mxu0 %v3799_v16  ;;  %v3877_v16 = vpack.c.bf16 %v241_v45, %v237_v43  ;;  %v3813_v54 = vpack.c.bf16 %v495_v47, %v491_v42  ;;  %v3879_v58 = vpack.c.bf16 %v250_v50, %v246_v48  ;;  %v507_v13 = vld [vmem:[%s7281_s2 + $0xbc0] sm:$0xff]  ;;  %v253_v14 = vld [vmem:[%s7281_s2 + $0x3d0] sm:$0xff]  ;;  %v266_v24 = vld [vmem:[%s7281_s2 + $0x438] sm:$0xff] }
  0xb8   :  { %v257_v15 = vld [vmem:[%s7281_s2 + $0x3f0] sm:$0xff]  ;;  %v274_v42 = vld [vmem:[%s7281_s2 + $0x478] sm:$0xff] }
  0xb9   :  { %3866 = vmatpush1.bf16.msra.mxu1 %v3865_v63  ;;  %v3815_v63 = vpack.c.bf16 %v504_v53, %v500_v52  ;;  %v1257_v25 = vld [vmem:[#allocation7 + $0x8] sm:$0xff]  ;;  %v6266_v50 = vld [vmem:[%s7279_s0 + $0x58] sm:$0xff] }
  0xba   :  { %3802 = vmatpush1.bf16.msra.mxu0 %v3801_v0  ;;  %3868 = vmatprep.subr.bf16.mxu1 %v3867_v2  ;;  %v503_v0 = vld [vmem:[%s7281_s2 + $0xba0] sm:$0xff]  ;;  %v254_v2 = vld [vmem:[%s7281_s2 + $0x3d8] sm:$0xff]  ;;  %v1261_v26 = vld [vmem:[#allocation7 + $0x28] sm:$0xff] }
  0xbb   :  { %3804 = vmatprep.subr.bf16.mxu0 %v3803_v7  ;;  %v3881_v7 = vpack.c.bf16 %v249_v61, %v245_v60  ;;  %v3817_v8 = vpack.c.bf16 %v503_v0, %v499_v59  ;;  %v3883_v12 = vpack.c.bf16 %v258_v4, %v254_v2  ;;  %v261_v31 = vld [vmem:[%s7281_s2 + $0x410] sm:$0xff]  ;;  %v6248_v34 = vpack.c.bf16 %v1261_v26, %v1257_v25  ;;  %v1268_v59 = vld [vmem:[#allocation7 + $0x60] sm:$0xff]  ;;  %v278_v60 = vld [vmem:[%s7281_s2 + $0x498] sm:$0xff] }
  0xbc   :  { %v265_v32 = vld [vmem:[%s7281_s2 + $0x430] sm:$0xff]  ;;  %v282_v61 = vld [vmem:[%s7281_s2 + $0x4b8] sm:$0xff] }
  0xbd   :  { %3870 = vmatpush1.bf16.msra.mxu1 %v3869_v20  ;;  %v3819_v20 = vpack.c.bf16 %v512_v6, %v508_v5  ;;  %v1265_v43 = vld [vmem:[#allocation7 + $0x48] sm:$0xff]  ;;  %v3889_v47 = vpack.c.bf16 %v265_v32, %v261_v31  ;;  %v1280_v32 = vld [vmem:[#allocation7 + $0xc0] sm:$0xff] }
  0xbe   :  { %3806 = vmatpush1.bf16.msra.mxu0 %v3805_v22  ;;  %3872 = vmatprep.subr.bf16.mxu1 %v3871_v23  ;;  %v511_v22 = vld [vmem:[%s7281_s2 + $0xbe0] sm:$0xff]  ;;  %v262_v23 = vld [vmem:[%s7281_s2 + $0x418] sm:$0xff]  ;;  %v1269_v45 = vld [vmem:[#allocation7 + $0x68] sm:$0xff] }
  0xbf   :  { %3808 = vmatprep.subr.bf16.mxu0 %v3807_v27  ;;  %v3885_v27 = vpack.c.bf16 %v257_v15, %v253_v14  ;;  %v3821_v29 = vpack.c.bf16 %v511_v22, %v507_v13  ;;  %v3887_v30 = vpack.c.bf16 %v266_v24, %v262_v23  ;;  %v269_v52 = vld [vmem:[%s7281_s2 + $0x450] sm:$0xff]  ;;  %v6297_v5 = vld [vmem:[%s7279_s0 + $0x88] sm:$0xff]  ;;  %v286_v15 = vld [vmem:[%s7281_s2 + $0x4d8] sm:$0xff] }
  0xc0   :  { %v273_v53 = vld [vmem:[%s7281_s2 + $0x470] sm:$0xff]  ;;  %v1272_v13 = vld [vmem:[#allocation7 + $0x80] sm:$0xff] }
  0xc1   :  { %3874 = vmatpush1.bf16.msra.mxu1 %v3873_v36  ;;  %v1256_v36 = vld [vmem:[#allocation7] sm:$0xff]  ;;  %v1277_v0 = vld [vmem:[#allocation7 + $0xa8] sm:$0xff]  ;;  %v3893_v4 = vpack.c.bf16 %v273_v53, %v269_v52 }
  0xc2   :  { %3810 = vmatpush1.bf16.msra.mxu0 %v3809_v40  ;;  %3876 = vmatprep.subr.bf16.mxu1 %v3875_v41  ;;  %v1260_v40 = vld [vmem:[#allocation7 + $0x20] sm:$0xff]  ;;  %v270_v41 = vld [vmem:[%s7281_s2 + $0x458] sm:$0xff]  ;;  %v6288_v2 = vld [vmem:[%s7279_s0 + $0x50] sm:$0xff] }
  0xc3   :  { %3812 = vmatprep.subr.bf16.mxu0 %v3811_v46  ;;  %v6259_v46 = vld [vmem:[%s7279_s0 + $0x20] sm:$0xff]  ;;  %v6261_v48 = vpack.c.bf16 %v1260_v40, %v1256_v36  ;;  %v277_v6 = vld [vmem:[%s7281_s2 + $0x490] sm:$0xff]  ;;  %v294_v40 = vld [vmem:[%s7281_s2 + $0x518] sm:$0xff] }
  0xc4   :  { %v1276_v14 = vld [vmem:[#allocation7 + $0xa0] sm:$0xff]  ;;  %v1281_v22 = vld [vmem:[#allocation7 + $0xc8] sm:$0xff] }
  0xc5   :  { %3878 = vmatpush1.bf16.msra.mxu1 %v3877_v16  ;;  %v3891_v16 = vpack.c.bf16 %v274_v42, %v270_v41  ;;  %v1285_v23 = vld [vmem:[#allocation7 + $0xe8] sm:$0xff]  ;;  %v6319_v24 = vld [vmem:[%s7279_s0 + $0x80] sm:$0xff]  ;;  %v6323_v26 = vpack.c.bf16 %v1276_v14, %v1272_v13  ;;  %v298_v41 = vld [vmem:[%s7281_s2 + $0x538] sm:$0xff] }
  0xc6   :  { %3814 = vmatpush1.bf16.msra.mxu0 %v3813_v54  ;;  %3880 = vmatprep.subr.bf16.mxu1 %v3879_v58  ;;  %v6275_v54 = vpack.c.bf16 %v1269_v45, %v1265_v43  ;;  %v1264_v58 = vld [vmem:[#allocation7 + $0x40] sm:$0xff]  ;;  %v6337_v31 = vpack.c.bf16 %v1285_v23, %v1281_v22  ;;  %v1289_v42 = vld [vmem:[#allocation7 + $0x108] sm:$0xff]  ;;  %v6390_v14 = vld [vmem:[%s7279_s0 + $0x118] sm:$0xff] }
  0xc7   :  { %3816 = vmatprep.subr.bf16.mxu0 %v3815_v63  ;;  %v1273_v63 = vld [vmem:[#allocation7 + $0x88] sm:$0xff]  ;;  %v1284_v36 = vld [vmem:[#allocation7 + $0xe0] sm:$0xff] }
  0xc8   :  { %v1293_v43 = vld [vmem:[#allocation7 + $0x128] sm:$0xff]  ;;  %v6354_v52 = vpack.c.bf16 %v1284_v36, %v1280_v32  ;;  %v1296_v23 = vld [vmem:[#allocation7 + $0x140] sm:$0xff] }
  0xc9   :  { %3882 = vmatpush1.bf16.msra.mxu1 %v3881_v7  ;;  %v281_v7 = vld [vmem:[%s7281_s2 + $0x4b0] sm:$0xff]  ;;  %v6359_v53 = vld [vmem:[%s7279_s0 + $0xe8] sm:$0xff] }
  0xca   :  { %3818 = vmatpush1.bf16.msra.mxu0 %v3817_v8  ;;  %3884 = vmatprep.subr.bf16.mxu1 %v3883_v12  ;;  %v3895_v8 = vpack.c.bf16 %v282_v61, %v278_v60  ;;  %v6306_v12 = vpack.c.bf16 %v1277_v0, %v1273_v63  ;;  %v3897_v25 = vpack.c.bf16 %v281_v7, %v277_v6  ;;  %v6350_v45 = vld [vmem:[%s7279_s0 + $0xb0] sm:$0xff]  ;;  %v1288_v60 = vld [vmem:[#allocation7 + $0x100] sm:$0xff]  ;;  %v302_v63 = vld [vmem:[%s7281_s2 + $0x558] sm:$0xff] }
  0xcb   :  { %3820 = vmatprep.subr.bf16.mxu0 %v3819_v20  ;;  %v290_v20 = vld [vmem:[%s7281_s2 + $0x4f8] sm:$0xff]  ;;  %v1292_v61 = vld [vmem:[#allocation7 + $0x120] sm:$0xff]  ;;  %v1301_v6 = vld [vmem:[#allocation7 + $0x168] sm:$0xff] }
  0xcc   :  { %v306_v0 = vld [vmem:[%s7281_s2 + $0x578] sm:$0xff]  ;;  %v6381_v7 = vld [vmem:[%s7279_s0 + $0xe0] sm:$0xff]  ;;  %v6385_v13 = vpack.c.bf16 %v1292_v61, %v1288_v60  ;;  %v1309_v32 = vld [vmem:[#allocation7 + $0x1a8] sm:$0xff] }
  0xcd   :  { %3886 = vmatpush1.bf16.msra.mxu1 %v3885_v27  ;;  %v6328_v27 = vld [vmem:[%s7279_s0 + $0xb8] sm:$0xff]  ;;  %v6412_v36 = vld [vmem:[%s7279_s0 + $0x110] sm:$0xff] }
  0xce   :  { %3822 = vmatpush1.bf16.msra.mxu0 %v3821_v29  ;;  %3888 = vmatprep.subr.bf16.mxu1 %v3887_v30  ;;  %v289_v29 = vld [vmem:[%s7281_s2 + $0x4f0] sm:$0xff]  ;;  %v3899_v30 = vpack.c.bf16 %v290_v20, %v286_v15  ;;  %v3907_v20 = vpack.c.bf16 %v306_v0, %v302_v63  ;;  %v318_v60 = vld [vmem:[%s7281_s2 + $0x5d8] sm:$0xff] }
  0xcf   :  { %4016 = vmatprep.subr.bf16.mxu0 %v6248_v34  ;;  %v305_v15 = vld [vmem:[%s7281_s2 + $0x570] sm:$0xff]  ;;  %v322_v61 = vld [vmem:[%s7281_s2 + $0x5f8] sm:$0xff] }
  0xd0   :  { %941 = vmatmul.mubr.f32.vlgmr.msra.gmra.mrb[16].mxu1 %v5731_v17  ;;  %v6292_v17 = vpack.c.bf16 %v1268_v59, %v1264_v58  ;;  %v3903_v58 = vpack.c.bf16 %v298_v41, %v294_v40  ;;  %v6368_v59 = vpack.c.bf16 %v1293_v43, %v1289_v42  ;;  %v6421_v42 = vld [vmem:[%s7279_s0 + $0x148] sm:$0xff]  ;;  %v313_v43 = vld [vmem:[%s7281_s2 + $0x5b0] sm:$0xff] }
  0xd1   :  { %828 = vmatmul.mubr.f32.vlgmr.msra.gmra.mrb[0].mxu0 %v6259_v46  ;;  %3890 = vmatpush1.bf16.msra.mxu1 %v3889_v47  ;;  %v1313_v63 = vld [vmem:[#allocation7 + $0x1c8] sm:$0xff] }
  0xd2   :  { %4018 = vmatpush1.bf16.msra.mxu0 %v6261_v48  ;;  %833 = vmatprep.mubr.f32.mxu0 %v6266_v50  ;;  %v1317_v0 = vld [vmem:[#allocation7 + $0x1e8] sm:$0xff] }
  0xd3   :  { %3892 = vmatprep.subr.bf16.mxu1 %v3891_v16  ;;  %4020 = vmatprep.subr.bf16.mxu0 %v6275_v54  ;;  %v297_v16 = vld [vmem:[%s7281_s2 + $0x530] sm:$0xff] }
  0xd4   :  { %946 = vmatprep.mubr.f32.mxu1 %v5767_v33  ;;  %v285_v33 = vld [vmem:[%s7281_s2 + $0x4d0] sm:$0xff] }
  0xd5   :  { %834 = vmatmul.mubr.f32.gmra.mrb[2].mxu0 %v6288_v2  ;;  %3894 = vmatpush1.bf16.msra.mxu1 %v3893_v4  ;;  %v3901_v47 = vpack.c.bf16 %v289_v29, %v285_v33  ;;  %v1297_v4 = vld [vmem:[#allocation7 + $0x148] sm:$0xff]  ;;  %v310_v33 = vld [vmem:[%s7281_s2 + $0x598] sm:$0xff] }
  0xd6   :  { %4022 = vmatpush1.bf16.msra.mxu0 %v6292_v17  ;;  %839 = vmatprep.mubr.f32.mxu0 %v6297_v5  ;;  %v6399_v22 = vpack.c.bf16 %v1301_v6, %v1297_v4  ;;  %v314_v29 = vld [vmem:[%s7281_s2 + $0x5b8] sm:$0xff]  ;;  %v6445_v6 = vld [vmem:[%s7279_s0 + $0x140] sm:$0xff] }
  0xd7   :  { %3896 = vmatprep.subr.bf16.mxu1 %v3895_v8  ;;  %4024 = vmatprep.subr.bf16.mxu0 %v6306_v12 }
  0xd8   :  { %947 = vmatmul.mubr.f32.gmra.mrb[18].mxu1 %v5775_v35  ;;  %v293_v35 = vld [vmem:[%s7281_s2 + $0x510] sm:$0xff] }
  0xd9   :  { %840 = vmatmul.mubr.f32.gmra.mrb[4].mxu0 %v6319_v24  ;;  %3898 = vmatpush1.bf16.msra.mxu1 %v3897_v25  ;;  %v3905_v8 = vpack.c.bf16 %v297_v16, %v293_v35  ;;  %v1300_v25 = vld [vmem:[#allocation7 + $0x160] sm:$0xff] }
  0xda   :  { %4026 = vmatpush1.bf16.msra.mxu0 %v6323_v26  ;;  %845 = vmatprep.mubr.f32.mxu0 %v6328_v27  ;;  %v6416_v41 = vpack.c.bf16 %v1300_v25, %v1296_v23  ;;  %v1304_v16 = vld [vmem:[#allocation7 + $0x180] sm:$0xff]  ;;  %v6461_v23 = vpack.c.bf16 %v1317_v0, %v1313_v63  ;;  %v333_v0 = vld [vmem:[%s7281_s2 + $0x650] sm:$0xff] }
  0xdb   :  { %3900 = vmatprep.subr.bf16.mxu1 %v3899_v30  ;;  %4028 = vmatprep.subr.bf16.mxu0 %v6337_v31  ;;  %v1305_v30 = vld [vmem:[#allocation7 + $0x188] sm:$0xff]  ;;  %v1312_v25 = vld [vmem:[#allocation7 + $0x1c0] sm:$0xff] }
  0xdc   :  { %952 = vmatprep.mubr.f32.mxu1 %v5809_v49  ;;  %v301_v49 = vld [vmem:[%s7281_s2 + $0x550] sm:$0xff]  ;;  %v6430_v35 = vpack.c.bf16 %v1309_v32, %v1305_v30  ;;  %v330_v30 = vld [vmem:[%s7281_s2 + $0x638] sm:$0xff] }
  0xdd   :  { %846 = vmatmul.mubr.f32.gmra.mrb[6].mxu0 %v6350_v45  ;;  %3902 = vmatpush1.bf16.msra.mxu1 %v3901_v47  ;;  %v3909_v40 = vpack.c.bf16 %v305_v15, %v301_v49  ;;  %v3911_v47 = vpack.c.bf16 %v314_v29, %v310_v33  ;;  %v317_v49 = vld [vmem:[%s7281_s2 + $0x5d0] sm:$0xff]  ;;  %v6459_v15 = vld [vmem:[%s7279_s0 + $0x178] sm:$0xff]  ;;  %v1316_v33 = vld [vmem:[#allocation7 + $0x1e0] sm:$0xff] }
  0xde   :  { %4030 = vmatpush1.bf16.msra.mxu0 %v6354_v52  ;;  %851 = vmatprep.mubr.f32.mxu0 %v6359_v53  ;;  %v326_v29 = vld [vmem:[%s7281_s2 + $0x618] sm:$0xff] }
  0xdf   :  { %3904 = vmatprep.subr.bf16.mxu1 %v3903_v58  ;;  %4032 = vmatprep.subr.bf16.mxu0 %v6368_v59  ;;  %v1308_v58 = vld [vmem:[#allocation7 + $0x1a0] sm:$0xff] }
  0xe0   :  { %953 = vmatmul.mubr.f32.gmra.mrb[20].mxu1 %v5817_v51  ;;  %v309_v51 = vld [vmem:[%s7281_s2 + $0x590] sm:$0xff] }
  0xe1   :  { %852 = vmatmul.mubr.f32.gmra.mrb[8].mxu0 %v6381_v7  ;;  %3906 = vmatpush1.bf16.msra.mxu1 %v3905_v8  ;;  %v3913_v4 = vpack.c.bf16 %v313_v43, %v309_v51  ;;  %v6447_v8 = vpack.c.bf16 %v1308_v58, %v1304_v16  ;;  %v6478_v51 = vpack.c.bf16 %v1316_v33, %v1312_v25  ;;  %v325_v43 = vld [vmem:[%s7281_s2 + $0x610] sm:$0xff]  ;;  %v334_v16 = vld [vmem:[%s7281_s2 + $0x658] sm:$0xff] }
  0xe2   :  { %4034 = vmatpush1.bf16.msra.mxu0 %v6385_v13  ;;  %857 = vmatprep.mubr.f32.mxu0 %v6390_v14  ;;  %v338_v58 = vld [vmem:[%s7281_s2 + $0x678] sm:$0xff]  ;;  %v341_v25 = vld [vmem:[%s7281_s2 + $0x690] sm:$0xff] }
  0xe3   :  { %3908 = vmatprep.subr.bf16.mxu1 %v3907_v20  ;;  %4036 = vmatprep.subr.bf16.mxu0 %v6399_v22  ;;  %v3915_v20 = vpack.c.bf16 %v322_v61, %v318_v60  ;;  %v7289_v61 = vmov 0.0   ;;  %v3923_v63 = vpack.c.bf16 %v338_v58, %v334_v16  ;;  %v345_v33 = vld [vmem:[%s7281_s2 + $0x6b0] sm:$0xff] }
  0xe4   :  { %958 = vmatprep.mubr.f32.mxu1 %v5851_v1  ;;  %v321_v1 = vld [vmem:[%s7281_s2 + $0x5f0] sm:$0xff] }
  0xe5   :  { %858 = vmatmul.mubr.f32.gmra.mrb[10].mxu0 %v6412_v36  ;;  %3910 = vmatpush1.bf16.msra.mxu1 %v3909_v40  ;;  %v3917_v32 = vpack.c.bf16 %v321_v1, %v317_v49  ;;  %v6476_v40 = vld [vmem:[%s7279_s0 + $0x170] sm:$0xff]  ;;  %v346_v49 = vld [vmem:[%s7281_s2 + $0x6b8] sm:$0xff] }
  0xe6   :  { %4038 = vmatpush1.bf16.msra.mxu0 %v6416_v41  ;;  %863 = vmatprep.mubr.f32.mxu0 %v6421_v42  ;;  %v357_v16 = vld [vmem:[%s7281_s2 + $0x710] sm:$0xff] }
  0xe7   :  { %3912 = vmatprep.subr.bf16.mxu1 %v3911_v47  ;;  %4040 = vmatprep.subr.bf16.mxu0 %v6430_v35  ;;  %v3919_v47 = vpack.c.bf16 %v330_v30, %v326_v29  ;;  %v3929_v29 = vpack.c.bf16 %v345_v33, %v341_v25  ;;  %v361_v58 = vld [vmem:[%s7281_s2 + $0x730] sm:$0xff] }
  0xe8   :  { %959 = vmatmul.mubr.f32.gmra.mrb[22].mxu1 %v5859_v3  ;;  %v329_v3 = vld [vmem:[%s7281_s2 + $0x630] sm:$0xff] }
  0xe9   :  { %864 = vmatmul.mubr.f32.gmra.mrb[12].mxu0 %v6445_v6  ;;  %3914 = vmatpush1.bf16.msra.mxu1 %v3913_v4  ;;  %v3921_v60 = vpack.c.bf16 %v329_v3, %v325_v43  ;;  %v337_v4 = vld [vmem:[%s7281_s2 + $0x670] sm:$0xff] }
  0xea   :  { %4042 = vmatpush1.bf16.msra.mxu0 %v6447_v8  ;;  %869 = vmatprep.mubr.f32.mxu0 %v6459_v15  ;;  %v3925_v1 = vpack.c.bf16 %v337_v4, %v333_v0  ;;  %v353_v43 = vld [vmem:[%s7281_s2 + $0x6f0] sm:$0xff] }
  0xeb   :  { %3916 = vmatprep.subr.bf16.mxu1 %v3915_v20  ;;  %4044 = vmatprep.subr.bf16.mxu0 %v6461_v23  ;;  %v365_v4 = vld [vmem:[%s7281_s2 + $0x750] sm:$0xff] }
  0xec   :  { %964 = vmatprep.mubr.f32.mxu1 %v5893_v19  ;;  %v342_v19 = vld [vmem:[%s7281_s2 + $0x698] sm:$0xff]  ;;  %v373_v25 = vld [vmem:[%s7281_s2 + $0x790] sm:$0xff] }
  0xed   :  { %870 = vmatmul.mubr.f32.gmra.mrb[14].mxu0 %v6476_v40  ;;  %3918 = vmatpush1.bf16.msra.mxu1 %v3917_v32  ;;  %v3927_v20 = vpack.c.bf16 %v346_v49, %v342_v19  ;;  %v349_v32 = vld [vmem:[%s7281_s2 + $0x6d0] sm:$0xff]  ;;  %v378_v49 = vld [vmem:[%s7281_s2 + $0x7b8] sm:$0xff] }
  0xee   :  { %4046 = vmatpush1.bf16.msra.mxu0 %v6478_v51  ;;  %1384 = vmatprep.mubr.f32.mxu0 %v7289_v61  ;;  %v3933_v3 = vpack.c.bf16 %v353_v43, %v349_v32  ;;  %v369_v19 = vld [vmem:[%s7281_s2 + $0x770] sm:$0xff] }
  0xef   :  { %3920 = vmatprep.subr.bf16.mxu1 %v3919_v47  ;;  %965 = vmatmul.mubr.f32.gmra.mrb[24].mxu1 %v5901_v21  ;;  %v350_v21 = vld [vmem:[%s7281_s2 + $0x6d8] sm:$0xff]  ;;  %v377_v33 = vld [vmem:[%s7281_s2 + $0x7b0] sm:$0xff] }
  0xf0   :  { %970 = vmatprep.mubr.f32.mxu1 %v5935_v37  ;;  %4080 = vmatprep.subr.bf16.mxu0 %v6248_v34  ;;  %v354_v37 = vld [vmem:[%s7281_s2 + $0x6f8] sm:$0xff]  ;;  %v381_v32 = vld [vmem:[%s7281_s2 + $0x7d0] sm:$0xff] }
  0xf1   :  { %1385 = vmatmul.mubr.f32.vlgmr.msra.gmra.mrb[0].mxu0 %v7289_v61  ;;  %3922 = vmatpush1.bf16.msra.mxu1 %v3921_v60  ;;  %v3931_v30 = vpack.c.bf16 %v354_v37, %v350_v21  ;;  %v5098_v60 = vld [vmem:[%s7279_s0 + $0x18] sm:$0xff]  ;;  %v385_v43 = vld [vmem:[%s7281_s2 + $0x7f0] sm:$0xff] }
  0xf2   :  { %3924 = vmatprep.subr.bf16.mxu1 %v3923_v63  ;;  %4082 = vmatpush1.bf16.msra.mxu0 %v6261_v48  ;;  %v3937_v63 = vpack.c.bf16 %v361_v58, %v357_v16  ;;  %v382_v21 = vld [vmem:[%s7281_s2 + $0x7d8] sm:$0xff]  ;;  %v389_v16 = vld [vmem:[%s7281_s2 + $0x810] sm:$0xff] }
  0xf3   :  { %971 = vmatmul.mubr.f32.gmra.mrb[26].mxu1 %v5945_v39  ;;  %4084 = vmatprep.subr.bf16.mxu0 %v6275_v54  ;;  %v358_v39 = vld [vmem:[%s7281_s2 + $0x718] sm:$0xff]  ;;  %v393_v58 = vld [vmem:[%s7281_s2 + $0x830] sm:$0xff] }
  0xf4   :  { %976 = vmatprep.mubr.f32.mxu1 %v5983_v55  ;;  %1561 = vmatprep.mubr.f32.mxu0 %v7289_v61  ;;  %v362_v55 = vld [vmem:[%s7281_s2 + $0x738] sm:$0xff] }
  0xf5   :  { %3926 = vmatpush1.bf16.msra.mxu1 %v3925_v1  ;;  %v3935_v47 = vpack.c.bf16 %v362_v55, %v358_v39  ;;  %v3941_v1 = vpack.c.bf16 %v369_v19, %v365_v4  ;;  %v386_v37 = vld [vmem:[%s7281_s2 + $0x7f8] sm:$0xff]  ;;  %v401_v4 = vld [vmem:[%s7281_s2 + $0x870] sm:$0xff] }
  0xf6   :  { %3928 = vmatprep.subr.bf16.mxu1 %v3927_v20  ;;  %4086 = vmatpush1.bf16.msra.mxu0 %v6292_v17  ;;  %v390_v39 = vld [vmem:[%s7281_s2 + $0x818] sm:$0xff] }
  0xf7   :  { %977 = vmatmul.mubr.f32.gmra.mrb[28].mxu1 %v5993_v57  ;;  %4088 = vmatprep.subr.bf16.mxu0 %v6306_v12  ;;  %v366_v57 = vld [vmem:[%s7281_s2 + $0x758] sm:$0xff] }
  0xf8   :  { %982 = vmatprep.mubr.f32.mxu1 %v6031_v9  ;;  %v370_v9 = vld [vmem:[%s7281_s2 + $0x778] sm:$0xff] }
  0xf9   :  { %3930 = vmatpush1.bf16.msra.mxu1 %v3929_v29  ;;  %v3939_v0 = vpack.c.bf16 %v370_v9, %v366_v57  ;;  %v3945_v29 = vpack.c.bf16 %v377_v33, %v373_v25  ;;  %v394_v55 = vld [vmem:[%s7281_s2 + $0x838] sm:$0xff]  ;;  %v405_v33 = vld [vmem:[%s7281_s2 + $0x890] sm:$0xff] }
  0xfa   :  { %3932 = vmatprep.subr.bf16.mxu1 %v3931_v30  ;;  %4090 = vmatpush1.bf16.msra.mxu0 %v6323_v26  ;;  %v3947_v30 = vpack.c.bf16 %v386_v37, %v382_v21  ;;  %v398_v57 = vld [vmem:[%s7281_s2 + $0x858] sm:$0xff]  ;;  %v409_v21 = vld [vmem:[%s7281_s2 + $0x8b0] sm:$0xff] }
  0xfb   :  { %983 = vmatmul.mubr.f32.gmra.mrb[30].mxu1 %v6041_v11  ;;  %4092 = vmatprep.subr.bf16.mxu0 %v6337_v31  ;;  %v374_v11 = vld [vmem:[%s7281_s2 + $0x798] sm:$0xff] }
  0xfc   :  { %1053 = vmatprep.mubr.f32.mxu1 %v5098_v60  ;;  %v3943_v20 = vpack.c.bf16 %v378_v49, %v374_v11  ;;  %v402_v9 = vld [vmem:[%s7281_s2 + $0x878] sm:$0xff]  ;;  %v3953_v60 = vpack.c.bf16 %v393_v58, %v389_v16  ;;  %v5099_v49 = vld [vmem:[%s7279_s0 + $0x10] sm:$0xff] }
  0xfd   :  { %3934 = vmatpush1.bf16.msra.mxu1 %v3933_v3  ;;  %v3949_v3 = vpack.c.bf16 %v385_v43, %v381_v32  ;;  %v406_v19 = vld [vmem:[%s7281_s2 + $0x898] sm:$0xff]  ;;  %v3961_v32 = vpack.c.bf16 %v409_v21, %v405_v33  ;;  %v5103_v58 = vld [vmem:[%s7279_s0 + $0x70] sm:$0xff] }
  0xfe   :  { %3936 = vmatprep.subr.bf16.mxu1 %v3935_v47  ;;  %4094 = vmatpush1.bf16.msra.mxu0 %v6354_v52  ;;  %v3951_v47 = vpack.c.bf16 %v394_v55, %v390_v39  ;;  %v410_v11 = vld [vmem:[%s7281_s2 + $0x8b8] sm:$0xff]  ;;  %v413_v55 = vld [vmem:[%s7281_s2 + $0x8d0] sm:$0xff] }
  0xff   :  { %4096 = vmatprep.subr.bf16.mxu0 %v6368_v59  ;;  %v3959_v25 = vpack.c.bf16 %v410_v11, %v406_v19  ;;  %v414_v37 = vld [vmem:[%s7281_s2 + $0x8d8] sm:$0xff]  ;;  %v5105_v11 = vld [vmem:[%s7279_s0 + $0xa0] sm:$0xff]  ;;  %v433_v33 = vld [vmem:[%s7281_s2 + $0x970] sm:$0xff] }
 0x100   :  { %v5102_v43 = vld [vmem:[%s7279_s0 + $0x78] sm:$0xff] }
 0x101   :  { %3938 = vmatpush1.bf16.msra.mxu1 %v3937_v63  ;;  %v3955_v63 = vpack.c.bf16 %v402_v9, %v398_v57  ;;  %v426_v16 = vld [vmem:[%s7281_s2 + $0x938] sm:$0xff]  ;;  %v5104_v9 = vld [vmem:[%s7279_s0 + $0xa8] sm:$0xff] }
 0x102   :  { %3940 = vmatprep.subr.bf16.mxu1 %v3939_v0  ;;  %4098 = vmatpush1.bf16.msra.mxu0 %v6385_v13  ;;  %v397_v0 = vld [vmem:[%s7281_s2 + $0x850] sm:$0xff]  ;;  %v434_v19 = vld [vmem:[%s7281_s2 + $0x978] sm:$0xff] }
 0x103   :  { %4100 = vmatprep.subr.bf16.mxu0 %v6399_v22  ;;  %v438_v21 = vld [vmem:[%s7281_s2 + $0x998] sm:$0xff] }
 0x105   :  { %3942 = vmatpush1.bf16.msra.mxu1 %v3941_v1  ;;  %v3957_v1 = vpack.c.bf16 %v401_v4, %v397_v0  ;;  %v425_v0 = vld [vmem:[%s7281_s2 + $0x930] sm:$0xff]  ;;  %v430_v4 = vld [vmem:[%s7281_s2 + $0x958] sm:$0xff] }
 0x106   :  { %3944 = vmatprep.subr.bf16.mxu1 %v3943_v20  ;;  %4102 = vmatpush1.bf16.msra.mxu0 %v6416_v41  ;;  %v5100_v20 = vld [vmem:[%s7279_s0 + $0x48] sm:$0xff] }
 0x107   :  { %4104 = vmatprep.subr.bf16.mxu0 %v6430_v35 }
 0x109   :  { %3946 = vmatpush1.bf16.msra.mxu1 %v3945_v29  ;;  %v418_v29 = vld [vmem:[%s7281_s2 + $0x8f8] sm:$0xff] }
 0x10a   :  { %3948 = vmatprep.subr.bf16.mxu1 %v3947_v30  ;;  %4106 = vmatpush1.bf16.msra.mxu0 %v6447_v8  ;;  %v5101_v30 = vld [vmem:[%s7279_s0 + $0x40] sm:$0xff]  ;;  %v3963_v39 = vpack.c.bf16 %v418_v29, %v414_v37  ;;  %v442_v37 = vld [vmem:[%s7281_s2 + $0x9b8] sm:$0xff]  ;;  %v5107_v29 = vld [vmem:[%s7279_s0 + $0xd0] sm:$0xff] }
 0x10b   :  { %4108 = vmatprep.subr.bf16.mxu0 %v6461_v23 }
 0x10d   :  { %3950 = vmatpush1.bf16.msra.mxu1 %v3949_v3  ;;  %v417_v3 = vld [vmem:[%s7281_s2 + $0x8f0] sm:$0xff] }
 0x10e   :  { %3952 = vmatprep.subr.bf16.mxu1 %v3951_v47  ;;  %4110 = vmatpush1.bf16.msra.mxu0 %v6478_v51  ;;  %v422_v47 = vld [vmem:[%s7281_s2 + $0x918] sm:$0xff]  ;;  %v3965_v57 = vpack.c.bf16 %v417_v3, %v413_v55 }
 0x10f   :  { %4144 = vmatprep.subr.bf16.mxu0 %v6248_v34  ;;  %v446_v55 = vld [vmem:[%s7281_s2 + $0x9d8] sm:$0xff] }
 0x110   :  { %1054 = vmatmul.mubr.f32.vlgmr.msra.gmra.mrb[16].mxu1 %v5099_v49  ;;  %v450_v3 = vld [vmem:[%s7281_s2 + $0x9f8] sm:$0xff] }
 0x111   :  { %3954 = vmatpush1.bf16.msra.mxu1 %v3953_v60  ;;  %1059 = vmatprep.mubr.f32.mxu1 %v5100_v20  ;;  %v3967_v60 = vpack.c.bf16 %v426_v16, %v422_v47  ;;  %v3971_v20 = vpack.c.bf16 %v434_v19, %v430_v4  ;;  %v3979_v47 = vpack.c.bf16 %v450_v3, %v446_v55  ;;  %v445_v16 = vld [vmem:[%s7281_s2 + $0x9d0] sm:$0xff] }
 0x112   :  { %3956 = vmatprep.subr.bf16.mxu1 %v3955_v63  ;;  %v421_v63 = vld [vmem:[%s7281_s2 + $0x910] sm:$0xff] }
 0x113   :  { %v3969_v49 = vpack.c.bf16 %v425_v0, %v421_v63  ;;  %v457_v63 = vld [vmem:[%s7281_s2 + $0xa30] sm:$0xff]  ;;  %v462_v0 = vld [vmem:[%s7281_s2 + $0xa58] sm:$0xff] }
 0x114   :  { %1060 = vmatmul.mubr.f32.gmra.mrb[18].mxu1 %v5101_v30  ;;  %v461_v19 = vld [vmem:[%s7281_s2 + $0xa50] sm:$0xff] }
 0x115   :  { %3958 = vmatpush1.bf16.msra.mxu1 %v3957_v1  ;;  %1065 = vmatprep.mubr.f32.mxu1 %v5102_v43  ;;  %v5106_v1 = vld [vmem:[%s7279_s0 + $0xd8] sm:$0xff]  ;;  %v437_v43 = vld [vmem:[%s7281_s2 + $0x990] sm:$0xff] }
 0x116   :  { %3960 = vmatprep.subr.bf16.mxu1 %v3959_v25  ;;  %v429_v25 = vld [vmem:[%s7281_s2 + $0x950] sm:$0xff] }
 0x117   :  { %v3973_v30 = vpack.c.bf16 %v433_v33, %v429_v25  ;;  %v473_v25 = vld [vmem:[%s7281_s2 + $0xab0] sm:$0xff]  ;;  %v478_v33 = vld [vmem:[%s7281_s2 + $0xad8] sm:$0xff] }
 0x118   :  { %1066 = vmatmul.mubr.f32.gmra.mrb[20].mxu1 %v5103_v58  ;;  %v449_v58 = vld [vmem:[%s7281_s2 + $0x9f0] sm:$0xff] }
 0x119   :  { %3962 = vmatpush1.bf16.msra.mxu1 %v3961_v32  ;;  %1071 = vmatprep.mubr.f32.mxu1 %v5104_v9  ;;  %v3975_v32 = vpack.c.bf16 %v442_v37, %v438_v21  ;;  %v482_v21 = vld [vmem:[%s7281_s2 + $0xaf8] sm:$0xff] }
 0x11a   :  { %3964 = vmatprep.subr.bf16.mxu1 %v3963_v39  ;;  %v441_v39 = vld [vmem:[%s7281_s2 + $0x9b0] sm:$0xff] }
 0x11c   :  { %1072 = vmatmul.mubr.f32.gmra.mrb[22].mxu1 %v5105_v11  ;;  %v465_v11 = vld [vmem:[%s7281_s2 + $0xa70] sm:$0xff] }
 0x11d   :  { %3966 = vmatpush1.bf16.msra.mxu1 %v3965_v57  ;;  %1077 = vmatprep.mubr.f32.mxu1 %v5106_v1  ;;  %v454_v57 = vld [vmem:[%s7281_s2 + $0xa18] sm:$0xff] }
 0x11e   :  { %3968 = vmatprep.subr.bf16.mxu1 %v3967_v60  ;;  %v453_v60 = vld [vmem:[%s7281_s2 + $0xa10] sm:$0xff] }
 0x120   :  { %1078 = vmatmul.mubr.f32.gmra.mrb[24].mxu1 %v5107_v29  ;;  %v3995_v29 = vpack.c.bf16 %v482_v21, %v478_v33 }
 0x121   :  { %3970 = vmatpush1.bf16.msra.mxu1 %v3969_v49  ;;  %1083 = vmatprep.mubr.f32.mxu1 %v5940_v38  ;;  %v3977_v38 = vpack.c.bf16 %v441_v39, %v437_v43  ;;  %v470_v49 = vld [vmem:[%s7281_s2 + $0xa98] sm:$0xff] }
 0x122   :  { %3972 = vmatprep.subr.bf16.mxu1 %v3971_v20  ;;  %v469_v20 = vld [vmem:[%s7281_s2 + $0xa90] sm:$0xff]  ;;  %v486_v43 = vld [vmem:[%s7281_s2 + $0xb18] sm:$0xff] }
 0x123   :  { %v3993_v37 = vpack.c.bf16 %v473_v25, %v469_v20  ;;  %v490_v39 = vld [vmem:[%s7281_s2 + $0xb38] sm:$0xff] }
 0x124   :  { %1084 = vmatmul.mubr.f32.gmra.mrb[26].mxu1 %v5956_v44  ;;  %v458_v44 = vld [vmem:[%s7281_s2 + $0xa38] sm:$0xff]  ;;  %v3999_v3 = vpack.c.bf16 %v490_v39, %v486_v43 }
 0x125   :  { %3974 = vmatpush1.bf16.msra.mxu1 %v3973_v30  ;;  %1089 = vmatprep.mubr.f32.mxu1 %v5988_v56  ;;  %v3981_v56 = vpack.c.bf16 %v449_v58, %v445_v16  ;;  %v3983_v9 = vpack.c.bf16 %v458_v44, %v454_v57  ;;  %v477_v30 = vld [vmem:[%s7281_s2 + $0xad0] sm:$0xff]  ;;  %v494_v16 = vld [vmem:[%s7281_s2 + $0xb58] sm:$0xff] }
 0x126   :  { %3976 = vmatprep.subr.bf16.mxu1 %v3975_v32  ;;  %v481_v32 = vld [vmem:[%s7281_s2 + $0xaf0] sm:$0xff]  ;;  %v498_v58 = vld [vmem:[%s7281_s2 + $0xb78] sm:$0xff] }
 0x127   :  { %v3997_v55 = vpack.c.bf16 %v481_v32, %v477_v30  ;;  %v4003_v44 = vpack.c.bf16 %v498_v58, %v494_v16  ;;  %v1259_v20 = vld [vmem:[#allocation7 + $0x18] sm:$0xff] }
 0x128   :  { %1090 = vmatmul.mubr.f32.gmra.mrb[28].mxu1 %v6004_v62  ;;  %v466_v62 = vld [vmem:[%s7281_s2 + $0xa78] sm:$0xff] }
 0x129   :  { %3978 = vmatpush1.bf16.msra.mxu1 %v3977_v38  ;;  %1095 = vmatprep.mubr.f32.mxu1 %v6036_v10  ;;  %v3985_v10 = vpack.c.bf16 %v457_v63, %v453_v60  ;;  %v3987_v4 = vpack.c.bf16 %v466_v62, %v462_v0  ;;  %v485_v38 = vld [vmem:[%s7281_s2 + $0xb10] sm:$0xff]  ;;  %v502_v60 = vld [vmem:[%s7281_s2 + $0xb98] sm:$0xff] }
 0x12a   :  { %3980 = vmatprep.subr.bf16.mxu1 %v3979_v47  ;;  %v489_v47 = vld [vmem:[%s7281_s2 + $0xb30] sm:$0xff]  ;;  %v506_v63 = vld [vmem:[%s7281_s2 + $0xbb8] sm:$0xff] }
 0x12b   :  { %v4001_v57 = vpack.c.bf16 %v489_v47, %v485_v38  ;;  %v4007_v62 = vpack.c.bf16 %v506_v63, %v502_v60  ;;  %v1263_v25 = vld [vmem:[#allocation7 + $0x38] sm:$0xff]  ;;  %v1282_v60 = vld [vmem:[#allocation7 + $0xd0] sm:$0xff] }
 0x12c   :  { %1096 = vmatmul.mubr.f32.gmra.mrb[30].mxu1 %v6052_v18  ;;  %v474_v18 = vld [vmem:[%s7281_s2 + $0xab8] sm:$0xff]  ;;  %v6830_v21 = vpack.c.bf16 %v1263_v25, %v1259_v20 }
 0x12d   :  { %3982 = vmatpush1.bf16.msra.mxu1 %v3981_v56  ;;  %1166 = vmatprep.mubr.f32.mxu1 %v6076_v28  ;;  %v3989_v28 = vpack.c.bf16 %v465_v11, %v461_v19  ;;  %v3991_v1 = vpack.c.bf16 %v474_v18, %v470_v49  ;;  %v493_v56 = vld [vmem:[%s7281_s2 + $0xb50] sm:$0xff]  ;;  %v510_v19 = vld [vmem:[%s7281_s2 + $0xbd8] sm:$0xff] }
 0x12e   :  { %3984 = vmatprep.subr.bf16.mxu1 %v3983_v9  ;;  %v497_v9 = vld [vmem:[%s7281_s2 + $0xb70] sm:$0xff]  ;;  %v514_v11 = vld [vmem:[%s7281_s2 + $0xbf8] sm:$0xff] }
 0x12f   :  { %v4005_v0 = vpack.c.bf16 %v497_v9, %v493_v56  ;;  %v4011_v18 = vpack.c.bf16 %v514_v11, %v510_v19  ;;  %v1267_v30 = vld [vmem:[#allocation7 + $0x58] sm:$0xff]  ;;  %v1286_v63 = vld [vmem:[#allocation7 + $0xf0] sm:$0xff]  ;;  %v517_v19 = vlaneseq }
 0x130   :  { %v1271_v32 = vld [vmem:[#allocation7 + $0x78] sm:$0xff] }
 0x131   :  { %3986 = vmatpush1.bf16.msra.mxu1 %v3985_v10  ;;  %v501_v10 = vld [vmem:[%s7281_s2 + $0xb90] sm:$0xff]  ;;  %v6835_v39 = vpack.c.bf16 %v1271_v32, %v1267_v30  ;;  %v1275_v38 = vld [vmem:[#allocation7 + $0x98] sm:$0xff] }
 0x132   :  { %3988 = vmatprep.subr.bf16.mxu1 %v3987_v4  ;;  %v505_v4 = vld [vmem:[%s7281_s2 + $0xbb0] sm:$0xff]  ;;  %v1279_v47 = vld [vmem:[#allocation7 + $0xb8] sm:$0xff] }
 0x133   :  { %v4009_v49 = vpack.c.bf16 %v505_v4, %v501_v10  ;;  %v6843_v58 = vpack.c.bf16 %v1279_v47, %v1275_v38  ;;  %v1283_v56 = vld [vmem:[#allocation7 + $0xd8] sm:$0xff]  ;;  %v1290_v10 = vld [vmem:[#allocation7 + $0x110] sm:$0xff] }
 0x134   :  { %v1287_v9 = vld [vmem:[#allocation7 + $0xf8] sm:$0xff]  ;;  %v1294_v4 = vld [vmem:[#allocation7 + $0x130] sm:$0xff] }
 0x135   :  { %3990 = vmatpush1.bf16.msra.mxu1 %v3989_v28  ;;  %v509_v28 = vld [vmem:[%s7281_s2 + $0xbd0] sm:$0xff]  ;;  %v1299_v11 = vld [vmem:[#allocation7 + $0x158] sm:$0xff] }
 0x136   :  { %3992 = vmatprep.subr.bf16.mxu1 %v3991_v1  ;;  %v513_v1 = vld [vmem:[%s7281_s2 + $0xbf0] sm:$0xff]  ;;  %v1307_v20 = vld [vmem:[#allocation7 + $0x198] sm:$0xff] }
 0x137   :  { %v4013_v33 = vpack.c.bf16 %v513_v1, %v509_v28  ;;  %v1298_v28 = vld [vmem:[#allocation7 + $0x150] sm:$0xff]  ;;  %v1311_v25 = vld [vmem:[#allocation7 + $0x1b8] sm:$0xff] }
 0x138   :  { %v1302_v1 = vld [vmem:[#allocation7 + $0x170] sm:$0xff]  ;;  %v6880_v30 = vld [vmem:[#allocation5] sm:$0xf] }
 0x139   :  { %3994 = vmatpush1.bf16.msra.mxu1 %v3993_v37  ;;  %v1258_v37 = vld [vmem:[#allocation7 + $0x10] sm:$0xff] }
 0x13a   :  { %3996 = vmatprep.subr.bf16.mxu1 %v3995_v29  ;;  %v1262_v29 = vld [vmem:[#allocation7 + $0x30] sm:$0xff] }
 0x13b   :  { %v6832_v43 = vpack.c.bf16 %v1262_v29, %v1258_v37  ;;  %v1306_v37 = vld [vmem:[#allocation7 + $0x190] sm:$0xff] }
 0x13c   :  { %v1310_v29 = vld [vmem:[#allocation7 + $0x1b0] sm:$0xff] }
 0x13d   :  { %3998 = vmatpush1.bf16.msra.mxu1 %v3997_v55  ;;  %v1266_v55 = vld [vmem:[#allocation7 + $0x50] sm:$0xff] }
 0x13e   :  { %4000 = vmatprep.subr.bf16.mxu1 %v3999_v3  ;;  %v1270_v3 = vld [vmem:[#allocation7 + $0x70] sm:$0xff] }
 0x13f   :  { %v6840_v16 = vpack.c.bf16 %v1270_v3, %v1266_v55  ;;  %v1315_v55 = vld [vmem:[#allocation7 + $0x1d8] sm:$0xff] }
 0x140   :  { %v1319_v3 = vld [vmem:[#allocation7 + $0x1f8] sm:$0xff] }
 0x141   :  { %4002 = vmatpush1.bf16.msra.mxu1 %v4001_v57  ;;  %v1274_v57 = vld [vmem:[#allocation7 + $0x90] sm:$0xff] }
 0x142   :  { %4004 = vmatprep.subr.bf16.mxu1 %v4003_v44  ;;  %v1278_v44 = vld [vmem:[#allocation7 + $0xb0] sm:$0xff] }
 0x145   :  { %4006 = vmatpush1.bf16.msra.mxu1 %v4005_v0  ;;  %v1291_v0 = vld [vmem:[#allocation7 + $0x118] sm:$0xff] }
 0x146   :  { %4008 = vmatprep.subr.bf16.mxu1 %v4007_v62  ;;  %v1295_v62 = vld [vmem:[#allocation7 + $0x138] sm:$0xff] }
 0x149   :  { %4010 = vmatpush1.bf16.msra.mxu1 %v4009_v49  ;;  %v1303_v49 = vld [vmem:[#allocation7 + $0x178] sm:$0xff] }
 0x14a   :  { %4012 = vmatprep.subr.bf16.mxu1 %v4011_v18  ;;  %v6869_v18 = vpack.c.bf16 %v1303_v49, %v1299_v11 }
 0x14d   :  { %4014 = vmatpush1.bf16.msra.mxu1 %v4013_v33  ;;  %v6878_v33 = vpack.c.bf16 %v1311_v25, %v1307_v20 }
 0x14e   :  { %4048 = vmatprep.subr.bf16.mxu1 %v6830_v21 }
 0x150   :  { %1167 = vmatmul.mubr.f32.vlgmr.msra.gmra.mrb[16].mxu1 %v6259_v46  ;;  %v6848_v46 = vpack.c.bf16 %v1278_v44, %v1274_v57  ;;  %v6896_v57 = vpack.c.bf16 %v1319_v3, %v1315_v55  ;;  %v1314_v44 = vld [vmem:[#allocation7 + $0x1d0] sm:$0xff] }
 0x151   :  { %4050 = vmatpush1.bf16.msra.mxu1 %v6832_v43  ;;  %1172 = vmatprep.mubr.f32.mxu1 %v6266_v50  ;;  %v6851_v50 = vpack.c.bf16 %v1287_v9, %v1283_v56  ;;  %v1318_v56 = vld [vmem:[#allocation7 + $0x1f0] sm:$0xff] }
 0x152   :  { %4052 = vmatprep.subr.bf16.mxu1 %v6835_v39 }
 0x154   :  { %1173 = vmatmul.mubr.f32.gmra.mrb[18].mxu1 %v6288_v2  ;;  %v6856_v2 = vpack.c.bf16 %v1286_v63, %v1282_v60  ;;  %v6906_v63 = vpack.c.bf16 %v1318_v56, %v1314_v44 }
 0x155   :  { %4054 = vmatpush1.bf16.msra.mxu1 %v6840_v16  ;;  %1178 = vmatprep.mubr.f32.mxu1 %v6297_v5  ;;  %v6859_v5 = vpack.c.bf16 %v1295_v62, %v1291_v0 }
 0x156   :  { %4056 = vmatprep.subr.bf16.mxu1 %v6843_v58 }
 0x158   :  { %1179 = vmatmul.mubr.f32.gmra.mrb[20].mxu1 %v6319_v24  ;;  %v6864_v24 = vpack.c.bf16 %v1294_v4, %v1290_v10 }
 0x159   :  { %4058 = vmatpush1.bf16.msra.mxu1 %v6848_v46  ;;  %1184 = vmatprep.mubr.f32.mxu1 %v6328_v27  ;;  %v6867_v27 = vshrl.u32 %v517_v19, 7 }
 0x15a   :  { %4060 = vmatprep.subr.bf16.mxu1 %v6851_v50 }
 0x15b   :  { %7294 = vst [vmem:[#allocation15_spill] sm:$0xff] %v6867_v27 }
 0x15c   :  { %1185 = vmatmul.mubr.f32.gmra.mrb[22].mxu1 %v6350_v45  ;;  %v6874_v45 = vpack.c.bf16 %v1302_v1, %v1298_v28 }
 0x15d   :  { %4062 = vmatpush1.bf16.msra.mxu1 %v6856_v2  ;;  %1190 = vmatprep.mubr.f32.mxu1 %v6359_v53  ;;  %v7288_v53 = vsub.s32 0, %v6867_v27 }
 0x15e   :  { %4064 = vmatprep.subr.bf16.mxu1 %v6859_v5 }
 0x15f   :  { %v520_v47 = vrot.slane %v6880_v30, %v7288_v53 }
 0x160   :  { %1191 = vmatmul.mubr.f32.gmra.mrb[24].mxu1 %v6381_v7  ;;  %v7287_v7 = vsub.s32 1, %v6867_v27 }
 0x161   :  { %4066 = vmatpush1.bf16.msra.mxu1 %v6864_v24  ;;  %1196 = vmatprep.mubr.f32.mxu1 %v6390_v14  ;;  %v6890_v14 = vpack.c.bf16 %v1310_v29, %v1306_v37 }
 0x162   :  { %4068 = vmatprep.subr.bf16.mxu1 %v6869_v18  ;;  %v6882_v32 = vpop.f32.mrb[0].mxu1 }
 0x163   :  { %v6885_v38 = vpop.f32.mrb[1].mxu1 }
 0x164   :  { %1197 = vmatmul.mubr.f32.gmra.mrb[26].mxu1 %v6412_v36  ;;  %v524_v36 = vrot.slane %v6880_v30, %v7287_v7  ;;  %v531_v7 = vsub.s32 3, %v6867_v27 }
 0x165   :  { %4070 = vmatpush1.bf16.msra.mxu1 %v6874_v45  ;;  %1202 = vmatprep.mubr.f32.mxu1 %v6421_v42 }
 0x166   :  { %4072 = vmatprep.subr.bf16.mxu1 %v6878_v33  ;;  %v609_v9 = vpop.f32.mrb[2].mxu1 }
 0x167   :  { %v6902_v42 = vadd.f32 %v609_v9, %v520_v47  ;;  %v611_v60 = vpop.f32.mrb[3].mxu1 }
 0x168   :  { %1203 = vmatmul.mubr.f32.gmra.mrb[28].mxu1 %v6445_v6  ;;  %v6908_v0 = vadd.f32 %v611_v60, %v524_v36 }
 0x169   :  { %4074 = vmatpush1.bf16.msra.mxu1 %v6890_v14  ;;  %1208 = vmatprep.mubr.f32.mxu1 %v6459_v15 }
 0x16a   :  { %4076 = vmatprep.subr.bf16.mxu1 %v6896_v57 }
 0x16b   :  { %v615_v62 = vpop.f32.mrb[4].mxu1 }
 0x16c   :  { %1209 = vmatmul.mubr.f32.gmra.mrb[30].mxu1 %v6476_v40  ;;  %v6912_v10 = vadd.f32 %v615_v62, %v520_v47  ;;  %v617_v4 = vpop.f32.mrb[5].mxu1 }
 0x16d   :  { %4078 = vmatpush1.bf16.msra.mxu1 %v6906_v63  ;;  %1455 = vmatprep.mubr.f32.mxu1 %v7289_v61  ;;  %v6916_v6 = vadd.f32 %v617_v4, %v524_v36 }
 0x16e   :  { %4112 = vmatprep.subr.bf16.mxu1 %v6830_v21 }
 0x16f   :  { %v621_v15 = vpop.f32.mrb[6].mxu1 }
 0x170   :  { %1456 = vmatmul.mubr.f32.vlgmr.msra.gmra.mrb[16].mxu1 %v7289_v61  ;;  %v6920_v19 = vadd.f32 %v621_v15, %v520_v47  ;;  %v623_v11 = vpop.f32.mrb[7].mxu1 }
 0x171   :  { %v6922_v49 = vadd.f32 %v623_v11, %v524_v36  ;;  %4114 = vmatpush1.bf16.msra.mxu1 %v6832_v43  ;;  %1632 = vmatprep.mubr.f32.mxu1 %v7289_v61  ;;  %v604_v11 = vadd.f32 %v6882_v32, %v520_v47 }
 0x172   :  { %4116 = vmatprep.subr.bf16.mxu1 %v6835_v39 }
 0x173   :  { %v627_v40 = vpop.f32.mrb[8].mxu1 }
 0x174   :  { %v6927_v28 = vadd.f32 %v627_v40, %v520_v47  ;;  %v629_v1 = vpop.f32.mrb[9].mxu1  ;;  %v606_v40 = vadd.f32 %v6885_v38, %v524_v36 }
 0x175   :  { %v6929_v20 = vadd.f32 %v629_v1, %v524_v36  ;;  %4118 = vmatpush1.bf16.msra.mxu1 %v6840_v16 }
 0x176   :  { %4120 = vmatprep.subr.bf16.mxu1 %v6843_v58 }
 0x177   :  { %v633_v25 = vpop.f32.mrb[10].mxu1 }
 0x178   :  { %v6933_v37 = vadd.f32 %v633_v25, %v520_v47  ;;  %v635_v29 = vpop.f32.mrb[11].mxu1 }
 0x179   :  { %v6935_v55 = vadd.f32 %v635_v29, %v524_v36  ;;  %4122 = vmatpush1.bf16.msra.mxu1 %v6848_v46 }
 0x17a   :  { %4124 = vmatprep.subr.bf16.mxu1 %v6851_v50 }
 0x17b   :  { %v639_v3 = vpop.f32.mrb[12].mxu1 }
 0x17c   :  { %v6939_v44 = vadd.f32 %v639_v3, %v520_v47  ;;  %v641_v56 = vpop.f32.mrb[13].mxu1 }
 0x17d   :  { %v6941_v9 = vadd.f32 %v641_v56, %v524_v36  ;;  %4126 = vmatpush1.bf16.msra.mxu1 %v6856_v2 }
 0x17e   :  { %4128 = vmatprep.subr.bf16.mxu1 %v6859_v5 }
 0x17f   :  { %v645_v60 = vpop.f32.mrb[14].mxu1 }
 0x180   :  { %v6945_v62 = vadd.f32 %v645_v60, %v520_v47  ;;  %v647_v4 = vpop.f32.mrb[15].mxu1  ;;  %v6967_v47 = vrot.slane %v6880_v30, %v531_v7 }
 0x181   :  { %v6947_v15 = vadd.f32 %v647_v4, %v524_v36  ;;  %4130 = vmatpush1.bf16.msra.mxu1 %v6864_v24  ;;  %v7291_v4 = vsub.s32 2, %v6867_v27 }
 0x182   :  { %4132 = vmatprep.subr.bf16.mxu1 %v6869_v18 }
 0x183   :  { %7295 = vst [vmem:[#allocation16_spill] sm:$0xff] %v6947_v15  ;;  %v6964_v32 = vrot.slane %v6880_v30, %v7291_v4 }
 0x185   :  { %4134 = vmatpush1.bf16.msra.mxu1 %v6874_v45 }
 0x186   :  { %4136 = vmatprep.subr.bf16.mxu1 %v6878_v33 }
 0x189   :  { %4138 = vmatpush1.bf16.msra.mxu1 %v6890_v14 }
 0x18a   :  { %4140 = vmatprep.subr.bf16.mxu1 %v6896_v57 }
 0x18d   :  { %4142 = vmatpush1.bf16.msra.mxu1 %v6906_v63 }
 0x18e   :  { %4176 = vmatprep.subr.bf16.mxu1 %v6830_v21 }
 0x1c4   :  { %v1386_v1 = vpop.f32.mrb[0].mxu0 }
 0x1c5   :  { %v4816_v25 = vadd.f32 %v1386_v1, %v604_v11  ;;  %v1388_v29 = vpop.f32.mrb[1].mxu0 }
 0x1c6   :  { %v4818_v3 = vadd.f32 %v1388_v29, %v606_v40 }
 0x1c7   :  { %v3500_v60 = vmul.f32 -1.442695, %v4816_v25 }
 0x1c8   :  { %v3501_v56 = vmul.f32 -1.442695, %v4818_v3 }
 0x1ca   :  { %4958 = vpow2.f32 %v3501_v56 }
 0x1cb   :  { %4960 = vpow2.f32 %v3500_v60 }
 0x1d4   :  { %v4959_v53 = vpop.eup %4958 }
 0x1d5   :  { %v4961_v61 = vpop.eup %4960  ;;  %v1476_v38 = vadd.f32 1.0, %v4959_v53 }
 0x1d6   :  { %v1475_v36 = vadd.f32 1.0, %v4961_v61 }
 0x1d7   :  { %4962 = vrcp.f32 %v1476_v38 }
 0x1d8   :  { %4964 = vrcp.f32 %v1475_v36  ;;  %v7296_v36 = vmov 0.0  }
 0x1e1   :  { %v4963_v3 = vpop.eup %4962 }
 0x1e2   :  { %v4965_v56 = vpop.eup %4964  ;;  %v1485_v53 = vmul.f32 0.0, %v4963_v3 }
 0x243   :  { %v1457_v11 = vpop.f32.mrb[16].mxu1 }
 0x244   :  { %v4847_v40 = vadd.f32 %v1457_v11, %v6964_v32  ;;  %v1459_v1 = vpop.f32.mrb[17].mxu1 }
 0x245   :  { %v4848_v25 = vadd.f32 %v1459_v1, %v6967_v47 }
 0x246   :  { %v3502_v29 = vmul.f32 -1.442695, %v4847_v40 }
 0x247   :  { %4966 = vtanh.f32 %v4848_v25 }
 0x248   :  { %4968 = vpow2.f32 %v3502_v29 }
 0x251   :  { %v4967_v60 = vpop.eup %4966 }
 0x252   :  { %v4969_v4 = vpop.eup %4968  ;;  %v1486_v27 = vmul.f32 %v4967_v60, %v4965_v56 }
 0x253   :  { %v1477_v30 = vadd.f32 1.0, %v4969_v4 }
 0x254   :  { %v6971_v7 = vadd.f32 %v1486_v27, %v1485_v53 }
 0x255   :  { %4970 = vrcp.f32 %v1477_v30 }
 0x256   :  { %4972 = vtanh.f32 %v6971_v7 }
 0x25f   :  { %v4971_v61 = vpop.eup %4970 }
 0x260   :  { %v4973_v38 = vpop.eup %4972 }
 0x261   :  { %v1489_v11 = vmul.f32 %v4973_v38, %v4971_v61 }
 0x263   :  { %1562 = vmatmul.mubr.f32.vlgmr.msra.gmra.mrb[2].mxu0 %v1489_v11  ;;  %1633 = vmatmul.mubr.f32.vlgmr.msra.gmra.mrb[18].mxu1 %v1489_v11 }
 0x264   :  { %4146 = vmatpush1.bf16.msra.mxu0 %v6261_v48  ;;  %4178 = vmatpush1.bf16.msra.mxu1 %v6832_v43 }
 0x265   :  { %4148 = vmatprep.subr.bf16.mxu0 %v6275_v54  ;;  %4180 = vmatprep.subr.bf16.mxu1 %v6835_v39 }
 0x266   :  { %1738 = vmatprep.mubr.f32.mxu0 %v7296_v36  ;;  %1809 = vmatprep.mubr.f32.mxu1 %v7296_v36 }
 0x268   :  { %4150 = vmatpush1.bf16.msra.mxu0 %v6292_v17  ;;  %4182 = vmatpush1.bf16.msra.mxu1 %v6840_v16 }
 0x269   :  { %4152 = vmatprep.subr.bf16.mxu0 %v6306_v12  ;;  %4184 = vmatprep.subr.bf16.mxu1 %v6843_v58 }
 0x26c   :  { %4154 = vmatpush1.bf16.msra.mxu0 %v6323_v26  ;;  %4186 = vmatpush1.bf16.msra.mxu1 %v6848_v46 }
 0x26d   :  { %4156 = vmatprep.subr.bf16.mxu0 %v6337_v31  ;;  %4188 = vmatprep.subr.bf16.mxu1 %v6851_v50 }
 0x270   :  { %4158 = vmatpush1.bf16.msra.mxu0 %v6354_v52  ;;  %4190 = vmatpush1.bf16.msra.mxu1 %v6856_v2 }
 0x271   :  { %4160 = vmatprep.subr.bf16.mxu0 %v6368_v59  ;;  %4192 = vmatprep.subr.bf16.mxu1 %v6859_v5 }
 0x274   :  { %4162 = vmatpush1.bf16.msra.mxu0 %v6385_v13  ;;  %4194 = vmatpush1.bf16.msra.mxu1 %v6864_v24 }
 0x275   :  { %4164 = vmatprep.subr.bf16.mxu0 %v6399_v22  ;;  %4196 = vmatprep.subr.bf16.mxu1 %v6869_v18 }
 0x278   :  { %4166 = vmatpush1.bf16.msra.mxu0 %v6416_v41  ;;  %4198 = vmatpush1.bf16.msra.mxu1 %v6874_v45 }
 0x279   :  { %4168 = vmatprep.subr.bf16.mxu0 %v6430_v35  ;;  %4200 = vmatprep.subr.bf16.mxu1 %v6878_v33 }
 0x27c   :  { %4170 = vmatpush1.bf16.msra.mxu0 %v6447_v8  ;;  %4202 = vmatpush1.bf16.msra.mxu1 %v6890_v14 }
 0x27d   :  { %4172 = vmatprep.subr.bf16.mxu0 %v6461_v23  ;;  %4204 = vmatprep.subr.bf16.mxu1 %v6896_v57 }
 0x280   :  { %4174 = vmatpush1.bf16.msra.mxu0 %v6478_v51  ;;  %4206 = vmatpush1.bf16.msra.mxu1 %v6906_v63 }
 0x281   :  { %4208 = vmatprep.subr.bf16.mxu0 %v6248_v34  ;;  %4240 = vmatprep.subr.bf16.mxu1 %v6830_v21 }
 0x336   :  { %v1563_v27 = vpop.f32.mrb[2].mxu0  ;;  %v1634_v4 = vpop.f32.mrb[18].mxu1 }
 0x337   :  { %v4820_v40 = vadd.f32 %v1563_v27, %v6902_v42  ;;  %v1565_v1 = vpop.f32.mrb[3].mxu0  ;;  %v1636_v25 = vpop.f32.mrb[19].mxu1  ;;  %v4849_v60 = vadd.f32 %v1634_v4, %v6964_v32 }
 0x338   :  { %v4822_v29 = vadd.f32 %v1565_v1, %v6908_v0  ;;  %v4850_v53 = vadd.f32 %v1636_v25, %v6967_v47 }
 0x339   :  { %v3503_v3 = vmul.f32 -1.442695, %v4820_v40  ;;  %v3505_v30 = vmul.f32 -1.442695, %v4849_v60 }
 0x33a   :  { %v3504_v56 = vmul.f32 -1.442695, %v4822_v29 }
 0x33b   :  { %4974 = vpow2.f32 %v3503_v3 }
 0x33c   :  { %4976 = vpow2.f32 %v3504_v56 }
 0x33d   :  { %4978 = vtanh.f32 %v4850_v53 }
 0x33e   :  { %4980 = vpow2.f32 %v3505_v30 }
 0x345   :  { %v4975_v61 = vpop.eup %4974 }
 0x346   :  { %v1652_v38 = vadd.f32 1.0, %v4975_v61  ;;  %v4977_v11 = vpop.eup %4976 }
 0x347   :  { %v1653_v42 = vadd.f32 1.0, %v4977_v11  ;;  %v4979_v27 = vpop.eup %4978 }
 0x348   :  { %4982 = vrcp.f32 %v1652_v38  ;;  %v4981_v15 = vpop.eup %4980 }
 0x349   :  { %4984 = vrcp.f32 %v1653_v42  ;;  %v1654_v29 = vadd.f32 1.0, %v4981_v15 }
 0x34b   :  { %4986 = vrcp.f32 %v1654_v29 }
 0x352   :  { %v4983_v0 = vpop.eup %4982 }
 0x353   :  { %v1663_v40 = vmul.f32 %v4983_v0, %v4979_v27  ;;  %v4985_v1 = vpop.eup %4984 }
 0x354   :  { %v1662_v3 = vmul.f32 %v4985_v1, %v6971_v7 }
 0x355   :  { %v4987_v25 = vpop.eup %4986 }
 0x356   :  { %v7013_v4 = vadd.f32 %v1663_v40, %v1662_v3 }
 0x358   :  { %4988 = vtanh.f32 %v7013_v4 }
 0x362   :  { %v4989_v56 = vpop.eup %4988 }
 0x363   :  { %v1666_v60 = vmul.f32 %v4989_v56, %v4987_v25 }
 0x365   :  { %1739 = vmatmul.mubr.f32.vlgmr.msra.gmra.mrb[4].mxu0 %v1666_v60  ;;  %1810 = vmatmul.mubr.f32.vlgmr.msra.gmra.mrb[20].mxu1 %v1666_v60 }
 0x366   :  { %4210 = vmatpush1.bf16.msra.mxu0 %v6261_v48  ;;  %4242 = vmatpush1.bf16.msra.mxu1 %v6832_v43 }
 0x367   :  { %4212 = vmatprep.subr.bf16.mxu0 %v6275_v54  ;;  %4244 = vmatprep.subr.bf16.mxu1 %v6835_v39 }
 0x368   :  { %1915 = vmatprep.mubr.f32.mxu0 %v7296_v36  ;;  %1986 = vmatprep.mubr.f32.mxu1 %v7296_v36 }
 0x36a   :  { %4214 = vmatpush1.bf16.msra.mxu0 %v6292_v17  ;;  %4246 = vmatpush1.bf16.msra.mxu1 %v6840_v16 }
 0x36b   :  { %4216 = vmatprep.subr.bf16.mxu0 %v6306_v12  ;;  %4248 = vmatprep.subr.bf16.mxu1 %v6843_v58 }
 0x36e   :  { %4218 = vmatpush1.bf16.msra.mxu0 %v6323_v26  ;;  %4250 = vmatpush1.bf16.msra.mxu1 %v6848_v46 }
 0x36f   :  { %4220 = vmatprep.subr.bf16.mxu0 %v6337_v31  ;;  %4252 = vmatprep.subr.bf16.mxu1 %v6851_v50 }
 0x372   :  { %4222 = vmatpush1.bf16.msra.mxu0 %v6354_v52  ;;  %4254 = vmatpush1.bf16.msra.mxu1 %v6856_v2 }
 0x373   :  { %4224 = vmatprep.subr.bf16.mxu0 %v6368_v59  ;;  %4256 = vmatprep.subr.bf16.mxu1 %v6859_v5 }
 0x376   :  { %4226 = vmatpush1.bf16.msra.mxu0 %v6385_v13  ;;  %4258 = vmatpush1.bf16.msra.mxu1 %v6864_v24 }
 0x377   :  { %4228 = vmatprep.subr.bf16.mxu0 %v6399_v22  ;;  %4260 = vmatprep.subr.bf16.mxu1 %v6869_v18 }
 0x37a   :  { %4230 = vmatpush1.bf16.msra.mxu0 %v6416_v41  ;;  %4262 = vmatpush1.bf16.msra.mxu1 %v6874_v45 }
 0x37b   :  { %4232 = vmatprep.subr.bf16.mxu0 %v6430_v35  ;;  %4264 = vmatprep.subr.bf16.mxu1 %v6878_v33 }
 0x37e   :  { %4234 = vmatpush1.bf16.msra.mxu0 %v6447_v8  ;;  %4266 = vmatpush1.bf16.msra.mxu1 %v6890_v14 }
 0x37f   :  { %4236 = vmatprep.subr.bf16.mxu0 %v6461_v23  ;;  %4268 = vmatprep.subr.bf16.mxu1 %v6896_v57 }
 0x382   :  { %4238 = vmatpush1.bf16.msra.mxu0 %v6478_v51  ;;  %4270 = vmatpush1.bf16.msra.mxu1 %v6906_v63 }
 0x383   :  { %4272 = vmatprep.subr.bf16.mxu0 %v6248_v34  ;;  %4304 = vmatprep.subr.bf16.mxu1 %v6830_v21 }
 0x438   :  { %v1740_v15 = vpop.f32.mrb[4].mxu0  ;;  %v1811_v7 = vpop.f32.mrb[20].mxu1 }
 0x439   :  { %v4824_v53 = vadd.f32 %v1740_v15, %v6912_v10  ;;  %v1742_v30 = vpop.f32.mrb[5].mxu0  ;;  %v1813_v61 = vpop.f32.mrb[21].mxu1  ;;  %v4851_v27 = vadd.f32 %v1811_v7, %v6964_v32 }
 0x43a   :  { %v4826_v38 = vadd.f32 %v1742_v30, %v6916_v6  ;;  %v4852_v0 = vadd.f32 %v1813_v61, %v6967_v47 }
 0x43b   :  { %v3506_v11 = vmul.f32 -1.442695, %v4824_v53  ;;  %v3508_v40 = vmul.f32 -1.442695, %v4851_v27 }
 0x43c   :  { %v3507_v42 = vmul.f32 -1.442695, %v4826_v38 }
 0x43d   :  { %4990 = vpow2.f32 %v3506_v11 }
 0x43e   :  { %4992 = vpow2.f32 %v3507_v42 }
 0x43f   :  { %4994 = vtanh.f32 %v4852_v0 }
 0x440   :  { %4996 = vpow2.f32 %v3508_v40 }
 0x447   :  { %v4991_v1 = vpop.eup %4990 }
 0x448   :  { %v1829_v29 = vadd.f32 1.0, %v4991_v1  ;;  %v4993_v3 = vpop.eup %4992 }
 0x449   :  { %v1830_v10 = vadd.f32 1.0, %v4993_v3  ;;  %v4995_v25 = vpop.eup %4994 }
 0x44a   :  { %4998 = vrcp.f32 %v1829_v29  ;;  %v4997_v56 = vpop.eup %4996 }
 0x44b   :  { %5000 = vrcp.f32 %v1830_v10  ;;  %v1831_v53 = vadd.f32 1.0, %v4997_v56 }
 0x44d   :  { %5002 = vrcp.f32 %v1831_v53 }
 0x454   :  { %v4999_v6 = vpop.eup %4998 }
 0x455   :  { %v1840_v60 = vmul.f32 %v4999_v6, %v4995_v25  ;;  %v5001_v15 = vpop.eup %5000 }
 0x456   :  { %v1839_v30 = vmul.f32 %v5001_v15, %v7013_v4 }
 0x457   :  { %v5003_v61 = vpop.eup %5002 }
 0x458   :  { %v7055_v7 = vadd.f32 %v1840_v60, %v1839_v30 }
 0x45a   :  { %5004 = vtanh.f32 %v7055_v7 }
 0x464   :  { %v5005_v38 = vpop.eup %5004 }
 0x465   :  { %v1843_v11 = vmul.f32 %v5005_v38, %v5003_v61 }
 0x467   :  { %1916 = vmatmul.mubr.f32.vlgmr.msra.gmra.mrb[6].mxu0 %v1843_v11  ;;  %1987 = vmatmul.mubr.f32.vlgmr.msra.gmra.mrb[22].mxu1 %v1843_v11 }
 0x468   :  { %4274 = vmatpush1.bf16.msra.mxu0 %v6261_v48  ;;  %4306 = vmatpush1.bf16.msra.mxu1 %v6832_v43 }
 0x469   :  { %4276 = vmatprep.subr.bf16.mxu0 %v6275_v54  ;;  %4308 = vmatprep.subr.bf16.mxu1 %v6835_v39 }
 0x46a   :  { %2092 = vmatprep.mubr.f32.mxu0 %v7296_v36  ;;  %2163 = vmatprep.mubr.f32.mxu1 %v7296_v36 }
 0x46c   :  { %4278 = vmatpush1.bf16.msra.mxu0 %v6292_v17  ;;  %4310 = vmatpush1.bf16.msra.mxu1 %v6840_v16 }
 0x46d   :  { %4280 = vmatprep.subr.bf16.mxu0 %v6306_v12  ;;  %4312 = vmatprep.subr.bf16.mxu1 %v6843_v58 }
 0x470   :  { %4282 = vmatpush1.bf16.msra.mxu0 %v6323_v26  ;;  %4314 = vmatpush1.bf16.msra.mxu1 %v6848_v46 }
 0x471   :  { %4284 = vmatprep.subr.bf16.mxu0 %v6337_v31  ;;  %4316 = vmatprep.subr.bf16.mxu1 %v6851_v50 }
 0x474   :  { %4286 = vmatpush1.bf16.msra.mxu0 %v6354_v52  ;;  %4318 = vmatpush1.bf16.msra.mxu1 %v6856_v2 }
 0x475   :  { %4288 = vmatprep.subr.bf16.mxu0 %v6368_v59  ;;  %4320 = vmatprep.subr.bf16.mxu1 %v6859_v5 }
 0x478   :  { %4290 = vmatpush1.bf16.msra.mxu0 %v6385_v13  ;;  %4322 = vmatpush1.bf16.msra.mxu1 %v6864_v24 }
 0x479   :  { %4292 = vmatprep.subr.bf16.mxu0 %v6399_v22  ;;  %4324 = vmatprep.subr.bf16.mxu1 %v6869_v18 }
 0x47c   :  { %4294 = vmatpush1.bf16.msra.mxu0 %v6416_v41  ;;  %4326 = vmatpush1.bf16.msra.mxu1 %v6874_v45 }
 0x47d   :  { %4296 = vmatprep.subr.bf16.mxu0 %v6430_v35  ;;  %4328 = vmatprep.subr.bf16.mxu1 %v6878_v33 }
 0x480   :  { %4298 = vmatpush1.bf16.msra.mxu0 %v6447_v8  ;;  %4330 = vmatpush1.bf16.msra.mxu1 %v6890_v14 }
 0x481   :  { %4300 = vmatprep.subr.bf16.mxu0 %v6461_v23  ;;  %4332 = vmatprep.subr.bf16.mxu1 %v6896_v57 }
 0x484   :  { %4302 = vmatpush1.bf16.msra.mxu0 %v6478_v51  ;;  %4334 = vmatpush1.bf16.msra.mxu1 %v6906_v63 }
 0x485   :  { %4336 = vmatprep.subr.bf16.mxu0 %v6248_v34  ;;  %4368 = vmatprep.subr.bf16.mxu1 %v6830_v21 }
 0x53a   :  { %v1917_v4 = vpop.f32.mrb[6].mxu0  ;;  %v1988_v42 = vpop.f32.mrb[22].mxu1 }
 0x53b   :  { %v4828_v27 = vadd.f32 %v1917_v4, %v6920_v19  ;;  %v1919_v0 = vpop.f32.mrb[7].mxu0  ;;  %v1990_v40 = vpop.f32.mrb[23].mxu1  ;;  %v4853_v10 = vadd.f32 %v1988_v42, %v6964_v32 }
 0x53c   :  { %v4830_v1 = vadd.f32 %v1919_v0, %v6922_v49  ;;  %v4854_v25 = vadd.f32 %v1990_v40, %v6967_v47 }
 0x53d   :  { %v3509_v29 = vmul.f32 -1.442695, %v4828_v27  ;;  %v3511_v56 = vmul.f32 -1.442695, %v4853_v10 }
 0x53e   :  { %v3510_v3 = vmul.f32 -1.442695, %v4830_v1 }
 0x53f   :  { %5006 = vpow2.f32 %v3509_v29 }
 0x540   :  { %5008 = vpow2.f32 %v3510_v3 }
 0x541   :  { %5010 = vtanh.f32 %v4854_v25 }
 0x542   :  { %5012 = vpow2.f32 %v3511_v56 }
 0x549   :  { %v5007_v6 = vpop.eup %5006 }
 0x54a   :  { %v2006_v60 = vadd.f32 1.0, %v5007_v6  ;;  %v5009_v15 = vpop.eup %5008 }
 0x54b   :  { %v2007_v19 = vadd.f32 1.0, %v5009_v15  ;;  %v5011_v53 = vpop.eup %5010 }
 0x54c   :  { %5014 = vrcp.f32 %v2006_v60  ;;  %v5013_v30 = vpop.eup %5012 }
 0x54d   :  { %5016 = vrcp.f32 %v2007_v19  ;;  %v2008_v11 = vadd.f32 1.0, %v5013_v30 }
 0x54f   :  { %5018 = vrcp.f32 %v2008_v11 }
 0x556   :  { %v5015_v49 = vpop.eup %5014 }
 0x557   :  { %v2017_v61 = vmul.f32 %v5015_v49, %v5011_v53  ;;  %v5017_v38 = vpop.eup %5016 }
 0x558   :  { %v2016_v4 = vmul.f32 %v5017_v38, %v7055_v7 }
 0x559   :  { %v5019_v27 = vpop.eup %5018 }
 0x55a   :  { %v7097_v42 = vadd.f32 %v2017_v61, %v2016_v4 }
 0x55c   :  { %5020 = vtanh.f32 %v7097_v42 }
 0x566   :  { %v5021_v0 = vpop.eup %5020 }
 0x567   :  { %v2020_v40 = vmul.f32 %v5021_v0, %v5019_v27 }
 0x569   :  { %2093 = vmatmul.mubr.f32.vlgmr.msra.gmra.mrb[8].mxu0 %v2020_v40  ;;  %2164 = vmatmul.mubr.f32.vlgmr.msra.gmra.mrb[24].mxu1 %v2020_v40 }
 0x56a   :  { %4338 = vmatpush1.bf16.msra.mxu0 %v6261_v48  ;;  %4370 = vmatpush1.bf16.msra.mxu1 %v6832_v43 }
 0x56b   :  { %4340 = vmatprep.subr.bf16.mxu0 %v6275_v54  ;;  %4372 = vmatprep.subr.bf16.mxu1 %v6835_v39 }
 0x56c   :  { %2269 = vmatprep.mubr.f32.mxu0 %v7296_v36  ;;  %2340 = vmatprep.mubr.f32.mxu1 %v7296_v36 }
 0x56e   :  { %4342 = vmatpush1.bf16.msra.mxu0 %v6292_v17  ;;  %4374 = vmatpush1.bf16.msra.mxu1 %v6840_v16 }
 0x56f   :  { %4344 = vmatprep.subr.bf16.mxu0 %v6306_v12  ;;  %4376 = vmatprep.subr.bf16.mxu1 %v6843_v58 }
 0x572   :  { %4346 = vmatpush1.bf16.msra.mxu0 %v6323_v26  ;;  %4378 = vmatpush1.bf16.msra.mxu1 %v6848_v46 }
 0x573   :  { %4348 = vmatprep.subr.bf16.mxu0 %v6337_v31  ;;  %4380 = vmatprep.subr.bf16.mxu1 %v6851_v50 }
 0x576   :  { %4350 = vmatpush1.bf16.msra.mxu0 %v6354_v52  ;;  %4382 = vmatpush1.bf16.msra.mxu1 %v6856_v2 }
 0x577   :  { %4352 = vmatprep.subr.bf16.mxu0 %v6368_v59  ;;  %4384 = vmatprep.subr.bf16.mxu1 %v6859_v5 }
 0x57a   :  { %4354 = vmatpush1.bf16.msra.mxu0 %v6385_v13  ;;  %4386 = vmatpush1.bf16.msra.mxu1 %v6864_v24 }
 0x57b   :  { %4356 = vmatprep.subr.bf16.mxu0 %v6399_v22  ;;  %4388 = vmatprep.subr.bf16.mxu1 %v6869_v18 }
 0x57e   :  { %4358 = vmatpush1.bf16.msra.mxu0 %v6416_v41  ;;  %4390 = vmatpush1.bf16.msra.mxu1 %v6874_v45 }
 0x57f   :  { %4360 = vmatprep.subr.bf16.mxu0 %v6430_v35  ;;  %4392 = vmatprep.subr.bf16.mxu1 %v6878_v33 }
 0x582   :  { %4362 = vmatpush1.bf16.msra.mxu0 %v6447_v8  ;;  %4394 = vmatpush1.bf16.msra.mxu1 %v6890_v14 }
 0x583   :  { %4364 = vmatprep.subr.bf16.mxu0 %v6461_v23  ;;  %4396 = vmatprep.subr.bf16.mxu1 %v6896_v57 }
 0x586   :  { %4366 = vmatpush1.bf16.msra.mxu0 %v6478_v51  ;;  %4398 = vmatpush1.bf16.msra.mxu1 %v6906_v63 }
 0x587   :  { %4400 = vmatprep.subr.bf16.mxu0 %v6248_v34  ;;  %4432 = vmatprep.subr.bf16.mxu1 %v6830_v21 }
 0x63c   :  { %v2094_v7 = vpop.f32.mrb[8].mxu0  ;;  %v2165_v1 = vpop.f32.mrb[24].mxu1 }
 0x63d   :  { %v4832_v29 = vadd.f32 %v2094_v7, %v6927_v28  ;;  %v2096_v3 = vpop.f32.mrb[9].mxu0  ;;  %v2167_v10 = vpop.f32.mrb[25].mxu1  ;;  %v4855_v60 = vadd.f32 %v2165_v1, %v6964_v32 }
 0x63e   :  { %v4834_v25 = vadd.f32 %v2096_v3, %v6929_v20  ;;  %v4856_v15 = vadd.f32 %v2167_v10, %v6967_v47 }
 0x63f   :  { %v3512_v56 = vmul.f32 -1.442695, %v4832_v29  ;;  %v3514_v19 = vmul.f32 -1.442695, %v4855_v60 }
 0x640   :  { %v3513_v6 = vmul.f32 -1.442695, %v4834_v25 }
 0x641   :  { %5022 = vpow2.f32 %v3512_v56 }
 0x642   :  { %5024 = vpow2.f32 %v3513_v6 }
 0x643   :  { %5026 = vtanh.f32 %v4856_v15 }
 0x644   :  { %5028 = vpow2.f32 %v3514_v19 }
 0x64b   :  { %v5023_v53 = vpop.eup %5022 }
 0x64c   :  { %v2183_v30 = vadd.f32 1.0, %v5023_v53  ;;  %v5025_v49 = vpop.eup %5024 }
 0x64d   :  { %v2184_v28 = vadd.f32 1.0, %v5025_v49  ;;  %v5027_v61 = vpop.eup %5026 }
 0x64e   :  { %5030 = vrcp.f32 %v2183_v30  ;;  %v5029_v38 = vpop.eup %5028 }
 0x64f   :  { %5032 = vrcp.f32 %v2184_v28  ;;  %v2185_v27 = vadd.f32 1.0, %v5029_v38 }
 0x651   :  { %5034 = vrcp.f32 %v2185_v27 }
 0x658   :  { %v5031_v20 = vpop.eup %5030 }
 0x659   :  { %v2194_v11 = vmul.f32 %v5031_v20, %v5027_v61  ;;  %v5033_v4 = vpop.eup %5032 }
 0x65a   :  { %v2193_v0 = vmul.f32 %v5033_v4, %v7097_v42 }
 0x65b   :  { %v5035_v7 = vpop.eup %5034 }
 0x65c   :  { %v7139_v40 = vadd.f32 %v2194_v11, %v2193_v0 }
 0x65e   :  { %5036 = vtanh.f32 %v7139_v40 }
 0x668   :  { %v5037_v1 = vpop.eup %5036 }
 0x669   :  { %v2197_v29 = vmul.f32 %v5037_v1, %v5035_v7 }
 0x66b   :  { %2270 = vmatmul.mubr.f32.vlgmr.msra.gmra.mrb[10].mxu0 %v2197_v29  ;;  %2341 = vmatmul.mubr.f32.vlgmr.msra.gmra.mrb[26].mxu1 %v2197_v29  ;;  %v2750_v29 = vld [vmem:[#allocation9 + $0x50] sm:$0xff] }
 0x66c   :  { %4402 = vmatpush1.bf16.msra.mxu0 %v6261_v48  ;;  %4434 = vmatpush1.bf16.msra.mxu1 %v6832_v43 }
 0x66d   :  { %4404 = vmatprep.subr.bf16.mxu0 %v6275_v54  ;;  %4436 = vmatprep.subr.bf16.mxu1 %v6835_v39 }
 0x66e   :  { %2446 = vmatprep.mubr.f32.mxu0 %v7296_v36  ;;  %2517 = vmatprep.mubr.f32.mxu1 %v7296_v36 }
 0x670   :  { %4406 = vmatpush1.bf16.msra.mxu0 %v6292_v17  ;;  %4438 = vmatpush1.bf16.msra.mxu1 %v6840_v16 }
 0x671   :  { %4408 = vmatprep.subr.bf16.mxu0 %v6306_v12  ;;  %4440 = vmatprep.subr.bf16.mxu1 %v6843_v58 }
 0x674   :  { %4410 = vmatpush1.bf16.msra.mxu0 %v6323_v26  ;;  %4442 = vmatpush1.bf16.msra.mxu1 %v6848_v46 }
 0x675   :  { %4412 = vmatprep.subr.bf16.mxu0 %v6337_v31  ;;  %4444 = vmatprep.subr.bf16.mxu1 %v6851_v50 }
 0x678   :  { %4414 = vmatpush1.bf16.msra.mxu0 %v6354_v52  ;;  %4446 = vmatpush1.bf16.msra.mxu1 %v6856_v2 }
 0x679   :  { %4416 = vmatprep.subr.bf16.mxu0 %v6368_v59  ;;  %4448 = vmatprep.subr.bf16.mxu1 %v6859_v5 }
 0x67c   :  { %4418 = vmatpush1.bf16.msra.mxu0 %v6385_v13  ;;  %4450 = vmatpush1.bf16.msra.mxu1 %v6864_v24 }
 0x67d   :  { %4420 = vmatprep.subr.bf16.mxu0 %v6399_v22  ;;  %4452 = vmatprep.subr.bf16.mxu1 %v6869_v18 }
 0x680   :  { %4422 = vmatpush1.bf16.msra.mxu0 %v6416_v41  ;;  %4454 = vmatpush1.bf16.msra.mxu1 %v6874_v45 }
 0x681   :  { %4424 = vmatprep.subr.bf16.mxu0 %v6430_v35  ;;  %4456 = vmatprep.subr.bf16.mxu1 %v6878_v33 }
 0x684   :  { %4426 = vmatpush1.bf16.msra.mxu0 %v6447_v8  ;;  %4458 = vmatpush1.bf16.msra.mxu1 %v6890_v14 }
 0x685   :  { %4428 = vmatprep.subr.bf16.mxu0 %v6461_v23  ;;  %4460 = vmatprep.subr.bf16.mxu1 %v6896_v57 }
 0x688   :  { %4430 = vmatpush1.bf16.msra.mxu0 %v6478_v51  ;;  %4462 = vmatpush1.bf16.msra.mxu1 %v6906_v63 }
 0x689   :  { %4464 = vmatprep.subr.bf16.mxu0 %v6248_v34  ;;  %4496 = vmatprep.subr.bf16.mxu1 %v6830_v21 }
 0x73e   :  { %v2271_v42 = vpop.f32.mrb[10].mxu0  ;;  %v2342_v3 = vpop.f32.mrb[26].mxu1 }
 0x73f   :  { %v4836_v10 = vadd.f32 %v2271_v42, %v6933_v37  ;;  %v2273_v25 = vpop.f32.mrb[11].mxu0  ;;  %v2344_v56 = vpop.f32.mrb[27].mxu1  ;;  %v4857_v19 = vadd.f32 %v2342_v3, %v6964_v32  ;;  %v2796_v42 = vld [vmem:[#allocation9 + $0x1c0] sm:$0xff]  ;;  %v2799_v3 = vld [vmem:[#allocation9 + $0x1d8] sm:$0xff] }
 0x740   :  { %v4838_v6 = vadd.f32 %v2273_v25, %v6935_v55  ;;  %v4858_v53 = vadd.f32 %v2344_v56, %v6967_v47 }
 0x741   :  { %v3515_v60 = vmul.f32 -1.442695, %v4836_v10  ;;  %v3517_v30 = vmul.f32 -1.442695, %v4857_v19 }
 0x742   :  { %v3516_v15 = vmul.f32 -1.442695, %v4838_v6  ;;  %v2746_v6 = vld [vmem:[#allocation9 + $0x30] sm:$0xff] }
 0x743   :  { %5038 = vpow2.f32 %v3515_v60  ;;  %v2749_v60 = vld [vmem:[#allocation9 + $0x48] sm:$0xff] }
 0x744   :  { %5040 = vpow2.f32 %v3516_v15 }
 0x745   :  { %5042 = vtanh.f32 %v4858_v53 }
 0x746   :  { %5044 = vpow2.f32 %v3517_v30  ;;  %v2753_v30 = vld [vmem:[#allocation9 + $0x68] sm:$0xff] }
 0x74d   :  { %v5039_v34 = vpop.eup %5038 }
 0x74e   :  { %v2360_v49 = vadd.f32 1.0, %v5039_v34  ;;  %v5041_v21 = vpop.eup %5040  ;;  %v4723_v34 = vpack.c.bf16 %v2799_v3, %v2796_v42  ;;  %v2772_v3 = vld [vmem:[#allocation9 + $0x100] sm:$0xff] }
 0x74f   :  { %v2361_v37 = vadd.f32 1.0, %v5041_v21  ;;  %v5043_v28 = vpop.eup %5042  ;;  %v2751_v21 = vld [vmem:[#allocation9 + $0x58] sm:$0xff] }
 0x750   :  { %5046 = vrcp.f32 %v2360_v49  ;;  %v5045_v61 = vpop.eup %5044  ;;  %v2748_v49 = vld [vmem:[#allocation9 + $0x40] sm:$0xff] }
 0x751   :  { %5048 = vrcp.f32 %v2361_v37  ;;  %v2362_v11 = vadd.f32 1.0, %v5045_v61  ;;  %v2756_v37 = vld [vmem:[#allocation9 + $0x80] sm:$0xff]  ;;  %v2805_v61 = vld [vmem:[#allocation9 + $0x208] sm:$0xff] }
 0x753   :  { %5050 = vrcp.f32 %v2362_v11  ;;  %v2755_v11 = vld [vmem:[#allocation9 + $0x78] sm:$0xff] }
 0x75a   :  { %v5047_v55 = vpop.eup %5046 }
 0x75b   :  { %v2371_v38 = vmul.f32 %v5047_v55, %v5043_v28  ;;  %v5049_v20 = vpop.eup %5048  ;;  %v2802_v28 = vld [vmem:[#allocation9 + $0x1f0] sm:$0xff]  ;;  %v2735_v55 = vld [vmem:[%s7280_s1 + $0x8] sm:$0xff] }
 0x75c   :  { %v2370_v4 = vmul.f32 %v5049_v20, %v7139_v40  ;;  %v2745_v40 = vld [vmem:[#allocation9 + $0x28] sm:$0xff]  ;;  %v2752_v20 = vld [vmem:[#allocation9 + $0x60] sm:$0xff] }
 0x75d   :  { %v5051_v0 = vpop.eup %5050 }
 0x75e   :  { %v7181_v27 = vadd.f32 %v2371_v38, %v2370_v4  ;;  %v4533_v38 = vpack.c.bf16 %v2749_v60, %v2746_v6  ;;  %v4725_v4 = vpack.c.bf16 %v2751_v21, %v2748_v49  ;;  %v2829_v6 = vld [vmem:[#allocation9 + $0x2c8] sm:$0xff]  ;;  %v2778_v21 = vld [vmem:[#allocation9 + $0x130] sm:$0xff] }
 0x760   :  { %5052 = vtanh.f32 %v7181_v27 }
 0x76a   :  { %v5053_v7 = vpop.eup %5052 }
 0x76b   :  { %v2374_v1 = vmul.f32 %v5053_v7, %v5051_v0  ;;  %v2759_v0 = vld [vmem:[#allocation9 + $0x98] sm:$0xff]  ;;  %v4727_v7 = vpack.c.bf16 %v2805_v61, %v2802_v28  ;;  %v2786_v28 = vld [vmem:[#allocation9 + $0x170] sm:$0xff]  ;;  %v2832_v61 = vld [vmem:[#allocation9 + $0x2e0] sm:$0xff] }
 0x76d   :  { %2447 = vmatmul.mubr.f32.vlgmr.msra.gmra.mrb[12].mxu0 %v2374_v1  ;;  %2518 = vmatmul.mubr.f32.vlgmr.msra.gmra.mrb[28].mxu1 %v2374_v1  ;;  %v2754_v1 = vld [vmem:[#allocation9 + $0x70] sm:$0xff] }
 0x76e   :  { %4466 = vmatpush1.bf16.msra.mxu0 %v6261_v48  ;;  %4498 = vmatpush1.bf16.msra.mxu1 %v6832_v43  ;;  %v2741_v48 = vld [vmem:[#allocation9 + $0x8] sm:$0xff] }
 0x76f   :  { %4468 = vmatprep.subr.bf16.mxu0 %v6275_v54  ;;  %4500 = vmatprep.subr.bf16.mxu1 %v6835_v39  ;;  %v2744_v54 = vld [vmem:[#allocation9 + $0x20] sm:$0xff] }
 0x770   :  { %2623 = vmatprep.mubr.f32.mxu0 %v7296_v36  ;;  %2694 = vmatprep.mubr.f32.mxu1 %v7296_v36  ;;  %v2742_v36 = vld [vmem:[#allocation9 + $0x10] sm:$0xff] }
 0x771   :  { %v4721_v15 = vpack.c.bf16 %v2745_v40, %v2742_v36 }
 0x772   :  { %4470 = vmatpush1.bf16.msra.mxu0 %v6292_v17  ;;  %4502 = vmatpush1.bf16.msra.mxu1 %v6840_v16  ;;  %v4527_v17 = vpack.c.bf16 %v2744_v54, %v2741_v48  ;;  %v2757_v48 = vld [vmem:[#allocation9 + $0x88] sm:$0xff]  ;;  %v2762_v54 = vld [vmem:[#allocation9 + $0xb0] sm:$0xff] }
 0x773   :  { %4472 = vmatprep.subr.bf16.mxu0 %v6306_v12  ;;  %4504 = vmatprep.subr.bf16.mxu1 %v6843_v58  ;;  %v2790_v12 = vld [vmem:[#allocation9 + $0x190] sm:$0xff] }
 0x776   :  { %4474 = vmatpush1.bf16.msra.mxu0 %v6323_v26  ;;  %4506 = vmatpush1.bf16.msra.mxu1 %v6848_v46  ;;  %v2793_v26 = vld [vmem:[#allocation9 + $0x1a8] sm:$0xff] }
 0x777   :  { %4476 = vmatprep.subr.bf16.mxu0 %v6337_v31  ;;  %4508 = vmatprep.subr.bf16.mxu1 %v6851_v50  ;;  %v4719_v31 = vpack.c.bf16 %v2793_v26, %v2790_v12  ;;  %v2811_v12 = vld [vmem:[#allocation9 + $0x238] sm:$0xff]  ;;  %v4537_v26 = vpack.c.bf16 %v2755_v11, %v2752_v20  ;;  %v2782_v20 = vld [vmem:[#allocation9 + $0x150] sm:$0xff]  ;;  %v2785_v11 = vld [vmem:[#allocation9 + $0x168] sm:$0xff] }
 0x77a   :  { %4478 = vmatpush1.bf16.msra.mxu0 %v6354_v52  ;;  %4510 = vmatpush1.bf16.msra.mxu1 %v6856_v2 }
 0x77b   :  { %4480 = vmatprep.subr.bf16.mxu0 %v6368_v59  ;;  %4512 = vmatprep.subr.bf16.mxu1 %v6859_v5 }
 0x77e   :  { %4482 = vmatpush1.bf16.msra.mxu0 %v6385_v13  ;;  %4514 = vmatpush1.bf16.msra.mxu1 %v6864_v24 }
 0x77f   :  { %4484 = vmatprep.subr.bf16.mxu0 %v6399_v22  ;;  %4516 = vmatprep.subr.bf16.mxu1 %v6869_v18 }
 0x782   :  { %4486 = vmatpush1.bf16.msra.mxu0 %v6416_v41  ;;  %4518 = vmatpush1.bf16.msra.mxu1 %v6874_v45 }
 0x783   :  { %4488 = vmatprep.subr.bf16.mxu0 %v6430_v35  ;;  %4520 = vmatprep.subr.bf16.mxu1 %v6878_v33 }
 0x786   :  { %4490 = vmatpush1.bf16.msra.mxu0 %v6447_v8  ;;  %4522 = vmatpush1.bf16.msra.mxu1 %v6890_v14 }
 0x787   :  { %4492 = vmatprep.subr.bf16.mxu0 %v6461_v23  ;;  %4524 = vmatprep.subr.bf16.mxu1 %v6896_v57 }
 0x78a   :  { %4494 = vmatpush1.bf16.msra.mxu0 %v6478_v51  ;;  %4526 = vmatpush1.bf16.msra.mxu1 %v6906_v63  ;;  %v2740_v63 = vld [vmem:[#allocation9] sm:$0xff] }
 0x78b   :  { %4528 = vmatprep.subr.bf16.mxu0 %v4527_v17  ;;  %4720 = vmatprep.subr.bf16.mxu1 %v4719_v31  ;;  %v2808_v17 = vld [vmem:[#allocation9 + $0x220] sm:$0xff]  ;;  %v2758_v31 = vld [vmem:[#allocation9 + $0x90] sm:$0xff] }
 0x840   :  { %v2448_v52 = vpop.f32.mrb[12].mxu0  ;;  %v2519_v59 = vpop.f32.mrb[28].mxu1 }
 0x841   :  { %v4840_v13 = vadd.f32 %v2448_v52, %v6939_v44  ;;  %v2450_v22 = vpop.f32.mrb[13].mxu0  ;;  %v2521_v41 = vpop.f32.mrb[29].mxu1  ;;  %v4859_v51 = vadd.f32 %v2519_v59, %v6964_v32  ;;  %v2743_v44 = vld [vmem:[#allocation9 + $0x18] sm:$0xff]  ;;  %v2761_v52 = vld [vmem:[#allocation9 + $0xa8] sm:$0xff]  ;;  %v4729_v59 = vpack.c.bf16 %v2757_v48, %v2754_v1  ;;  %v2784_v1 = vld [vmem:[#allocation9 + $0x160] sm:$0xff] }
 0x842   :  { %v4842_v35 = vadd.f32 %v2450_v22, %v6941_v9  ;;  %v4860_v43 = vadd.f32 %v2521_v41, %v6967_v47  ;;  %v2747_v9 = vld [vmem:[#allocation9 + $0x38] sm:$0xff]  ;;  %v4529_v56 = vpack.c.bf16 %v2743_v44, %v2740_v63  ;;  %v2765_v22 = vld [vmem:[#allocation9 + $0xc8] sm:$0xff]  ;;  %v4731_v41 = vpack.c.bf16 %v2811_v12, %v2808_v17  ;;  %v2770_v44 = vld [vmem:[#allocation9 + $0xf0] sm:$0xff] }
 0x843   :  { %v3518_v8 = vmul.f32 -1.442695, %v4840_v13  ;;  %v3520_v39 = vmul.f32 -1.442695, %v4859_v51  ;;  %v4531_v53 = vpack.c.bf16 %v2750_v29, %v2747_v9  ;;  %v4539_v13 = vpack.c.bf16 %v2762_v54, %v2759_v0  ;;  %v2814_v51 = vld [vmem:[#allocation9 + $0x250] sm:$0xff]  ;;  %v2773_v9 = vld [vmem:[#allocation9 + $0x108] sm:$0xff] }
 0x844   :  { %v3519_v23 = vmul.f32 -1.442695, %v4842_v35  ;;  %v2760_v35 = vld [vmem:[#allocation9 + $0xa0] sm:$0xff]  ;;  %v2777_v29 = vld [vmem:[#allocation9 + $0x128] sm:$0xff]  ;;  %v4549_v60 = vpack.c.bf16 %v2773_v9, %v2770_v44  ;;  %v2787_v48 = vld [vmem:[#allocation9 + $0x178] sm:$0xff] }
 0x845   :  { %5054 = vpow2.f32 %v3518_v8  ;;  %v2763_v8 = vld [vmem:[#allocation9 + $0xb8] sm:$0xff]  ;;  %v2789_v0 = vld [vmem:[#allocation9 + $0x188] sm:$0xff]  ;;  %v2792_v54 = vld [vmem:[#allocation9 + $0x1a0] sm:$0xff] }
 0x846   :  { %5056 = vpow2.f32 %v3519_v23  ;;  %v2768_v23 = vld [vmem:[#allocation9 + $0xe0] sm:$0xff]  ;;  %v2886_v17 = vld [vmem:[#allocation9 + $0x490] sm:$0xff]  ;;  %v2889_v12 = vld [vmem:[#allocation9 + $0x4a8] sm:$0xff] }
 0x847   :  { %5058 = vtanh.f32 %v4860_v43  ;;  %v2817_v43 = vld [vmem:[#allocation9 + $0x268] sm:$0xff]  ;;  %v7236_v44 = vld [vmem:[%s7280_s1 + $0x18] sm:$0xff] }
 0x848   :  { %5060 = vpow2.f32 %v3520_v39  ;;  %v4541_v39 = vpack.c.bf16 %v2761_v52, %v2758_v31  ;;  %v2788_v31 = vld [vmem:[#allocation9 + $0x180] sm:$0xff]  ;;  %v2791_v52 = vld [vmem:[#allocation9 + $0x198] sm:$0xff] }
 0x84f   :  { %v5055_v16 = vpop.eup %5054 }
 0x850   :  { %v2537_v58 = vadd.f32 1.0, %v5055_v16  ;;  %v5057_v46 = vpop.eup %5056  ;;  %v2764_v16 = vld [vmem:[#allocation9 + $0xc0] sm:$0xff] }
 0x851   :  { %v2538_v50 = vadd.f32 1.0, %v5057_v46  ;;  %v5059_v2 = vpop.eup %5058  ;;  %v4733_v46 = vpack.c.bf16 %v2763_v8, %v2760_v35  ;;  %v2838_v35 = vld [vmem:[#allocation9 + $0x310] sm:$0xff]  ;;  %v2841_v8 = vld [vmem:[#allocation9 + $0x328] sm:$0xff] }
 0x852   :  { %5062 = vrcp.f32 %v2537_v58  ;;  %v5061_v5 = vpop.eup %5060  ;;  %v2767_v58 = vld [vmem:[#allocation9 + $0xd8] sm:$0xff] }
 0x853   :  { %5064 = vrcp.f32 %v2538_v50  ;;  %v2539_v33 = vadd.f32 1.0, %v5061_v5  ;;  %v4543_v50 = vpack.c.bf16 %v2768_v23, %v2765_v22  ;;  %v4735_v5 = vpack.c.bf16 %v2817_v43, %v2814_v51  ;;  %v2795_v22 = vld [vmem:[#allocation9 + $0x1b8] sm:$0xff]  ;;  %v2798_v23 = vld [vmem:[#allocation9 + $0x1d0] sm:$0xff]  ;;  %v2892_v51 = vld [vmem:[#allocation9 + $0x4c0] sm:$0xff] }
 0x854   :  { %v4545_v63 = vpack.c.bf16 %v2767_v58, %v2764_v16  ;;  %v2895_v43 = vld [vmem:[#allocation9 + $0x4d8] sm:$0xff]  ;;  %v2794_v16 = vld [vmem:[#allocation9 + $0x1b0] sm:$0xff]  ;;  %v2797_v58 = vld [vmem:[#allocation9 + $0x1c8] sm:$0xff] }
 0x855   :  { %5066 = vrcp.f32 %v2539_v33  ;;  %v2820_v33 = vld [vmem:[#allocation9 + $0x280] sm:$0xff]  ;;  %v4565_v9 = vpack.c.bf16 %v2797_v58, %v2794_v16  ;;  %v2925_v16 = vld [vmem:[#allocation9 + $0x5c8] sm:$0xff] }
 0x85c   :  { %v5063_v24 = vpop.eup %5062 }
 0x85d   :  { %v2548_v18 = vmul.f32 %v5063_v24, %v5059_v2  ;;  %v5065_v45 = vpop.eup %5064  ;;  %v2771_v2 = vld [vmem:[#allocation9 + $0xf8] sm:$0xff]  ;;  %v2766_v24 = vld [vmem:[#allocation9 + $0xd0] sm:$0xff] }
 0x85e   :  { %v2547_v14 = vmul.f32 %v5065_v45, %v7181_v27  ;;  %v4535_v27 = vpack.c.bf16 %v2756_v37, %v2753_v30  ;;  %v2774_v45 = vld [vmem:[#allocation9 + $0x110] sm:$0xff]  ;;  %v2781_v37 = vld [vmem:[#allocation9 + $0x148] sm:$0xff] }
 0x85f   :  { %v5067_v10 = vpop.eup %5066  ;;  %v4547_v40 = vpack.c.bf16 %v2774_v45, %v2771_v2  ;;  %v4563_v2 = vpack.c.bf16 %v2798_v23, %v2795_v22  ;;  %v2847_v45 = vld [vmem:[#allocation9 + $0x358] sm:$0xff]  ;;  %v2868_v23 = vld [vmem:[#allocation9 + $0x400] sm:$0xff] }
 0x860   :  { %v7221_v57 = vadd.f32 %v2548_v18, %v2547_v14  ;;  %v2769_v18 = vld [vmem:[#allocation9 + $0xe8] sm:$0xff]  ;;  %v2823_v14 = vld [vmem:[#allocation9 + $0x298] sm:$0xff] }
 0x861   :  { %v4737_v36 = vpack.c.bf16 %v2769_v18, %v2766_v24  ;;  %v4739_v42 = vpack.c.bf16 %v2823_v14, %v2820_v33  ;;  %v4755_v24 = vpack.c.bf16 %v2895_v43, %v2892_v51  ;;  %v2844_v18 = vld [vmem:[#allocation9 + $0x340] sm:$0xff]  ;;  %v2898_v14 = vld [vmem:[#allocation9 + $0x4f0] sm:$0xff]  ;;  %v2871_v51 = vld [vmem:[#allocation9 + $0x418] sm:$0xff] }
 0x862   :  { %5068 = vtanh.f32 %v7221_v57  ;;  %v7230_v33 = vld [vmem:[%s7280_s1] sm:$0xff] }
 0x863   :  { %v2828_v43 = vld [vmem:[#allocation9 + $0x2c0] sm:$0xff] }
 0x86c   :  { %v5069_v25 = vpop.eup %5068 }
 0x86d   :  { %v2551_v19 = vmul.f32 %v5069_v25, %v5067_v10  ;;  %v2775_v10 = vld [vmem:[#allocation9 + $0x118] sm:$0xff]  ;;  %v2780_v25 = vld [vmem:[#allocation9 + $0x140] sm:$0xff] }
 0x86e   :  { %v4551_v30 = vpack.c.bf16 %v2780_v25, %v2777_v29  ;;  %v4757_v29 = vpack.c.bf16 %v2847_v45, %v2844_v18  ;;  %v2850_v25 = vld [vmem:[#allocation9 + $0x370] sm:$0xff] }
 0x86f   :  { %2624 = vmatmul.mubr.f32.vlgmr.msra.gmra.mrb[14].mxu0 %v2551_v19  ;;  %2695 = vmatmul.mubr.f32.vlgmr.msra.gmra.mrb[30].mxu1 %v2551_v19  ;;  %v2779_v19 = vld [vmem:[#allocation9 + $0x138] sm:$0xff]  ;;  %v2874_v45 = vld [vmem:[#allocation9 + $0x430] sm:$0xff] }
 0x870   :  { %4530 = vmatpush1.bf16.msra.mxu0 %v4529_v56  ;;  %4722 = vmatpush3.bf16.msra.mxu1 %v4721_v15  ;;  %v2826_v56 = vld [vmem:[#allocation9 + $0x2b0] sm:$0xff]  ;;  %v2776_v15 = vld [vmem:[#allocation9 + $0x120] sm:$0xff] }
 0x871   :  { %4532 = vmatprep.subr.bf16.mxu0 %v4531_v53  ;;  %4724 = vmatprep.subr.bf16.mxu1 %v4723_v34  ;;  %v4741_v53 = vpack.c.bf16 %v2775_v10, %v2772_v3  ;;  %v2783_v34 = vld [vmem:[#allocation9 + $0x158] sm:$0xff]  ;;  %v4743_v49 = vpack.c.bf16 %v2829_v6, %v2826_v56  ;;  %v2853_v56 = vld [vmem:[#allocation9 + $0x388] sm:$0xff]  ;;  %v2810_v6 = vld [vmem:[#allocation9 + $0x230] sm:$0xff] }
 0x872   :  { %3109 = vmatprep.mubr.f32.mxu0 %v2735_v55  ;;  %3322 = vmatprep.mubr.f32.mxu1 %v2735_v55  ;;  %v2835_v55 = vld [vmem:[#allocation9 + $0x2f8] sm:$0xff] }
 0x873   :  { %v2807_v3 = vld [vmem:[#allocation9 + $0x218] sm:$0xff] }
 0x874   :  { %4534 = vmatpush1.bf16.msra.mxu0 %v4533_v38  ;;  %4726 = vmatpush3.bf16.msra.mxu1 %v4725_v4  ;;  %v4553_v38 = vpack.c.bf16 %v2779_v19, %v2776_v15  ;;  %v4745_v4 = vpack.c.bf16 %v2781_v37, %v2778_v21  ;;  %v2907_v15 = vld [vmem:[#allocation9 + $0x538] sm:$0xff]  ;;  %v2813_v21 = vld [vmem:[#allocation9 + $0x248] sm:$0xff] }
 0x875   :  { %4536 = vmatprep.subr.bf16.mxu0 %v4535_v27  ;;  %4728 = vmatprep.subr.bf16.mxu1 %v4727_v7  ;;  %v4555_v27 = vpack.c.bf16 %v2786_v28, %v2783_v34  ;;  %v4747_v7 = vpack.c.bf16 %v2835_v55, %v2832_v61  ;;  %v4761_v34 = vpack.c.bf16 %v2853_v56, %v2850_v25  ;;  %v2856_v28 = vld [vmem:[#allocation9 + $0x3a0] sm:$0xff]  ;;  %v2859_v61 = vld [vmem:[#allocation9 + $0x3b8] sm:$0xff]  ;;  %v2837_v25 = vld [vmem:[#allocation9 + $0x308] sm:$0xff] }
 0x876   :  { %v2816_v55 = vld [vmem:[#allocation9 + $0x260] sm:$0xff] }
 0x878   :  { %4538 = vmatpush1.bf16.msra.mxu0 %v4537_v26  ;;  %4730 = vmatpush3.bf16.msra.mxu1 %v4729_v59  ;;  %v4557_v26 = vpack.c.bf16 %v2785_v11, %v2782_v20  ;;  %v4749_v59 = vpack.c.bf16 %v2787_v48, %v2784_v1  ;;  %v2913_v20 = vld [vmem:[#allocation9 + $0x568] sm:$0xff]  ;;  %v2819_v1 = vld [vmem:[#allocation9 + $0x278] sm:$0xff] }
 0x879   :  { %4540 = vmatprep.subr.bf16.mxu0 %v4539_v13  ;;  %4732 = vmatprep.subr.bf16.mxu1 %v4731_v41  ;;  %v4559_v13 = vpack.c.bf16 %v2792_v54, %v2789_v0  ;;  %v4751_v41 = vpack.c.bf16 %v2889_v12, %v2886_v17  ;;  %v4765_v0 = vpack.c.bf16 %v2859_v61, %v2856_v28  ;;  %v2862_v54 = vld [vmem:[#allocation9 + $0x3d0] sm:$0xff]  ;;  %v2865_v17 = vld [vmem:[#allocation9 + $0x3e8] sm:$0xff]  ;;  %v2843_v28 = vld [vmem:[#allocation9 + $0x338] sm:$0xff] }
 0x87a   :  { %v2822_v12 = vld [vmem:[#allocation9 + $0x290] sm:$0xff]  ;;  %v4769_v22 = vpack.c.bf16 %v2865_v17, %v2862_v54  ;;  %v2849_v17 = vld [vmem:[#allocation9 + $0x368] sm:$0xff] }
 0x87c   :  { %4542 = vmatpush1.bf16.msra.mxu0 %v4541_v39  ;;  %4734 = vmatpush3.bf16.msra.mxu1 %v4733_v46  ;;  %v4561_v39 = vpack.c.bf16 %v2791_v52, %v2788_v31  ;;  %v2801_v46 = vld [vmem:[#allocation9 + $0x1e8] sm:$0xff]  ;;  %v2919_v31 = vld [vmem:[#allocation9 + $0x598] sm:$0xff] }
 0x87d   :  { %4544 = vmatprep.subr.bf16.mxu0 %v4543_v50  ;;  %4736 = vmatprep.subr.bf16.mxu1 %v4735_v5  ;;  %v4753_v50 = vpack.c.bf16 %v2841_v8, %v2838_v35  ;;  %v2804_v5 = vld [vmem:[#allocation9 + $0x200] sm:$0xff]  ;;  %v2825_v35 = vld [vmem:[#allocation9 + $0x2a8] sm:$0xff] }
 0x880   :  { %4546 = vmatpush1.bf16.msra.mxu0 %v4545_v63  ;;  %4738 = vmatpush3.bf16.msra.mxu1 %v4737_v36  ;;  %v2901_v63 = vld [vmem:[#allocation9 + $0x508] sm:$0xff]  ;;  %v2800_v36 = vld [vmem:[#allocation9 + $0x1e0] sm:$0xff] }
 0x881   :  { %4548 = vmatprep.subr.bf16.mxu0 %v4547_v40  ;;  %4740 = vmatprep.subr.bf16.mxu1 %v4739_v42  ;;  %v2803_v40 = vld [vmem:[#allocation9 + $0x1f8] sm:$0xff]  ;;  %v4567_v42 = vpack.c.bf16 %v2804_v5, %v2801_v46  ;;  %v4759_v10 = vpack.c.bf16 %v2901_v63, %v2898_v14  ;;  %v2824_v46 = vld [vmem:[#allocation9 + $0x2a0] sm:$0xff]  ;;  %v4583_v5 = vpack.c.bf16 %v2828_v43, %v2825_v35  ;;  %v2877_v14 = vld [vmem:[#allocation9 + $0x448] sm:$0xff] }
 0x882   :  { %v4569_v19 = vpack.c.bf16 %v2803_v40, %v2800_v36  ;;  %v2834_v63 = vld [vmem:[#allocation9 + $0x2f0] sm:$0xff]  ;;  %v2931_v36 = vld [vmem:[#allocation9 + $0x5f8] sm:$0xff]  ;;  %v2848_v35 = vld [vmem:[#allocation9 + $0x360] sm:$0xff] }
 0x883   :  { %v2855_v43 = vld [vmem:[#allocation9 + $0x398] sm:$0xff] }
 0x884   :  { %4550 = vmatpush1.bf16.msra.mxu0 %v4549_v60  ;;  %4742 = vmatpush3.bf16.msra.mxu1 %v4741_v53  ;;  %v2904_v60 = vld [vmem:[#allocation9 + $0x520] sm:$0xff]  ;;  %v2806_v53 = vld [vmem:[#allocation9 + $0x210] sm:$0xff] }
 0x885   :  { %4552 = vmatprep.subr.bf16.mxu0 %v4551_v30  ;;  %4744 = vmatprep.subr.bf16.mxu1 %v4743_v49  ;;  %v2809_v30 = vld [vmem:[#allocation9 + $0x228] sm:$0xff]  ;;  %v4571_v49 = vpack.c.bf16 %v2810_v6, %v2807_v3  ;;  %v4763_v37 = vpack.c.bf16 %v2907_v15, %v2904_v60  ;;  %v4777_v3 = vpack.c.bf16 %v2877_v14, %v2874_v45  ;;  %v2880_v6 = vld [vmem:[#allocation9 + $0x460] sm:$0xff]  ;;  %v2883_v60 = vld [vmem:[#allocation9 + $0x478] sm:$0xff] }
 0x886   :  { %v4573_v11 = vpack.c.bf16 %v2809_v30, %v2806_v53  ;;  %v2840_v15 = vld [vmem:[#allocation9 + $0x320] sm:$0xff]  ;;  %v2985_v53 = vld [vmem:[#allocation9 + $0x7a8] sm:$0xff] }
 0x887   :  { %v2861_v14 = vld [vmem:[#allocation9 + $0x3c8] sm:$0xff] }
 0x888   :  { %4554 = vmatpush1.bf16.msra.mxu0 %v4553_v38  ;;  %4746 = vmatpush3.bf16.msra.mxu1 %v4745_v4  ;;  %v2910_v38 = vld [vmem:[#allocation9 + $0x550] sm:$0xff]  ;;  %v2812_v4 = vld [vmem:[#allocation9 + $0x240] sm:$0xff] }
 0x889   :  { %4556 = vmatprep.subr.bf16.mxu0 %v4555_v27  ;;  %4748 = vmatprep.subr.bf16.mxu1 %v4747_v7  ;;  %v2815_v27 = vld [vmem:[#allocation9 + $0x258] sm:$0xff]  ;;  %v4575_v7 = vpack.c.bf16 %v2816_v55, %v2813_v21  ;;  %v4767_v48 = vpack.c.bf16 %v2913_v20, %v2910_v38  ;;  %v4781_v21 = vpack.c.bf16 %v2883_v60, %v2880_v6  ;;  %v2934_v55 = vld [vmem:[#allocation9 + $0x610] sm:$0xff]  ;;  %v2937_v38 = vld [vmem:[#allocation9 + $0x628] sm:$0xff] }
 0x88a   :  { %v4577_v52 = vpack.c.bf16 %v2815_v27, %v2812_v4  ;;  %v2846_v20 = vld [vmem:[#allocation9 + $0x350] sm:$0xff]  ;;  %v2991_v4 = vld [vmem:[#allocation9 + $0x7d8] sm:$0xff] }
 0x88b   :  { %v4595_v54 = vpack.c.bf16 %v2846_v20, %v2843_v28  ;;  %v2867_v6 = vld [vmem:[#allocation9 + $0x3f8] sm:$0xff]  ;;  %v2964_v20 = vld [vmem:[#allocation9 + $0x700] sm:$0xff] }
 0x88c   :  { %4558 = vmatpush1.bf16.msra.mxu0 %v4557_v26  ;;  %4750 = vmatpush3.bf16.msra.mxu1 %v4749_v59  ;;  %v2916_v26 = vld [vmem:[#allocation9 + $0x580] sm:$0xff]  ;;  %v2818_v59 = vld [vmem:[#allocation9 + $0x270] sm:$0xff] }
 0x88d   :  { %4560 = vmatprep.subr.bf16.mxu0 %v4559_v13  ;;  %4752 = vmatprep.subr.bf16.mxu1 %v4751_v41  ;;  %v2821_v13 = vld [vmem:[#allocation9 + $0x288] sm:$0xff]  ;;  %v4579_v41 = vpack.c.bf16 %v2822_v12, %v2819_v1  ;;  %v4771_v8 = vpack.c.bf16 %v2919_v31, %v2916_v26  ;;  %v2940_v26 = vld [vmem:[#allocation9 + $0x640] sm:$0xff]  ;;  %v2943_v31 = vld [vmem:[#allocation9 + $0x658] sm:$0xff] }
 0x88e   :  { %v4581_v58 = vpack.c.bf16 %v2821_v13, %v2818_v59  ;;  %v7242_v1 = vld [vmem:[%s7280_s1 + $0x10] sm:$0xff] }
 0x88f   :  { %3323 = vmatmul.mubr.f32.vlgmr.msra.gmra.mrb[32].mxu1 %v7230_v33  ;;  %v2994_v59 = vld [vmem:[#allocation9 + $0x7f0] sm:$0xff]  ;;  %v2997_v13 = vld [vmem:[#allocation9 + $0x808] sm:$0xff] }
 0x890   :  { %4562 = vmatpush1.bf16.msra.mxu0 %v4561_v39  ;;  %4754 = vmatpush3.bf16.msra.mxu1 %v4753_v50  ;;  %v2922_v39 = vld [vmem:[#allocation9 + $0x5b0] sm:$0xff]  ;;  %v2827_v50 = vld [vmem:[#allocation9 + $0x2b8] sm:$0xff] }
 0x891   :  { %4564 = vmatprep.subr.bf16.mxu0 %v4563_v2  ;;  %4756 = vmatprep.subr.bf16.mxu1 %v4755_v24  ;;  %v4773_v2 = vpack.c.bf16 %v2871_v51, %v2868_v23  ;;  %v2831_v24 = vld [vmem:[#allocation9 + $0x2d8] sm:$0xff]  ;;  %v4775_v18 = vpack.c.bf16 %v2925_v16, %v2922_v39  ;;  %v4585_v40 = vpack.c.bf16 %v2827_v50, %v2824_v46  ;;  %v2946_v16 = vld [vmem:[#allocation9 + $0x670] sm:$0xff]  ;;  %v3000_v46 = vld [vmem:[#allocation9 + $0x820] sm:$0xff] }
 0x892   :  { %3392 = vmatprep.mubr.f32.mxu1 %v7236_v44  ;;  %v4789_v23 = vpack.c.bf16 %v2943_v31, %v2940_v26  ;;  %v4791_v39 = vpack.c.bf16 %v2997_v13, %v2994_v59  ;;  %v3003_v50 = vld [vmem:[#allocation9 + $0x838] sm:$0xff]  ;;  %v2973_v59 = vld [vmem:[#allocation9 + $0x748] sm:$0xff]  ;;  %v2882_v13 = vld [vmem:[#allocation9 + $0x470] sm:$0xff] }
 0x893   :  { %v2879_v26 = vld [vmem:[#allocation9 + $0x458] sm:$0xff] }
 0x894   :  { %4566 = vmatpush1.bf16.msra.mxu0 %v4565_v9  ;;  %4758 = vmatpush3.bf16.msra.mxu1 %v4757_v29  ;;  %v2928_v9 = vld [vmem:[#allocation9 + $0x5e0] sm:$0xff]  ;;  %v2830_v29 = vld [vmem:[#allocation9 + $0x2d0] sm:$0xff] }
 0x895   :  { %4568 = vmatprep.subr.bf16.mxu0 %v4567_v42  ;;  %4760 = vmatprep.subr.bf16.mxu1 %v4759_v10  ;;  %v2833_v42 = vld [vmem:[#allocation9 + $0x2e8] sm:$0xff]  ;;  %v4587_v10 = vpack.c.bf16 %v2834_v63, %v2831_v24  ;;  %v4779_v56 = vpack.c.bf16 %v2931_v36, %v2928_v9  ;;  %v4795_v63 = vpack.c.bf16 %v3003_v50, %v3000_v46  ;;  %v2952_v9 = vld [vmem:[#allocation9 + $0x6a0] sm:$0xff]  ;;  %v2955_v36 = vld [vmem:[#allocation9 + $0x6b8] sm:$0xff] }
 0x896   :  { %v4589_v30 = vpack.c.bf16 %v2833_v42, %v2830_v29  ;;  %v2857_v24 = vld [vmem:[#allocation9 + $0x3a8] sm:$0xff]  ;;  %v3006_v29 = vld [vmem:[#allocation9 + $0x850] sm:$0xff]  ;;  %v2888_v50 = vld [vmem:[#allocation9 + $0x4a0] sm:$0xff] }
 0x897   :  { %v3009_v42 = vld [vmem:[#allocation9 + $0x868] sm:$0xff] }
 0x898   :  { %4570 = vmatpush1.bf16.msra.mxu0 %v4569_v19  ;;  %4762 = vmatpush3.bf16.msra.mxu1 %v4761_v34  ;;  %v2982_v19 = vld [vmem:[#allocation9 + $0x790] sm:$0xff]  ;;  %v2836_v34 = vld [vmem:[#allocation9 + $0x300] sm:$0xff]  ;;  %v4799_v60 = vpack.c.bf16 %v3009_v42, %v3006_v29  ;;  %v2885_v46 = vld [vmem:[#allocation9 + $0x488] sm:$0xff] }
 0x899   :  { %4572 = vmatprep.subr.bf16.mxu0 %v4571_v49  ;;  %4764 = vmatprep.subr.bf16.mxu1 %v4763_v37  ;;  %v2839_v49 = vld [vmem:[#allocation9 + $0x318] sm:$0xff]  ;;  %v4591_v37 = vpack.c.bf16 %v2840_v15, %v2837_v25  ;;  %v4783_v61 = vpack.c.bf16 %v2985_v53, %v2982_v19  ;;  %v4797_v25 = vpack.c.bf16 %v2955_v36, %v2952_v9  ;;  %v2958_v15 = vld [vmem:[#allocation9 + $0x6d0] sm:$0xff]  ;;  %v2961_v19 = vld [vmem:[#allocation9 + $0x6e8] sm:$0xff] }
 0x89a   :  { %v4593_v27 = vpack.c.bf16 %v2839_v49, %v2836_v34  ;;  %v2870_v53 = vld [vmem:[#allocation9 + $0x410] sm:$0xff]  ;;  %v3015_v34 = vld [vmem:[#allocation9 + $0x898] sm:$0xff]  ;;  %v4801_v28 = vpack.c.bf16 %v2961_v19, %v2958_v15  ;;  %v2893_v42 = vld [vmem:[#allocation9 + $0x4c8] sm:$0xff] }
 0x89b   :  { %v7256_v36 = vld [vmem:[%s7280_s1 + $0x20] sm:$0xff]  ;;  %v2890_v29 = vld [vmem:[#allocation9 + $0x4b0] sm:$0xff] }
 0x89c   :  { %4574 = vmatpush1.bf16.msra.mxu0 %v4573_v11  ;;  %4766 = vmatpush3.bf16.msra.mxu1 %v4765_v0  ;;  %v2988_v11 = vld [vmem:[#allocation9 + $0x7c0] sm:$0xff]  ;;  %v2842_v0 = vld [vmem:[#allocation9 + $0x330] sm:$0xff] }
 0x89d   :  { %4576 = vmatprep.subr.bf16.mxu0 %v4575_v7  ;;  %4768 = vmatprep.subr.bf16.mxu1 %v4767_v48  ;;  %v2845_v7 = vld [vmem:[#allocation9 + $0x348] sm:$0xff]  ;;  %v4785_v48 = vpack.c.bf16 %v2937_v38, %v2934_v55  ;;  %v4787_v12 = vpack.c.bf16 %v2991_v4, %v2988_v11  ;;  %v2967_v11 = vld [vmem:[#allocation9 + $0x718] sm:$0xff]  ;;  %v2876_v4 = vld [vmem:[#allocation9 + $0x440] sm:$0xff] }
 0x89e   :  { %v2873_v55 = vld [vmem:[#allocation9 + $0x428] sm:$0xff]  ;;  %v2906_v15 = vld [vmem:[#allocation9 + $0x530] sm:$0xff] }
 0x8a0   :  { %4578 = vmatpush1.bf16.msra.mxu0 %v4577_v52  ;;  %4770 = vmatpush3.bf16.msra.mxu1 %v4769_v22  ;;  %v2852_v52 = vld [vmem:[#allocation9 + $0x380] sm:$0xff] }
 0x8a1   :  { %4580 = vmatprep.subr.bf16.mxu0 %v4579_v41  ;;  %4772 = vmatprep.subr.bf16.mxu1 %v4771_v8  ;;  %v7249_v22 = vld [vmem:[%s7280_s1 + $0x28] sm:$0xff]  ;;  %v4597_v41 = vpack.c.bf16 %v2845_v7, %v2842_v0  ;;  %v2851_v8 = vld [vmem:[#allocation9 + $0x378] sm:$0xff]  ;;  %v4599_v51 = vpack.c.bf16 %v2852_v52, %v2849_v17  ;;  %v4805_v17 = vpack.c.bf16 %v2967_v11, %v2964_v20  ;;  %v2970_v52 = vld [vmem:[#allocation9 + $0x730] sm:$0xff] }
 0x8a2   :  { %v3021_v0 = vld [vmem:[#allocation9 + $0x8c8] sm:$0xff]  ;;  %v2918_v20 = vld [vmem:[#allocation9 + $0x590] sm:$0xff] }
 0x8a4   :  { %4582 = vmatpush1.bf16.msra.mxu0 %v4581_v58  ;;  %4774 = vmatpush3.bf16.msra.mxu1 %v4773_v2  ;;  %v2858_v58 = vld [vmem:[#allocation9 + $0x3b0] sm:$0xff]  ;;  %v4601_v2 = vpack.c.bf16 %v2851_v8, %v2848_v35  ;;  %v3027_v35 = vld [vmem:[#allocation9 + $0x8f8] sm:$0xff] }
 0x8a5   :  { %4584 = vmatprep.subr.bf16.mxu0 %v4583_v5  ;;  %4776 = vmatprep.subr.bf16.mxu1 %v4775_v18  ;;  %v2854_v5 = vld [vmem:[#allocation9 + $0x390] sm:$0xff]  ;;  %v4603_v45 = vpack.c.bf16 %v2858_v58, %v2855_v43  ;;  %v4619_v43 = vpack.c.bf16 %v2882_v13, %v2879_v26  ;;  %v2979_v58 = vld [vmem:[#allocation9 + $0x778] sm:$0xff] }
 0x8a6   :  { %v2923_v26 = vld [vmem:[#allocation9 + $0x5b8] sm:$0xff] }
 0x8a8   :  { %4586 = vmatpush1.bf16.msra.mxu0 %v4585_v40  ;;  %4778 = vmatpush3.bf16.msra.mxu1 %v4777_v3  ;;  %v2864_v40 = vld [vmem:[#allocation9 + $0x3e0] sm:$0xff] }
 0x8a9   :  { %4588 = vmatprep.subr.bf16.mxu0 %v4587_v10  ;;  %4780 = vmatprep.subr.bf16.mxu1 %v4779_v56  ;;  %v2860_v3 = vld [vmem:[#allocation9 + $0x3c0] sm:$0xff]  ;;  %v2863_v10 = vld [vmem:[#allocation9 + $0x3d8] sm:$0xff]  ;;  %v4607_v56 = vpack.c.bf16 %v2864_v40, %v2861_v14 }
 0x8aa   :  { %v4609_v49 = vpack.c.bf16 %v2863_v10, %v2860_v3  ;;  %v2891_v14 = vld [vmem:[#allocation9 + $0x4b8] sm:$0xff]  ;;  %v2900_v3 = vld [vmem:[#allocation9 + $0x500] sm:$0xff]  ;;  %v4629_v10 = vpack.c.bf16 %v2893_v42, %v2890_v29  ;;  %v2954_v29 = vld [vmem:[#allocation9 + $0x6b0] sm:$0xff] }
 0x8ac   :  { %4590 = vmatpush1.bf16.msra.mxu0 %v4589_v30  ;;  %4782 = vmatpush3.bf16.msra.mxu1 %v4781_v21  ;;  %v3012_v30 = vld [vmem:[#allocation9 + $0x880] sm:$0xff]  ;;  %v2866_v21 = vld [vmem:[#allocation9 + $0x3f0] sm:$0xff] }
 0x8ad   :  { %4592 = vmatprep.subr.bf16.mxu0 %v4591_v37  ;;  %4784 = vmatprep.subr.bf16.mxu1 %v4783_v61  ;;  %v2869_v37 = vld [vmem:[#allocation9 + $0x408] sm:$0xff]  ;;  %v4611_v61 = vpack.c.bf16 %v2870_v53, %v2867_v6  ;;  %v4803_v38 = vpack.c.bf16 %v3015_v34, %v3012_v30  ;;  %v2899_v6 = vld [vmem:[#allocation9 + $0x4f8] sm:$0xff]  ;;  %v2902_v30 = vld [vmem:[#allocation9 + $0x510] sm:$0xff] }
 0x8ae   :  { %v4613_v7 = vpack.c.bf16 %v2869_v37, %v2866_v21  ;;  %v2905_v34 = vld [vmem:[#allocation9 + $0x528] sm:$0xff]  ;;  %v2912_v21 = vld [vmem:[#allocation9 + $0x560] sm:$0xff] }
 0x8af   :  { %3110 = vmatmul.mubr.f32.vlgmr.msra.gmra.mrb[16].mxu0 %v7230_v33  ;;  %3393 = vmatmul.mubr.f32.vlgmr.msra.gmra.mrb[34].mxu1 %v7242_v1  ;;  %v2949_v33 = vld [vmem:[#allocation9 + $0x688] sm:$0xff]  ;;  %v4637_v37 = vpack.c.bf16 %v2905_v34, %v2902_v30  ;;  %v2962_v34 = vld [vmem:[#allocation9 + $0x6f0] sm:$0xff] }
 0x8b0   :  { %4594 = vmatpush1.bf16.msra.mxu0 %v4593_v27  ;;  %4786 = vmatpush3.bf16.msra.mxu1 %v4785_v48  ;;  %v4793_v18 = vpack.c.bf16 %v2949_v33, %v2946_v16  ;;  %v3018_v27 = vld [vmem:[#allocation9 + $0x8b0] sm:$0xff]  ;;  %v2872_v48 = vld [vmem:[#allocation9 + $0x420] sm:$0xff] }
 0x8b1   :  { %4596 = vmatprep.subr.bf16.mxu0 %v4595_v54  ;;  %4788 = vmatprep.subr.bf16.mxu1 %v4787_v12  ;;  %v2875_v54 = vld [vmem:[#allocation9 + $0x438] sm:$0xff]  ;;  %v4615_v12 = vpack.c.bf16 %v2876_v4, %v2873_v55  ;;  %v4807_v31 = vpack.c.bf16 %v3021_v0, %v3018_v27  ;;  %v2976_v33 = vld [vmem:[#allocation9 + $0x760] sm:$0xff]  ;;  %v2914_v27 = vld [vmem:[#allocation9 + $0x570] sm:$0xff] }
 0x8b2   :  { %3180 = vmatprep.mubr.f32.mxu0 %v7236_v44  ;;  %3462 = vmatprep.mubr.f32.mxu1 %v7249_v22  ;;  %v4605_v44 = vpack.c.bf16 %v2857_v24, %v2854_v5  ;;  %v4617_v8 = vpack.c.bf16 %v2875_v54, %v2872_v48  ;;  %v4813_v5 = vpack.c.bf16 %v2979_v58, %v2976_v33  ;;  %v2911_v55 = vld [vmem:[#allocation9 + $0x558] sm:$0xff]  ;;  %v2917_v0 = vld [vmem:[#allocation9 + $0x588] sm:$0xff]  ;;  %v2924_v48 = vld [vmem:[#allocation9 + $0x5c0] sm:$0xff] }
 0x8b3   :  { %v4623_v24 = vpack.c.bf16 %v2888_v50, %v2885_v46  ;;  %v4645_v54 = vpack.c.bf16 %v2917_v0, %v2914_v27  ;;  %v2939_v33 = vld [vmem:[#allocation9 + $0x638] sm:$0xff]  ;;  %v2942_v58 = vld [vmem:[#allocation9 + $0x650] sm:$0xff] }
 0x8b4   :  { %4598 = vmatpush1.bf16.msra.mxu0 %v4597_v41  ;;  %4790 = vmatpush3.bf16.msra.mxu1 %v4789_v23  ;;  %v3024_v41 = vld [vmem:[#allocation9 + $0x8e0] sm:$0xff]  ;;  %v2878_v23 = vld [vmem:[#allocation9 + $0x450] sm:$0xff]  ;;  %v4659_v50 = vpack.c.bf16 %v2942_v58, %v2939_v33  ;;  %v2995_v33 = vld [vmem:[#allocation9 + $0x7f8] sm:$0xff] }
 0x8b5   :  { %4600 = vmatprep.subr.bf16.mxu0 %v4599_v51  ;;  %4792 = vmatprep.subr.bf16.mxu1 %v4791_v39  ;;  %v4809_v51 = vpack.c.bf16 %v2973_v59, %v2970_v52  ;;  %v2881_v39 = vld [vmem:[#allocation9 + $0x468] sm:$0xff]  ;;  %v4811_v16 = vpack.c.bf16 %v3027_v35, %v3024_v41  ;;  %v2930_v52 = vld [vmem:[#allocation9 + $0x5f0] sm:$0xff]  ;;  %v2999_v58 = vld [vmem:[#allocation9 + $0x818] sm:$0xff] }
 0x8b6   :  { %v2926_v41 = vld [vmem:[#allocation9 + $0x5d0] sm:$0xff]  ;;  %v2929_v35 = vld [vmem:[#allocation9 + $0x5e8] sm:$0xff] }
 0x8b7   :  { %v2974_v0 = vld [vmem:[#allocation9 + $0x750] sm:$0xff] }
 0x8b8   :  { %4602 = vmatpush1.bf16.msra.mxu0 %v4601_v2  ;;  %4794 = vmatpush3.bf16.msra.mxu1 %v4793_v18  ;;  %v4621_v2 = vpack.c.bf16 %v2881_v39, %v2878_v23  ;;  %v2884_v18 = vld [vmem:[#allocation9 + $0x480] sm:$0xff] }
 0x8b9   :  { %4604 = vmatprep.subr.bf16.mxu0 %v4603_v45  ;;  %4796 = vmatprep.subr.bf16.mxu1 %v4795_v63  ;;  %v2887_v45 = vld [vmem:[#allocation9 + $0x498] sm:$0xff]  ;;  %v2894_v63 = vld [vmem:[#allocation9 + $0x4d0] sm:$0xff]  ;;  %v2936_v23 = vld [vmem:[#allocation9 + $0x620] sm:$0xff] }
 0x8ba   :  { %v4625_v9 = vpack.c.bf16 %v2887_v45, %v2884_v18  ;;  %v4627_v40 = vpack.c.bf16 %v2894_v63, %v2891_v14  ;;  %v2932_v39 = vld [vmem:[#allocation9 + $0x600] sm:$0xff] }
 0x8bb   :  { %v2948_v18 = vld [vmem:[#allocation9 + $0x680] sm:$0xff] }
 0x8bc   :  { %4606 = vmatpush1.bf16.msra.mxu0 %v4605_v44  ;;  %4798 = vmatpush3.bf16.msra.mxu1 %v4797_v25  ;;  %v2897_v44 = vld [vmem:[#allocation9 + $0x4e8] sm:$0xff]  ;;  %v2944_v63 = vld [vmem:[#allocation9 + $0x660] sm:$0xff] }
 0x8bd   :  { %4608 = vmatprep.subr.bf16.mxu0 %v4607_v56  ;;  %4800 = vmatprep.subr.bf16.mxu1 %v4799_v60  ;;  %v4631_v25 = vpack.c.bf16 %v2900_v3, %v2897_v44  ;;  %v2896_v56 = vld [vmem:[#allocation9 + $0x4e0] sm:$0xff]  ;;  %v2903_v60 = vld [vmem:[#allocation9 + $0x518] sm:$0xff]  ;;  %v2950_v3 = vld [vmem:[#allocation9 + $0x690] sm:$0xff] }
 0x8be   :  { %v4633_v19 = vpack.c.bf16 %v2899_v6, %v2896_v56  ;;  %v4635_v53 = vpack.c.bf16 %v2906_v15, %v2903_v60  ;;  %v2960_v56 = vld [vmem:[#allocation9 + $0x6e0] sm:$0xff]  ;;  %v2963_v15 = vld [vmem:[#allocation9 + $0x6f8] sm:$0xff] }
 0x8bf   :  { %v2956_v60 = vld [vmem:[#allocation9 + $0x6c0] sm:$0xff] }
 0x8c0   :  { %4610 = vmatpush1.bf16.msra.mxu0 %v4609_v49  ;;  %4802 = vmatpush3.bf16.msra.mxu1 %v4801_v28  ;;  %v2909_v49 = vld [vmem:[#allocation9 + $0x548] sm:$0xff] }
 0x8c1   :  { %4612 = vmatprep.subr.bf16.mxu0 %v4611_v61  ;;  %4804 = vmatprep.subr.bf16.mxu1 %v4803_v38  ;;  %v4639_v28 = vpack.c.bf16 %v2912_v21, %v2909_v49  ;;  %v2908_v61 = vld [vmem:[#allocation9 + $0x540] sm:$0xff]  ;;  %v2915_v38 = vld [vmem:[#allocation9 + $0x578] sm:$0xff]  ;;  %v2965_v49 = vld [vmem:[#allocation9 + $0x708] sm:$0xff] }
 0x8c2   :  { %v4641_v11 = vpack.c.bf16 %v2911_v55, %v2908_v61  ;;  %v4643_v4 = vpack.c.bf16 %v2918_v20, %v2915_v38  ;;  %v2969_v21 = vld [vmem:[#allocation9 + $0x728] sm:$0xff]  ;;  %v2968_v55 = vld [vmem:[#allocation9 + $0x720] sm:$0xff]  ;;  %v2971_v38 = vld [vmem:[#allocation9 + $0x738] sm:$0xff] }
 0x8c3   :  { %v2975_v20 = vld [vmem:[#allocation9 + $0x758] sm:$0xff] }
 0x8c4   :  { %4614 = vmatpush1.bf16.msra.mxu0 %v4613_v7  ;;  %4806 = vmatpush3.bf16.msra.mxu1 %v4805_v17  ;;  %v2921_v7 = vld [vmem:[#allocation9 + $0x5a8] sm:$0xff] }
 0x8c5   :  { %4616 = vmatprep.subr.bf16.mxu0 %v4615_v12  ;;  %4808 = vmatprep.subr.bf16.mxu1 %v4807_v31  ;;  %v4647_v17 = vpack.c.bf16 %v2924_v48, %v2921_v7  ;;  %v2920_v12 = vld [vmem:[#allocation9 + $0x5a0] sm:$0xff]  ;;  %v2927_v31 = vld [vmem:[#allocation9 + $0x5d8] sm:$0xff]  ;;  %v2977_v7 = vld [vmem:[#allocation9 + $0x768] sm:$0xff] }
 0x8c6   :  { %v4649_v59 = vpack.c.bf16 %v2923_v26, %v2920_v12  ;;  %v4651_v13 = vpack.c.bf16 %v2930_v52, %v2927_v31  ;;  %v2981_v48 = vld [vmem:[#allocation9 + $0x788] sm:$0xff]  ;;  %v2980_v26 = vld [vmem:[#allocation9 + $0x780] sm:$0xff]  ;;  %v2983_v31 = vld [vmem:[#allocation9 + $0x798] sm:$0xff] }
 0x8c7   :  { %v2987_v52 = vld [vmem:[#allocation9 + $0x7b8] sm:$0xff] }
 0x8c8   :  { %4618 = vmatpush1.bf16.msra.mxu0 %v4617_v8  ;;  %4810 = vmatpush3.bf16.msra.mxu1 %v4809_v51  ;;  %v2933_v8 = vld [vmem:[#allocation9 + $0x608] sm:$0xff]  ;;  %v4653_v51 = vpack.c.bf16 %v2929_v35, %v2926_v41  ;;  %v2986_v35 = vld [vmem:[#allocation9 + $0x7b0] sm:$0xff] }
 0x8c9   :  { %4620 = vmatprep.subr.bf16.mxu0 %v4619_v43  ;;  %4812 = vmatprep.subr.bf16.mxu1 %v4811_v16  ;;  %v4655_v43 = vpack.c.bf16 %v2936_v23, %v2933_v8  ;;  %v2935_v16 = vld [vmem:[#allocation9 + $0x618] sm:$0xff]  ;;  %v2989_v8 = vld [vmem:[#allocation9 + $0x7c8] sm:$0xff] }
 0x8ca   :  { %v4657_v46 = vpack.c.bf16 %v2935_v16, %v2932_v39  ;;  %v2993_v23 = vld [vmem:[#allocation9 + $0x7e8] sm:$0xff]  ;;  %v2992_v16 = vld [vmem:[#allocation9 + $0x7e0] sm:$0xff] }
 0x8cc   :  { %4622 = vmatpush1.bf16.msra.mxu0 %v4621_v2  ;;  %4814 = vmatpush3.bf16.msra.mxu1 %v4813_v5  ;;  %v2938_v2 = vld [vmem:[#allocation9 + $0x630] sm:$0xff]  ;;  %v2941_v5 = vld [vmem:[#allocation9 + $0x648] sm:$0xff] }
 0x8cd   :  { %4624 = vmatprep.subr.bf16.mxu0 %v4623_v24  ;;  %v2945_v24 = vld [vmem:[#allocation9 + $0x668] sm:$0xff]  ;;  %v4661_v45 = vpack.c.bf16 %v2941_v5, %v2938_v2  ;;  %v2998_v5 = vld [vmem:[#allocation9 + $0x810] sm:$0xff] }
 0x8ce   :  { %v4663_v14 = vpack.c.bf16 %v2948_v18, %v2945_v24  ;;  %v3001_v24 = vld [vmem:[#allocation9 + $0x828] sm:$0xff] }
 0x8cf   :  { %3463 = vmatmul.mubr.f32.vlgmr.msra.gmra.mrb[36].mxu1 %v7256_v36  ;;  %v3005_v18 = vld [vmem:[#allocation9 + $0x848] sm:$0xff] }
 0x8d0   :  { %4626 = vmatpush1.bf16.msra.mxu0 %v4625_v9  ;;  %v2947_v9 = vld [vmem:[#allocation9 + $0x678] sm:$0xff] }
 0x8d1   :  { %4628 = vmatprep.subr.bf16.mxu0 %v4627_v40  ;;  %v2951_v40 = vld [vmem:[#allocation9 + $0x698] sm:$0xff]  ;;  %v4665_v42 = vpack.c.bf16 %v2947_v9, %v2944_v63  ;;  %v3004_v9 = vld [vmem:[#allocation9 + $0x840] sm:$0xff] }
 0x8d2   :  { %v4667_v44 = vpack.c.bf16 %v2954_v29, %v2951_v40  ;;  %v3007_v40 = vld [vmem:[#allocation9 + $0x858] sm:$0xff] }
 0x8d3   :  { %v3011_v29 = vld [vmem:[#allocation9 + $0x878] sm:$0xff] }
 0x8d4   :  { %4630 = vmatpush1.bf16.msra.mxu0 %v4629_v10  ;;  %v2953_v10 = vld [vmem:[#allocation9 + $0x6a8] sm:$0xff] }
 0x8d5   :  { %4632 = vmatprep.subr.bf16.mxu0 %v4631_v25  ;;  %v2957_v25 = vld [vmem:[#allocation9 + $0x6c8] sm:$0xff] }
 0x8d6   :  { %v4671_v6 = vpack.c.bf16 %v2960_v56, %v2957_v25  ;;  %v3013_v25 = vld [vmem:[#allocation9 + $0x888] sm:$0xff] }
 0x8d7   :  { %v3017_v56 = vld [vmem:[#allocation9 + $0x8a8] sm:$0xff] }
 0x8d8   :  { %4634 = vmatpush1.bf16.msra.mxu0 %v4633_v19  ;;  %v2966_v19 = vld [vmem:[#allocation9 + $0x710] sm:$0xff] }
 0x8d9   :  { %4636 = vmatprep.subr.bf16.mxu0 %v4635_v53  ;;  %v4675_v30 = vpack.c.bf16 %v2966_v19, %v2963_v15  ;;  %v3019_v15 = vld [vmem:[#allocation9 + $0x8b8] sm:$0xff] }
 0x8da   :  { %v3023_v19 = vld [vmem:[#allocation9 + $0x8d8] sm:$0xff] }
 0x8dc   :  { %4638 = vmatpush1.bf16.msra.mxu0 %v4637_v37  ;;  %v2972_v37 = vld [vmem:[#allocation9 + $0x740] sm:$0xff] }
 0x8dd   :  { %4640 = vmatprep.subr.bf16.mxu0 %v4639_v28  ;;  %v4677_v28 = vpack.c.bf16 %v2965_v49, %v2962_v34  ;;  %v4679_v61 = vpack.c.bf16 %v2972_v37, %v2969_v21  ;;  %v3022_v49 = vld [vmem:[#allocation9 + $0x8d0] sm:$0xff]  ;;  %v3025_v21 = vld [vmem:[#allocation9 + $0x8e8] sm:$0xff] }
 0x8de   :  { %v4717_v37 = vpack.c.bf16 %v3025_v21, %v3022_v49 }
 0x8e0   :  { %4642 = vmatpush1.bf16.msra.mxu0 %v4641_v11  ;;  %v2978_v11 = vld [vmem:[#allocation9 + $0x770] sm:$0xff] }
 0x8e1   :  { %4644 = vmatprep.subr.bf16.mxu0 %v4643_v4  ;;  %v4681_v4 = vpack.c.bf16 %v2971_v38, %v2968_v55  ;;  %v4683_v27 = vpack.c.bf16 %v2978_v11, %v2975_v20  ;;  %v7297_v11 = vld [vmem:[#allocation16_spill] sm:$0xff] }
 0x8e4   :  { %4646 = vmatpush1.bf16.msra.mxu0 %v4645_v54  ;;  %v2984_v54 = vld [vmem:[#allocation9 + $0x7a0] sm:$0xff] }
 0x8e5   :  { %4648 = vmatprep.subr.bf16.mxu0 %v4647_v17  ;;  %v4685_v17 = vpack.c.bf16 %v2977_v7, %v2974_v0  ;;  %v4687_v12 = vpack.c.bf16 %v2984_v54, %v2981_v48 }
 0x8e8   :  { %4650 = vmatpush1.bf16.msra.mxu0 %v4649_v59  ;;  %v2990_v59 = vld [vmem:[#allocation9 + $0x7d0] sm:$0xff] }
 0x8e9   :  { %4652 = vmatprep.subr.bf16.mxu0 %v4651_v13  ;;  %v4689_v13 = vpack.c.bf16 %v2983_v31, %v2980_v26  ;;  %v4691_v41 = vpack.c.bf16 %v2990_v59, %v2987_v52 }
 0x8ec   :  { %4654 = vmatpush1.bf16.msra.mxu0 %v4653_v51  ;;  %v2996_v51 = vld [vmem:[#allocation9 + $0x800] sm:$0xff] }
 0x8ed   :  { %4656 = vmatprep.subr.bf16.mxu0 %v4655_v43  ;;  %v4693_v43 = vpack.c.bf16 %v2989_v8, %v2986_v35  ;;  %v4695_v39 = vpack.c.bf16 %v2996_v51, %v2993_v23 }
 0x8ef   :  { %3181 = vmatmul.mubr.f32.vlgmr.msra.gmra.mrb[16].mxu0 %v7242_v1  ;;  %v4669_v1 = vpack.c.bf16 %v2953_v10, %v2950_v3  ;;  %v3010_v10 = vld [vmem:[#allocation9 + $0x870] sm:$0xff] }
 0x8f0   :  { %4658 = vmatpush1.bf16.msra.mxu0 %v4657_v46  ;;  %3251 = vmatprep.mubr.f32.mxu0 %v7249_v22  ;;  %v2959_v22 = vld [vmem:[#allocation9 + $0x6d8] sm:$0xff]  ;;  %v3002_v46 = vld [vmem:[#allocation9 + $0x830] sm:$0xff] }
 0x8f1   :  { %4660 = vmatprep.subr.bf16.mxu0 %v4659_v50  ;;  %v4673_v53 = vpack.c.bf16 %v2959_v22, %v2956_v60  ;;  %v4697_v50 = vpack.c.bf16 %v2995_v33, %v2992_v16  ;;  %v4699_v2 = vpack.c.bf16 %v3002_v46, %v2999_v58  ;;  %v3016_v22 = vld [vmem:[#allocation9 + $0x8a0] sm:$0xff] }
 0x8f2   :  { %v3028_v16 = vld [vmem:[#allocation10] sm:$0x7]  ;;  %v7298_v33 = vld [vmem:[#allocation15_spill] sm:$0xff] }
 0x8f3   :  { %v7299_v58 = vsub.s32 2, %v7298_v33 }
 0x8f4   :  { %4662 = vmatpush1.bf16.msra.mxu0 %v4661_v45  ;;  %v3008_v45 = vld [vmem:[#allocation9 + $0x860] sm:$0xff] }
 0x8f5   :  { %4664 = vmatprep.subr.bf16.mxu0 %v4663_v14  ;;  %v4701_v14 = vpack.c.bf16 %v3001_v24, %v2998_v5  ;;  %v4703_v63 = vpack.c.bf16 %v3008_v45, %v3005_v18  ;;  %v3041_v46 = vrot.slane %v3028_v16, %v7299_v58 }
 0x8f8   :  { %4666 = vmatpush1.bf16.msra.mxu0 %v4665_v42  ;;  %v3014_v42 = vld [vmem:[#allocation9 + $0x890] sm:$0xff] }
 0x8f9   :  { %4668 = vmatprep.subr.bf16.mxu0 %v4667_v44  ;;  %v4705_v44 = vpack.c.bf16 %v3007_v40, %v3004_v9  ;;  %v4707_v3 = vpack.c.bf16 %v3014_v42, %v3011_v29  ;;  %v7300_v9 = vsub.s32 0, %v7298_v33 }
 0x8fb   :  { %v3033_v40 = vrot.slane %v3028_v16, %v7300_v9 }
 0x8fc   :  { %4670 = vmatpush1.bf16.msra.mxu0 %v4669_v1  ;;  %v3020_v1 = vld [vmem:[#allocation9 + $0x8c0] sm:$0xff] }
 0x8fd   :  { %4672 = vmatprep.subr.bf16.mxu0 %v4671_v6  ;;  %v4709_v6 = vpack.c.bf16 %v3013_v25, %v3010_v10  ;;  %v4711_v60 = vpack.c.bf16 %v3020_v1, %v3017_v56 }
 0x900   :  { %4674 = vmatpush1.bf16.msra.mxu0 %v4673_v53  ;;  %v3026_v53 = vld [vmem:[#allocation9 + $0x8f0] sm:$0xff] }
 0x901   :  { %4676 = vmatprep.subr.bf16.mxu0 %v4675_v30  ;;  %v4713_v30 = vpack.c.bf16 %v3019_v15, %v3016_v22  ;;  %v4715_v34 = vpack.c.bf16 %v3026_v53, %v3023_v19 }
 0x904   :  { %4678 = vmatpush1.bf16.msra.mxu0 %v4677_v28 }
 0x905   :  { %4680 = vmatprep.subr.bf16.mxu0 %v4679_v61 }
 0x908   :  { %4682 = vmatpush1.bf16.msra.mxu0 %v4681_v4 }
 0x909   :  { %4684 = vmatprep.subr.bf16.mxu0 %v4683_v27 }
 0x90c   :  { %4686 = vmatpush1.bf16.msra.mxu0 %v4685_v17 }
 0x90d   :  { %4688 = vmatprep.subr.bf16.mxu0 %v4687_v12 }
 0x910   :  { %4690 = vmatpush1.bf16.msra.mxu0 %v4689_v13 }
 0x911   :  { %4692 = vmatprep.subr.bf16.mxu0 %v4691_v41 }
 0x914   :  { %4694 = vmatpush1.bf16.msra.mxu0 %v4693_v43 }
 0x915   :  { %4696 = vmatprep.subr.bf16.mxu0 %v4695_v39 }
 0x918   :  { %4698 = vmatpush1.bf16.msra.mxu0 %v4697_v50 }
 0x919   :  { %4700 = vmatprep.subr.bf16.mxu0 %v4699_v2 }
 0x91c   :  { %4702 = vmatpush1.bf16.msra.mxu0 %v4701_v14 }
 0x91d   :  { %4704 = vmatprep.subr.bf16.mxu0 %v4703_v63 }
 0x920   :  { %4706 = vmatpush1.bf16.msra.mxu0 %v4705_v44  ;;  %v7301_v44 = vsub.s32 1, %v7298_v33 }
 0x921   :  { %4708 = vmatprep.subr.bf16.mxu0 %v4707_v3 }
 0x922   :  { %v3037_v3 = vrot.slane %v3028_v16, %v7301_v44 }
 0x924   :  { %4710 = vmatpush1.bf16.msra.mxu0 %v4709_v6 }
 0x925   :  { %4712 = vmatprep.subr.bf16.mxu0 %v4711_v60 }
 0x928   :  { %4714 = vmatpush1.bf16.msra.mxu0 %v4713_v30 }
 0x929   :  { %4716 = vmatprep.subr.bf16.mxu0 %v4715_v34 }
 0x92c   :  { %4718 = vmatpush1.bf16.msra.mxu0 %v4717_v37 }
 0x92f   :  { %3252 = vmatmul.mubr.f32.vlgmr.msra.gmra.mrb[16].mxu0 %v7256_v36 }
 0x942   :  { %v2625_v28 = vpop.f32.mrb[14].mxu0  ;;  %v2696_v61 = vpop.f32.mrb[30].mxu1 }
 0x943   :  { %v4844_v55 = vadd.f32 %v2625_v28, %v6945_v62  ;;  %v2627_v38 = vpop.f32.mrb[15].mxu0  ;;  %v2698_v20 = vpop.f32.mrb[31].mxu1  ;;  %v4861_v7 = vadd.f32 %v2696_v61, %v6964_v32 }
 0x944   :  { %v4846_v4 = vadd.f32 %v2627_v38, %v7297_v11  ;;  %v4862_v48 = vadd.f32 %v2698_v20, %v6967_v47 }
 0x945   :  { %v3521_v27 = vmul.f32 -1.442695, %v4844_v55  ;;  %v3523_v54 = vmul.f32 -1.442695, %v4861_v7 }
 0x946   :  { %v3522_v0 = vmul.f32 -1.442695, %v4846_v4 }
 0x947   :  { %5070 = vpow2.f32 %v3521_v27 }
 0x948   :  { %5072 = vpow2.f32 %v3522_v0 }
 0x949   :  { %5074 = vtanh.f32 %v4862_v48 }
 0x94a   :  { %5076 = vpow2.f32 %v3523_v54 }
 0x951   :  { %v5071_v17 = vpop.eup %5070 }
 0x952   :  { %v2714_v12 = vadd.f32 1.0, %v5071_v17  ;;  %v5073_v36 = vpop.eup %5072 }
 0x953   :  { %v2715_v62 = vadd.f32 1.0, %v5073_v36  ;;  %v5075_v26 = vpop.eup %5074 }
 0x954   :  { %5078 = vrcp.f32 %v2714_v12  ;;  %v5077_v31 = vpop.eup %5076 }
 0x955   :  { %5080 = vrcp.f32 %v2715_v62  ;;  %v2716_v41 = vadd.f32 1.0, %v5077_v31 }
 0x957   :  { %5082 = vrcp.f32 %v2716_v41 }
 0x95e   :  { %v5079_v52 = vpop.eup %5078 }
 0x95f   :  { %v2725_v59 = vmul.f32 %v5079_v52, %v5075_v26  ;;  %v5081_v13 = vpop.eup %5080 }
 0x960   :  { %v2724_v35 = vmul.f32 %v5081_v13, %v7221_v57 }
 0x961   :  { %v5083_v51 = vpop.eup %5082 }
 0x962   :  { %v3558_v32 = vpop.f32.mrb[32].mxu1  ;;  %v2726_v8 = vadd.f32 %v2725_v59, %v2724_v35 }
 0x963   :  { %v3559_v47 = vpop.f32.mrb[33].mxu1 }
 0x964   :  { %v3560_v23 = vadd.f32 %v3559_v47, %v3558_v32  ;;  %5084 = vtanh.f32 %v2726_v8 }
 0x966   :  { %v3325_v50 = vadd.f32 %v3560_v23, %v3041_v46 }
 0x96e   :  { %v5085_v43 = vpop.eup %5084 }
 0x96f   :  { %v2728_v39 = vmul.f32 %v5085_v43, %v5083_v51 }
 0x971   :  { %3484 = vst [vmem:[%s7286_s7] sm:$0xff] %v2728_v39 }
 0x982   :  { %v3593_v2 = vpop.f32.mrb[34].mxu1 }
 0x983   :  { %v3594_v57 = vpop.f32.mrb[35].mxu1 }
 0x984   :  { %v3595_v5 = vadd.f32 %v3594_v57, %v3593_v2 }
 0x986   :  { %v3395_v24 = vadd.f32 %v3595_v5, %v3325_v50 }
 0x9a2   :  { %v3628_v18 = vpop.f32.mrb[36].mxu1 }
 0x9a3   :  { %v3629_v45 = vpop.f32.mrb[37].mxu1 }
 0x9a4   :  { %v3630_v14 = vadd.f32 %v3629_v45, %v3628_v18 }
 0x9a6   :  { %v3465_v63 = vadd.f32 %v3630_v14, %v3395_v24 }
 0xa02   :  { %v3253_v29 = vpop.f32.mrb[16].mxu0 }
 0xa03   :  { %v4863_v42 = vadd.f32 %v3253_v29, %v3033_v40  ;;  %v3255_v10 = vpop.f32.mrb[17].mxu0 }
 0xa04   :  { %v4864_v56 = vadd.f32 %v3255_v10, %v3037_v3 }
 0xa05   :  { %v3524_v25 = vmul.f32 -1.442695, %v4863_v42 }
 0xa06   :  { %v3525_v1 = vmul.f32 -1.442695, %v4864_v56 }
 0xa07   :  { %5086 = vpow2.f32 %v3524_v25 }
 0xa08   :  { %5088 = vpow2.f32 %v3525_v1 }
 0xa09   :  { %5090 = vtanh.f32 %v3465_v63 }
 0xa11   :  { %v5087_v6 = vpop.eup %5086 }
 0xa12   :  { %v3474_v60 = vadd.f32 1.0, %v5087_v6  ;;  %v5089_v22 = vpop.eup %5088 }
 0xa13   :  { %v3475_v15 = vadd.f32 1.0, %v5089_v22  ;;  %v5091_v19 = vpop.eup %5090 }
 0xa14   :  { %5092 = vrcp.f32 %v3474_v60 }
 0xa15   :  { %5094 = vrcp.f32 %v3475_v15 }
 0xa1e   :  { %v5093_v53 = vpop.eup %5092 }
 0xa1f   :  { %v3481_v30 = vmul.f32 %v5093_v53, %v5091_v19  ;;  %v5095_v34 = vpop.eup %5094 }
 0xa21   :  { %5096 = vtanh.f32 %v3481_v30 }
 0xa2b   :  { %v5097_v49 = vpop.eup %5096 }
 0xa2c   :  { %v3483_v21 = vmul.f32 %v5097_v49, %v5095_v34 }
 0xa2e   :  { %3485 = vst [vmem:[%s7286_s7 + $0x8] sm:$0xff] %v3483_v21 }
 0xa2f   :  { %3490 = vsyncpa [#allocation6], 1 }
 0xa30   :  { %3491 = vsyncpa [#allocation8], 1 }
 0xa31   :  { %3492 = vsyncpa [#allocation11], 1 }

</bundles_post_ra>
